<compile_context>
chip_gen: v7x
topology: tpu7x:2x2x1
jax: 0.10.0
libtpu: 0.0.40
codegen_flags: <defaults>
</compile_context>

<pallas_src>
import functools

import jax
import jax.numpy as jnp
from jax.experimental import pallas as pl
from jax.experimental.pallas import tpu as pltpu


def _round_up(v, m):
    return (v + m - 1) // m * m


# ----------------------------------------------------------------------------
# Conv layer = im2col (strided slices, NHWC) + Pallas matmul with K-split
# accumulation and fused bias + relu + BatchNorm(eval) epilogue.
# ----------------------------------------------------------------------------
def _conv_mm_kernel(p_ref, w_ref, aux_ref, o_ref, acc_ref):
    kq = pl.program_id(2)

    @pl.when(kq == 0)
    def _():
        acc_ref[...] = jnp.zeros_like(acc_ref)

    # bf16 operands, f32 accumulate on the MXU.
    acc_ref[...] += jnp.dot(p_ref[...], w_ref[...],
                            preferred_element_type=jnp.float32)

    @pl.when(kq == pl.num_programs(2) - 1)
    def _():
        acc = jnp.maximum(acc_ref[...] + aux_ref[0:1, :], 0.0)   # bias + relu
        acc = acc * aux_ref[1:2, :] + aux_ref[2:3, :]            # BN (eval)
        o_ref[...] = acc.astype(o_ref.dtype)                     # bf16 store


def _im2col_nhwc(x, k, stride, pad):
    # x: (N, H, W, C) -> patches (N*OH*OW, k*k*C), features ordered (kh, kw, C)
    # (lane-dense along C).  Built from k*k strided slices + concat instead of
    # a 6-D gather: lowers to contiguous copies, no full relayout.
    n, h, w, c = x.shape
    xp = jnp.pad(x, ((0, 0), (pad, pad), (pad, pad), (0, 0)))
    oh = (h + 2 * pad - k) // stride + 1
    ow = (w + 2 * pad - k) // stride + 1
    cols = []
    for kh in range(k):
        for kw in range(k):
            sl = jax.lax.slice(
                xp,
                (0, kh, kw, 0),
                (n, kh + (oh - 1) * stride + 1, kw + (ow - 1) * stride + 1, c),
                (1, stride, stride, 1))
            cols.append(sl.reshape(n * oh * ow, c))
    return jnp.concatenate(cols, axis=1), oh, ow


def conv2d_relu_bn(x_nhwc, w, b, bn_scale, bn_shift, *, k=5, stride=2, pad=2):
    n = x_nhwc.shape[0]
    cin = x_nhwc.shape[-1]
    cout = w.shape[0]

    # TODO(synk): patches are still materialized in HBM; a fully in-kernel
    #             (manual DMA) im2col would remove this traffic entirely.
    patches, oh, ow = _im2col_nhwc(x_nhwc.astype(jnp.bfloat16), k, stride, pad)
    rows, kk = patches.shape

    cout_p = _round_up(cout, 128)                 # lane-dense output stores
    kk_p = _round_up(kk, 256)                     # full MXU K passes (v6e/v7x)
    tk = kk_p if kk_p <= 512 else (512 if kk_p % 512 == 0 else 256)

    tm = min(512, _round_up(rows, 8))
    rows_p = _round_up(rows, tm)
    tn = min(cout_p, 256)
    # Guarantee >= 2 grid points on a "parallel" axis (v7x has 2 TensorCores).
    if (rows_p // tm) * (cout_p // tn) < 2 and cout_p > 128:
        tn = 128
    while (rows_p // tm) * (cout_p // tn) < 2 and tm > 8:
        tm = _round_up(tm // 2, 8)
        rows_p = _round_up(rows, tm)

    if rows_p != rows or kk_p != kk:
        patches = jnp.pad(patches, ((0, rows_p - rows), (0, kk_p - kk)))

    # torch weight (Cout, Cin, KH, KW) -> (KH*KW*Cin, Cout) matching (kh,kw,C)
    wm = jnp.transpose(w, (2, 3, 1, 0)).reshape(k * k * cin, cout)
    aux = jnp.stack([b, bn_scale, bn_shift]).astype(jnp.float32)   # (3, Cout)
    if cout_p != cout or kk_p != kk:
        wm = jnp.pad(wm, ((0, kk_p - kk), (0, cout_p - cout)))
        aux = jnp.pad(aux, ((0, 0), (0, cout_p - cout)))
    wm = wm.astype(jnp.bfloat16)

    out = pl.pallas_call(
        _conv_mm_kernel,
        out_shape=jax.ShapeDtypeStruct((rows_p, cout_p), jnp.bfloat16),
        grid_spec=pltpu.PrefetchScalarGridSpec(
            num_scalar_prefetch=0,
            grid=(rows_p // tm, cout_p // tn, kk_p // tk),
            in_specs=[
                pl.BlockSpec((tm, tk), lambda i, j, kq: (i, kq)),
                pl.BlockSpec((tk, tn), lambda i, j, kq: (kq, j)),
                pl.BlockSpec((3, tn), lambda i, j, kq: (0, j)),
            ],
            out_specs=pl.BlockSpec((tm, tn), lambda i, j, kq: (i, j)),
            scratch_shapes=[pltpu.VMEM((tm, tn), jnp.float32)],
        ),
        compiler_params=pltpu.CompilerParams(
            dimension_semantics=("parallel", "parallel", "arbitrary"),
            vmem_limit_bytes=32 * 1024 * 1024),   # explicit budget (v7x: 64 MiB phys)
    )(patches, wm, aux)

    out = out[:rows, :cout]
    return out.reshape(n, oh, ow, cout)           # stay NHWC (bf16) for next layer


# ----------------------------------------------------------------------------
# Global average pooling over (H, W)  (x.mean((-1, -2)) in torch)
# ----------------------------------------------------------------------------
def _gap_kernel(x_ref, o_ref):
    o_ref[...] = jnp.mean(x_ref[...].astype(jnp.float32), axis=1)


def global_avg_pool(x_nhwc):
    n, h, w, c = x_nhwc.shape
    s = h * w
    if s == 1:                       # conv4 output is 1x1 here: pooling = reshape
        return x_nhwc.reshape(n, c)
    x = x_nhwc.reshape(n, s, c)      # NHWC already: no transpose needed
    bt = min(_round_up(n, 8), 128)
    n_p = _round_up(n, bt)
    if n_p != n:
        x = jnp.pad(x, ((0, n_p - n), (0, 0), (0, 0)))
    out = pl.pallas_call(
        _gap_kernel,
        out_shape=jax.ShapeDtypeStruct((n_p, c), jnp.float32),
        grid_spec=pltpu.PrefetchScalarGridSpec(
            num_scalar_prefetch=0,
            grid=(n_p // bt,),
            in_specs=[pl.BlockSpec((bt, s, c), lambda i: (i, 0, 0))],
            out_specs=pl.BlockSpec((bt, c), lambda i: (i, 0)),
        ),
        compiler_params=pltpu.CompilerParams(dimension_semantics=("parallel",)),
    )(x)
    return out[:n]


# ----------------------------------------------------------------------------
# CfC recurrence: one Pallas invocation; x@wbx hoisted out of the serial loop,
# bf16 MXU operands, fused heads, fused per-step projection.
# ----------------------------------------------------------------------------
def _cfc_kernel(x_ref, h0_ref, wbx_ref, wbh_ref, bbb_ref, wh_ref, bh_ref,
                wfc_ref, bfc_ref, out_ref, hT_ref, zx_scr, hs_scr):
    t_len = x_ref.shape[0]
    hid = hT_ref.shape[-1]

    # Input-dependent half of the backbone, hoisted out of the recurrence:
    # one time-parallel (T*B, 256) x (256, 128) matmul instead of T small ones.
    zx_scr[...] = (jnp.einsum("tbd,dk->tbk", x_ref[...], wbx_ref[...],
                              preferred_element_type=jnp.float32)
                   + bbb_ref[...])

    def step(t, h):
        # backbone: hoisted x-part + recurrent h-part (bf16 operands, f32 acc)
        z = zx_scr[t] + jnp.dot(h.astype(jnp.bfloat16), wbh_ref[...],
                                preferred_element_type=jnp.float32)
        z = 1.7159 * jnp.tanh(0.666 * z)                       # lecun_tanh

        # fused heads: (B,128)x(128,3*hid) -> [ff1 | ff2 | gate] (ts = 1.0)
        heads = (jnp.dot(z.astype(jnp.bfloat16), wh_ref[...],
                         preferred_element_type=jnp.float32) + bh_ref[...])
        ff1 = jnp.tanh(heads[:, :hid])
        ff2 = jnp.tanh(heads[:, hid:2 * hid])
        gate = jax.nn.sigmoid(heads[:, 2 * hid:])              # sigmoid(t_a + t_b)
        h_new = ff1 * (1.0 - gate) + gate * ff2
        hs_scr[t] = h_new
        return h_new

    hT_ref[...] = jax.lax.fori_loop(0, t_len, step, h0_ref[...], unroll=True)

    # Per-step projection fused here (time-parallel, hs never leaves VMEM).
    out_ref[...] = (jnp.einsum("tbh,ha->tba", hs_scr[...].astype(jnp.bfloat16),
                               wfc_ref[...], preferred_element_type=jnp.float32)
                    + bfc_ref[...])


def cfc_rnn(x_btd, hx, params, hidden=64, n_actions=4):
    b, t_len, d = x_btd.shape
    x_tbd = jnp.transpose(x_btd, (1, 0, 2)).astype(jnp.bfloat16)   # time-major

    backbone = params["cfc_wbx"].shape[1]
    wbx = params["cfc_wbx"].astype(jnp.bfloat16)                   # (256, 128)
    wbh = params["cfc_wbh"].astype(jnp.bfloat16)                   # (64, 128)
    bbb = params["cfc_bbb"].reshape(1, -1).astype(jnp.float32)

    # ff1 / ff2 / (t_a + t_b) heads fused into one lane-dense matmul (ts = 1.0).
    wh = jnp.concatenate(
        [params["cfc_wff1"], params["cfc_wff2"],
         params["cfc_wta"] + params["cfc_wtb"]], axis=1).astype(jnp.bfloat16)
    bh = jnp.concatenate(
        [params["cfc_bff1"], params["cfc_bff2"],
         params["cfc_bta"] + params["cfc_btb"]]).reshape(1, -1).astype(jnp.float32)

    # Projection padded to 128 lanes so the fused output store is lane-dense.
    a_pad = _round_up(max(n_actions, 1), 128)
    wfc = jnp.pad(params["cfc_wfc"],
                  ((0, 0), (0, a_pad - n_actions))).astype(jnp.bfloat16)
    bfc = jnp.pad(params["cfc_bfc"],
                  (0, a_pad - n_actions)).reshape(1, 1, -1).astype(jnp.float32)

    out_pad, h_final = pl.pallas_call(
        _cfc_kernel,
        out_shape=(jax.ShapeDtypeStruct((t_len, b, a_pad), jnp.float32),
                   jax.ShapeDtypeStruct((b, hidden), jnp.float32)),
        scratch_shapes=[pltpu.VMEM((t_len, b, backbone), jnp.float32),
                        pltpu.VMEM((t_len, b, hidden), jnp.float32)],
    )(x_tbd, hx.astype(jnp.float32), wbx, wbh, bbb, wh, bh, wfc, bfc)

    out = jnp.transpose(out_pad[:, :, :n_actions], (1, 0, 2))     # (B, T, A)
    return out, h_final


# ----------------------------------------------------------------------------
# Full model forward  (mirrors ConvCfC.forward)
# ----------------------------------------------------------------------------
def conv_cfc_forward(params, x, hx=None, *, n_actions=4, hidden=64):
    b, t_len = x.shape[0], x.shape[1]
    xc = x.reshape(b * t_len, *x.shape[2:])                       # (B*T, C, H, W)
    xc = jnp.transpose(xc, (0, 2, 3, 1))                          # NCHW -> NHWC once

    one = lambda c: jnp.ones((c,), jnp.float32)
    zero = lambda c: jnp.zeros((c,), jnp.float32)

    h = conv2d_relu_bn(xc, params["w1"], params["b1"], one(64), zero(64))
    h = conv2d_relu_bn(h, params["w2"], params["b2"],
                       params["bn2_scale"], params["bn2_shift"])
    h = conv2d_relu_bn(h, params["w3"], params["b3"], one(128), zero(128))
    h = conv2d_relu_bn(h, params["w4"], params["b4"],
                       params["bn4_scale"], params["bn4_shift"])
    feats = global_avg_pool(h)                    # (B*T, 256)
    feats = feats.reshape(b, t_len, 256)

    if hx is None:
        hx = jnp.zeros((b, hidden), jnp.float32)
    out, h_final = cfc_rnn(feats, hx, params, hidden=hidden, n_actions=n_actions)
    return out, h_final


# ----------------------------------------------------------------------------
# Deterministic parameter construction (synthetic; no checkpoint loading)
# ----------------------------------------------------------------------------
# TODO(synk): real torch nn.Linear / CfC checkpoints store weights as (out, in);
#             a transpose is required at load time for real weights.
def init_params(key, n_actions, hidden=64, backbone=128, feat=256):
    ks = iter(jax.random.split(key, 40))

    def nrm(shape, fan_in):
        return (jax.random.normal(next(ks), shape, jnp.float32)
                / jnp.sqrt(jnp.float32(fan_in)))

    p = {}
    for i, (ci, co) in enumerate([(4, 64), (64, 128), (128, 128), (128, 256)], start=1):
        p[f"w{i}"] = nrm((co, ci, 5, 5), ci * 25)
        p[f"b{i}"] = nrm((co,), ci * 25)

    for name, c in (("bn2", 128), ("bn4", 256)):
        gamma = 1.0 + 0.1 * jax.random.normal(next(ks), (c,), jnp.float32)
        beta = 0.1 * jax.random.normal(next(ks), (c,), jnp.float32)
        rmean = 0.1 * jax.random.normal(next(ks), (c,), jnp.float32)
        rvar = 1.0 + 0.1 * jnp.abs(jax.random.normal(next(ks), (c,), jnp.float32))
        scale = gamma / jnp.sqrt(rvar + 1e-5)
        p[f"{name}_scale"] = scale
        p[f"{name}_shift"] = beta - rmean * scale

    cat = feat + hidden   # 320
    p["cfc_wbx"] = nrm((feat, backbone), cat)
    p["cfc_wbh"] = nrm((hidden, backbone), cat)
    p["cfc_bbb"] = nrm((backbone,), cat)
    for name in ("ff1", "ff2", "ta", "tb"):
        p[f"cfc_w{name}"] = nrm((backbone, hidden), backbone)
        p[f"cfc_b{name}"] = nrm((hidden,), backbone)
    p["cfc_wfc"] = nrm((hidden, n_actions), hidden)
    p["cfc_bfc"] = nrm((n_actions,), hidden)
    return p


if __name__ == "__main__":
    n_actions = 4
    B, T, C, H, W = 2, 8, 4, 16, 16          # x: (batch, seq, channels, H, W)

    key = jax.random.PRNGKey(0)
    kp, kx = jax.random.split(key)
    params = init_params(kp, n_actions)
    x = jax.random.normal(kx, (B, T, C, H, W), jnp.float32)

    fwd = jax.jit(functools.partial(conv_cfc_forward, n_actions=n_actions))
    out, hx = fwd(params, x)
    jax.block_until_ready((out, hx))

    assert out.shape == (B, T, n_actions), out.shape
    assert hx.shape == (B, 64), hx.shape
    assert jnp.all(jnp.isfinite(out)) and jnp.all(jnp.isfinite(hx))
    print("KERNEL_OK")
</pallas_src>

<mosaic_0001>
module attributes {stable_mosaic.version = 11 : i64} {
  func.func @_conv_mm_kernel(%arg0: i32, %arg1: i32, %arg2: i32, %arg3: memref<512x256xbf16, #tpu.memory_space<vmem>>, %arg4: memref<256x128xbf16, #tpu.memory_space<vmem>>, %arg5: memref<3x128xf32, #tpu.memory_space<vmem>>, %arg6: memref<512x128xbf16, #tpu.memory_space<vmem>>, %arg7: memref<512x128xf32, #tpu.memory_space<vmem>>) attributes {dimension_semantics = [#tpu.dimension_semantics<parallel>, #tpu.dimension_semantics<parallel>, #tpu.dimension_semantics<arbitrary>], iteration_bounds = array<i64: 2, 1, 1>, scalar_prefetch = 0 : i64, scratch_operands = 1 : i64, tpu.core_type = #tpu.core_type<tc>, window_params = [{transform_indices = @transform_0, window_bounds = array<i64: 512, 256>}, {transform_indices = @transform_1, window_bounds = array<i64: 256, 128>}, {transform_indices = @transform_2, window_bounds = array<i64: 3, 128>}, {transform_indices = @transform_3, window_bounds = array<i64: 512, 128>}]} {
    %c0_i32 = arith.constant 0 : i32
    %0 = arith.cmpi eq, %arg2, %c0_i32 : i32
    %1 = arith.extui %0 : i1 to i32
    %c0_i32_0 = arith.constant 0 : i32
    %2 = arith.cmpi ne, %1, %c0_i32_0 : i32
    scf.if %2 {
      %cst_10 = arith.constant 0.000000e+00 : f32
      %12 = vector.broadcast %cst_10 : f32 to vector<512x128xf32>
      %c0_11 = arith.constant 0 : index
      %c0_12 = arith.constant 0 : index
      %13 = vector.load %arg7[%c0_11, %c0_12] : memref<512x128xf32, #tpu.memory_space<vmem>>, vector<512x128xf32>
      tpu.vector_store %arg7[%c0_11, %c0_12], %12 {strides = array<i32>} : memref<512x128xf32, #tpu.memory_space<vmem>>, vector<512x128xf32>,
    } else {
    }
    %c0 = arith.constant 0 : index
    %c0_1 = arith.constant 0 : index
    %3 = vector.load %arg7[%c0, %c0_1] : memref<512x128xf32, #tpu.memory_space<vmem>>, vector<512x128xf32>
    %c0_2 = arith.constant 0 : index
    %c0_3 = arith.constant 0 : index
    %4 = vector.load %arg3[%c0_2, %c0_3] : memref<512x256xbf16, #tpu.memory_space<vmem>>, vector<512x256xbf16>
    %c0_4 = arith.constant 0 : index
    %c0_5 = arith.constant 0 : index
    %5 = vector.load %arg4[%c0_4, %c0_5] : memref<256x128xbf16, #tpu.memory_space<vmem>>, vector<256x128xbf16>
    %cst = arith.constant dense<0.000000e+00> : vector<512x128xf32>
    %6 = tpu.matmul %4, %5, %cst {dimension_numbers = #tpu.dot_dimension_numbers<[1], [0], [0], [1], [0, 0, 1, 1], [], []>} : vector<512x256xbf16>, vector<256x128xbf16>, vector<512x128xf32> -> vector<512x128xf32>
    %7 = arith.addf %3, %6 : vector<512x128xf32>
    %c0_6 = arith.constant 0 : index
    %c0_7 = arith.constant 0 : index
    %8 = vector.load %arg7[%c0_6, %c0_7] : memref<512x128xf32, #tpu.memory_space<vmem>>, vector<512x128xf32>
    tpu.vector_store %arg7[%c0_6, %c0_7], %7 {strides = array<i32>} : memref<512x128xf32, #tpu.memory_space<vmem>>, vector<512x128xf32>,
    %c0_i32_8 = arith.constant 0 : i32
    %9 = arith.cmpi eq, %arg2, %c0_i32_8 : i32
    %10 = arith.extui %9 : i1 to i32
    %c0_i32_9 = arith.constant 0 : i32
    %11 = arith.cmpi ne, %10, %c0_i32_9 : i32
    scf.if %11 {
      %c0_10 = arith.constant 0 : index
      %c0_11 = arith.constant 0 : index
      %12 = vector.load %arg7[%c0_10, %c0_11] : memref<512x128xf32, #tpu.memory_space<vmem>>, vector<512x128xf32>
      %c0_12 = arith.constant 0 : index
      %c0_13 = arith.constant 0 : index
      %13 = vector.load %arg5[%c0_12, %c0_13] : memref<3x128xf32, #tpu.memory_space<vmem>>, vector<1x128xf32>
      %14 = vector.broadcast %13 : vector<1x128xf32> to vector<512x128xf32>
      %15 = arith.addf %12, %14 : vector<512x128xf32>
      %cst_14 = arith.constant 0.000000e+00 : f32
      %16 = vector.broadcast %cst_14 : f32 to vector<512x128xf32>
      %17 = arith.maximumf %15, %16 : vector<512x128xf32>
      %c1 = arith.constant 1 : index
      %c0_15 = arith.constant 0 : index
      %18 = vector.load %arg5[%c1, %c0_15] : memref<3x128xf32, #tpu.memory_space<vmem>>, vector<1x128xf32>
      %19 = vector.broadcast %18 : vector<1x128xf32> to vector<512x128xf32>
      %20 = arith.mulf %17, %19 : vector<512x128xf32>
      %c2 = arith.constant 2 : index
      %c0_16 = arith.constant 0 : index
      %21 = vector.load %arg5[%c2, %c0_16] : memref<3x128xf32, #tpu.memory_space<vmem>>, vector<1x128xf32>
      %22 = vector.broadcast %21 : vector<1x128xf32> to vector<512x128xf32>
      %23 = arith.addf %20, %22 : vector<512x128xf32>
      %24 = arith.truncf %23 : vector<512x128xf32> to vector<512x128xbf16>
      %c0_17 = arith.constant 0 : index
      %c0_18 = arith.constant 0 : index
      %25 = vector.load %arg6[%c0_17, %c0_18] : memref<512x128xbf16, #tpu.memory_space<vmem>>, vector<512x128xbf16>
      tpu.vector_store %arg6[%c0_17, %c0_18], %24 {strides = array<i32>} : memref<512x128xbf16, #tpu.memory_space<vmem>>, vector<512x128xbf16>,
    } else {
    }
    return
  }
  func.func @transform_0(%arg0: i32, %arg1: i32, %arg2: i32) -> (i32, i32) {
    %c0_i32 = arith.constant 0 : i32
    return %arg0, %arg2 : i32, i32
  }
  func.func @transform_1(%arg0: i32, %arg1: i32, %arg2: i32) -> (i32, i32) {
    %c0_i32 = arith.constant 0 : i32
    return %arg2, %arg1 : i32, i32
  }
  func.func @transform_2(%arg0: i32, %arg1: i32, %arg2: i32) -> (i32, i32) {
    %c0_i32 = arith.constant 0 : i32
    %c0_i32_0 = arith.constant 0 : i32
    return %c0_i32, %arg1 : i32, i32
  }
  func.func @transform_3(%arg0: i32, %arg1: i32, %arg2: i32) -> (i32, i32) {
    %c0_i32 = arith.constant 0 : i32
    return %arg0, %arg1 : i32, i32
  }
}

module attributes {stable_mosaic.version = 11 : i64} {
  func.func @_conv_mm_kernel(%arg0: i32, %arg1: i32, %arg2: i32, %arg3: memref<128x256xbf16, #tpu.memory_space<vmem>>, %arg4: memref<256x128xbf16, #tpu.memory_space<vmem>>, %arg5: memref<3x128xf32, #tpu.memory_space<vmem>>, %arg6: memref<128x128xbf16, #tpu.memory_space<vmem>>, %arg7: memref<128x128xf32, #tpu.memory_space<vmem>>) attributes {dimension_semantics = [#tpu.dimension_semantics<parallel>, #tpu.dimension_semantics<parallel>, #tpu.dimension_semantics<arbitrary>], iteration_bounds = array<i64: 2, 1, 7>, scalar_prefetch = 0 : i64, scratch_operands = 1 : i64, tpu.core_type = #tpu.core_type<tc>, window_params = [{transform_indices = @transform_0, window_bounds = array<i64: 128, 256>}, {transform_indices = @transform_1, window_bounds = array<i64: 256, 128>}, {transform_indices = @transform_2, window_bounds = array<i64: 3, 128>}, {transform_indices = @transform_3, window_bounds = array<i64: 128, 128>}]} {
    %c0_i32 = arith.constant 0 : i32
    %0 = arith.cmpi eq, %arg2, %c0_i32 : i32
    %1 = arith.extui %0 : i1 to i32
    %c0_i32_0 = arith.constant 0 : i32
    %2 = arith.cmpi ne, %1, %c0_i32_0 : i32
    scf.if %2 {
      %cst_9 = arith.constant 0.000000e+00 : f32
      %12 = vector.broadcast %cst_9 : f32 to vector<128x128xf32>
      %c0_10 = arith.constant 0 : index
      %c0_11 = arith.constant 0 : index
      %13 = vector.load %arg7[%c0_10, %c0_11] : memref<128x128xf32, #tpu.memory_space<vmem>>, vector<128x128xf32>
      tpu.vector_store %arg7[%c0_10, %c0_11], %12 {strides = array<i32>} : memref<128x128xf32, #tpu.memory_space<vmem>>, vector<128x128xf32>,
    } else {
    }
    %c0 = arith.constant 0 : index
    %c0_1 = arith.constant 0 : index
    %3 = vector.load %arg7[%c0, %c0_1] : memref<128x128xf32, #tpu.memory_space<vmem>>, vector<128x128xf32>
    %c0_2 = arith.constant 0 : index
    %c0_3 = arith.constant 0 : index
    %4 = vector.load %arg3[%c0_2, %c0_3] : memref<128x256xbf16, #tpu.memory_space<vmem>>, vector<128x256xbf16>
    %c0_4 = arith.constant 0 : index
    %c0_5 = arith.constant 0 : index
    %5 = vector.load %arg4[%c0_4, %c0_5] : memref<256x128xbf16, #tpu.memory_space<vmem>>, vector<256x128xbf16>
    %cst = arith.constant dense<0.000000e+00> : vector<128x128xf32>
    %6 = tpu.matmul %4, %5, %cst {dimension_numbers = #tpu.dot_dimension_numbers<[1], [0], [0], [1], [0, 0, 1, 1], [], []>} : vector<128x256xbf16>, vector<256x128xbf16>, vector<128x128xf32> -> vector<128x128xf32>
    %7 = arith.addf %3, %6 : vector<128x128xf32>
    %c0_6 = arith.constant 0 : index
    %c0_7 = arith.constant 0 : index
    %8 = vector.load %arg7[%c0_6, %c0_7] : memref<128x128xf32, #tpu.memory_space<vmem>>, vector<128x128xf32>
    tpu.vector_store %arg7[%c0_6, %c0_7], %7 {strides = array<i32>} : memref<128x128xf32, #tpu.memory_space<vmem>>, vector<128x128xf32>,
    %c6_i32 = arith.constant 6 : i32
    %9 = arith.cmpi eq, %arg2, %c6_i32 : i32
    %10 = arith.extui %9 : i1 to i32
    %c0_i32_8 = arith.constant 0 : i32
    %11 = arith.cmpi ne, %10, %c0_i32_8 : i32
    scf.if %11 {
      %c0_9 = arith.constant 0 : index
      %c0_10 = arith.constant 0 : index
      %12 = vector.load %arg7[%c0_9, %c0_10] : memref<128x128xf32, #tpu.memory_space<vmem>>, vector<128x128xf32>
      %c0_11 = arith.constant 0 : index
      %c0_12 = arith.constant 0 : index
      %13 = vector.load %arg5[%c0_11, %c0_12] : memref<3x128xf32, #tpu.memory_space<vmem>>, vector<1x128xf32>
      %14 = vector.broadcast %13 : vector<1x128xf32> to vector<128x128xf32>
      %15 = arith.addf %12, %14 : vector<128x128xf32>
      %cst_13 = arith.constant 0.000000e+00 : f32
      %16 = vector.broadcast %cst_13 : f32 to vector<128x128xf32>
      %17 = arith.maximumf %15, %16 : vector<128x128xf32>
      %c1 = arith.constant 1 : index
      %c0_14 = arith.constant 0 : index
      %18 = vector.load %arg5[%c1, %c0_14] : memref<3x128xf32, #tpu.memory_space<vmem>>, vector<1x128xf32>
      %19 = vector.broadcast %18 : vector<1x128xf32> to vector<128x128xf32>
      %20 = arith.mulf %17, %19 : vector<128x128xf32>
      %c2 = arith.constant 2 : index
      %c0_15 = arith.constant 0 : index
      %21 = vector.load %arg5[%c2, %c0_15] : memref<3x128xf32, #tpu.memory_space<vmem>>, vector<1x128xf32>
      %22 = vector.broadcast %21 : vector<1x128xf32> to vector<128x128xf32>
      %23 = arith.addf %20, %22 : vector<128x128xf32>
      %24 = arith.truncf %23 : vector<128x128xf32> to vector<128x128xbf16>
      %c0_16 = arith.constant 0 : index
      %c0_17 = arith.constant 0 : index
      %25 = vector.load %arg6[%c0_16, %c0_17] : memref<128x128xbf16, #tpu.memory_space<vmem>>, vector<128x128xbf16>
      tpu.vector_store %arg6[%c0_16, %c0_17], %24 {strides = array<i32>} : memref<128x128xbf16, #tpu.memory_space<vmem>>, vector<128x128xbf16>,
    } else {
    }
    return
  }
  func.func @transform_0(%arg0: i32, %arg1: i32, %arg2: i32) -> (i32, i32) {
    %c0_i32 = arith.constant 0 : i32
    return %arg0, %arg2 : i32, i32
  }
  func.func @transform_1(%arg0: i32, %arg1: i32, %arg2: i32) -> (i32, i32) {
    %c0_i32 = arith.constant 0 : i32
    return %arg2, %arg1 : i32, i32
  }
  func.func @transform_2(%arg0: i32, %arg1: i32, %arg2: i32) -> (i32, i32) {
    %c0_i32 = arith.constant 0 : i32
    %c0_i32_0 = arith.constant 0 : i32
    return %c0_i32, %arg1 : i32, i32
  }
  func.func @transform_3(%arg0: i32, %arg1: i32, %arg2: i32) -> (i32, i32) {
    %c0_i32 = arith.constant 0 : i32
    return %arg0, %arg1 : i32, i32
  }
}

module attributes {stable_mosaic.version = 11 : i64} {
  func.func @_conv_mm_kernel(%arg0: i32, %arg1: i32, %arg2: i32, %arg3: memref<32x256xbf16, #tpu.memory_space<vmem>>, %arg4: memref<256x128xbf16, #tpu.memory_space<vmem>>, %arg5: memref<3x128xf32, #tpu.memory_space<vmem>>, %arg6: memref<32x128xbf16, #tpu.memory_space<vmem>>, %arg7: memref<32x128xf32, #tpu.memory_space<vmem>>) attributes {dimension_semantics = [#tpu.dimension_semantics<parallel>, #tpu.dimension_semantics<parallel>, #tpu.dimension_semantics<arbitrary>], iteration_bounds = array<i64: 2, 1, 13>, scalar_prefetch = 0 : i64, scratch_operands = 1 : i64, tpu.core_type = #tpu.core_type<tc>, window_params = [{transform_indices = @transform_0, window_bounds = array<i64: 32, 256>}, {transform_indices = @transform_1, window_bounds = array<i64: 256, 128>}, {transform_indices = @transform_2, window_bounds = array<i64: 3, 128>}, {transform_indices = @transform_3, window_bounds = array<i64: 32, 128>}]} {
    %c0_i32 = arith.constant 0 : i32
    %0 = arith.cmpi eq, %arg2, %c0_i32 : i32
    %1 = arith.extui %0 : i1 to i32
    %c0_i32_0 = arith.constant 0 : i32
    %2 = arith.cmpi ne, %1, %c0_i32_0 : i32
    scf.if %2 {
      %cst_9 = arith.constant 0.000000e+00 : f32
      %12 = vector.broadcast %cst_9 : f32 to vector<32x128xf32>
      %c0_10 = arith.constant 0 : index
      %c0_11 = arith.constant 0 : index
      %13 = vector.load %arg7[%c0_10, %c0_11] : memref<32x128xf32, #tpu.memory_space<vmem>>, vector<32x128xf32>
      tpu.vector_store %arg7[%c0_10, %c0_11], %12 {strides = array<i32>} : memref<32x128xf32, #tpu.memory_space<vmem>>, vector<32x128xf32>,
    } else {
    }
    %c0 = arith.constant 0 : index
    %c0_1 = arith.constant 0 : index
    %3 = vector.load %arg7[%c0, %c0_1] : memref<32x128xf32, #tpu.memory_space<vmem>>, vector<32x128xf32>
    %c0_2 = arith.constant 0 : index
    %c0_3 = arith.constant 0 : index
    %4 = vector.load %arg3[%c0_2, %c0_3] : memref<32x256xbf16, #tpu.memory_space<vmem>>, vector<32x256xbf16>
    %c0_4 = arith.constant 0 : index
    %c0_5 = arith.constant 0 : index
    %5 = vector.load %arg4[%c0_4, %c0_5] : memref<256x128xbf16, #tpu.memory_space<vmem>>, vector<256x128xbf16>
    %cst = arith.constant dense<0.000000e+00> : vector<32x128xf32>
    %6 = tpu.matmul %4, %5, %cst {dimension_numbers = #tpu.dot_dimension_numbers<[1], [0], [0], [1], [0, 0, 1, 1], [], []>} : vector<32x256xbf16>, vector<256x128xbf16>, vector<32x128xf32> -> vector<32x128xf32>
    %7 = arith.addf %3, %6 : vector<32x128xf32>
    %c0_6 = arith.constant 0 : index
    %c0_7 = arith.constant 0 : index
    %8 = vector.load %arg7[%c0_6, %c0_7] : memref<32x128xf32, #tpu.memory_space<vmem>>, vector<32x128xf32>
    tpu.vector_store %arg7[%c0_6, %c0_7], %7 {strides = array<i32>} : memref<32x128xf32, #tpu.memory_space<vmem>>, vector<32x128xf32>,
    %c12_i32 = arith.constant 12 : i32
    %9 = arith.cmpi eq, %arg2, %c12_i32 : i32
    %10 = arith.extui %9 : i1 to i32
    %c0_i32_8 = arith.constant 0 : i32
    %11 = arith.cmpi ne, %10, %c0_i32_8 : i32
    scf.if %11 {
      %c0_9 = arith.constant 0 : index
      %c0_10 = arith.constant 0 : index
      %12 = vector.load %arg7[%c0_9, %c0_10] : memref<32x128xf32, #tpu.memory_space<vmem>>, vector<32x128xf32>
      %c0_11 = arith.constant 0 : index
      %c0_12 = arith.constant 0 : index
      %13 = vector.load %arg5[%c0_11, %c0_12] : memref<3x128xf32, #tpu.memory_space<vmem>>, vector<1x128xf32>
      %14 = vector.broadcast %13 : vector<1x128xf32> to vector<32x128xf32>
      %15 = arith.addf %12, %14 : vector<32x128xf32>
      %cst_13 = arith.constant 0.000000e+00 : f32
      %16 = vector.broadcast %cst_13 : f32 to vector<32x128xf32>
      %17 = arith.maximumf %15, %16 : vector<32x128xf32>
      %c1 = arith.constant 1 : index
      %c0_14 = arith.constant 0 : index
      %18 = vector.load %arg5[%c1, %c0_14] : memref<3x128xf32, #tpu.memory_space<vmem>>, vector<1x128xf32>
      %19 = vector.broadcast %18 : vector<1x128xf32> to vector<32x128xf32>
      %20 = arith.mulf %17, %19 : vector<32x128xf32>
      %c2 = arith.constant 2 : index
      %c0_15 = arith.constant 0 : index
      %21 = vector.load %arg5[%c2, %c0_15] : memref<3x128xf32, #tpu.memory_space<vmem>>, vector<1x128xf32>
      %22 = vector.broadcast %21 : vector<1x128xf32> to vector<32x128xf32>
      %23 = arith.addf %20, %22 : vector<32x128xf32>
      %24 = arith.truncf %23 : vector<32x128xf32> to vector<32x128xbf16>
      %c0_16 = arith.constant 0 : index
      %c0_17 = arith.constant 0 : index
      %25 = vector.load %arg6[%c0_16, %c0_17] : memref<32x128xbf16, #tpu.memory_space<vmem>>, vector<32x128xbf16>
      tpu.vector_store %arg6[%c0_16, %c0_17], %24 {strides = array<i32>} : memref<32x128xbf16, #tpu.memory_space<vmem>>, vector<32x128xbf16>,
    } else {
    }
    return
  }
  func.func @transform_0(%arg0: i32, %arg1: i32, %arg2: i32) -> (i32, i32) {
    %c0_i32 = arith.constant 0 : i32
    return %arg0, %arg2 : i32, i32
  }
  func.func @transform_1(%arg0: i32, %arg1: i32, %arg2: i32) -> (i32, i32) {
    %c0_i32 = arith.constant 0 : i32
    return %arg2, %arg1 : i32, i32
  }
  func.func @transform_2(%arg0: i32, %arg1: i32, %arg2: i32) -> (i32, i32) {
    %c0_i32 = arith.constant 0 : i32
    %c0_i32_0 = arith.constant 0 : i32
    return %c0_i32, %arg1 : i32, i32
  }
  func.func @transform_3(%arg0: i32, %arg1: i32, %arg2: i32) -> (i32, i32) {
    %c0_i32 = arith.constant 0 : i32
    return %arg0, %arg1 : i32, i32
  }
}

module attributes {stable_mosaic.version = 11 : i64} {
  func.func @_conv_mm_kernel(%arg0: i32, %arg1: i32, %arg2: i32, %arg3: memref<16x256xbf16, #tpu.memory_space<vmem>>, %arg4: memref<256x128xbf16, #tpu.memory_space<vmem>>, %arg5: memref<3x128xf32, #tpu.memory_space<vmem>>, %arg6: memref<16x128xbf16, #tpu.memory_space<vmem>>, %arg7: memref<16x128xf32, #tpu.memory_space<vmem>>) attributes {dimension_semantics = [#tpu.dimension_semantics<parallel>, #tpu.dimension_semantics<parallel>, #tpu.dimension_semantics<arbitrary>], iteration_bounds = array<i64: 1, 2, 13>, scalar_prefetch = 0 : i64, scratch_operands = 1 : i64, tpu.core_type = #tpu.core_type<tc>, window_params = [{transform_indices = @transform_0, window_bounds = array<i64: 16, 256>}, {transform_indices = @transform_1, window_bounds = array<i64: 256, 128>}, {transform_indices = @transform_2, window_bounds = array<i64: 3, 128>}, {transform_indices = @transform_3, window_bounds = array<i64: 16, 128>}]} {
    %c0_i32 = arith.constant 0 : i32
    %0 = arith.cmpi eq, %arg2, %c0_i32 : i32
    %1 = arith.extui %0 : i1 to i32
    %c0_i32_0 = arith.constant 0 : i32
    %2 = arith.cmpi ne, %1, %c0_i32_0 : i32
    scf.if %2 {
      %cst_9 = arith.constant 0.000000e+00 : f32
      %12 = vector.broadcast %cst_9 : f32 to vector<16x128xf32>
      %c0_10 = arith.constant 0 : index
      %c0_11 = arith.constant 0 : index
      %13 = vector.load %arg7[%c0_10, %c0_11] : memref<16x128xf32, #tpu.memory_space<vmem>>, vector<16x128xf32>
      tpu.vector_store %arg7[%c0_10, %c0_11], %12 {strides = array<i32>} : memref<16x128xf32, #tpu.memory_space<vmem>>, vector<16x128xf32>,
    } else {
    }
    %c0 = arith.constant 0 : index
    %c0_1 = arith.constant 0 : index
    %3 = vector.load %arg7[%c0, %c0_1] : memref<16x128xf32, #tpu.memory_space<vmem>>, vector<16x128xf32>
    %c0_2 = arith.constant 0 : index
    %c0_3 = arith.constant 0 : index
    %4 = vector.load %arg3[%c0_2, %c0_3] : memref<16x256xbf16, #tpu.memory_space<vmem>>, vector<16x256xbf16>
    %c0_4 = arith.constant 0 : index
    %c0_5 = arith.constant 0 : index
    %5 = vector.load %arg4[%c0_4, %c0_5] : memref<256x128xbf16, #tpu.memory_space<vmem>>, vector<256x128xbf16>
    %cst = arith.constant dense<0.000000e+00> : vector<16x128xf32>
    %6 = tpu.matmul %4, %5, %cst {dimension_numbers = #tpu.dot_dimension_numbers<[1], [0], [0], [1], [0, 0, 1, 1], [], []>} : vector<16x256xbf16>, vector<256x128xbf16>, vector<16x128xf32> -> vector<16x128xf32>
    %7 = arith.addf %3, %6 : vector<16x128xf32>
    %c0_6 = arith.constant 0 : index
    %c0_7 = arith.constant 0 : index
    %8 = vector.load %arg7[%c0_6, %c0_7] : memref<16x128xf32, #tpu.memory_space<vmem>>, vector<16x128xf32>
    tpu.vector_store %arg7[%c0_6, %c0_7], %7 {strides = array<i32>} : memref<16x128xf32, #tpu.memory_space<vmem>>, vector<16x128xf32>,
    %c12_i32 = arith.constant 12 : i32
    %9 = arith.cmpi eq, %arg2, %c12_i32 : i32
    %10 = arith.extui %9 : i1 to i32
    %c0_i32_8 = arith.constant 0 : i32
    %11 = arith.cmpi ne, %10, %c0_i32_8 : i32
    scf.if %11 {
      %c0_9 = arith.constant 0 : index
      %c0_10 = arith.constant 0 : index
      %12 = vector.load %arg7[%c0_9, %c0_10] : memref<16x128xf32, #tpu.memory_space<vmem>>, vector<16x128xf32>
      %c0_11 = arith.constant 0 : index
      %c0_12 = arith.constant 0 : index
      %13 = vector.load %arg5[%c0_11, %c0_12] : memref<3x128xf32, #tpu.memory_space<vmem>>, vector<1x128xf32>
      %14 = vector.broadcast %13 : vector<1x128xf32> to vector<16x128xf32>
      %15 = arith.addf %12, %14 : vector<16x128xf32>
      %cst_13 = arith.constant 0.000000e+00 : f32
      %16 = vector.broadcast %cst_13 : f32 to vector<16x128xf32>
      %17 = arith.maximumf %15, %16 : vector<16x128xf32>
      %c1 = arith.constant 1 : index
      %c0_14 = arith.constant 0 : index
      %18 = vector.load %arg5[%c1, %c0_14] : memref<3x128xf32, #tpu.memory_space<vmem>>, vector<1x128xf32>
      %19 = vector.broadcast %18 : vector<1x128xf32> to vector<16x128xf32>
      %20 = arith.mulf %17, %19 : vector<16x128xf32>
      %c2 = arith.constant 2 : index
      %c0_15 = arith.constant 0 : index
      %21 = vector.load %arg5[%c2, %c0_15] : memref<3x128xf32, #tpu.memory_space<vmem>>, vector<1x128xf32>
      %22 = vector.broadcast %21 : vector<1x128xf32> to vector<16x128xf32>
      %23 = arith.addf %20, %22 : vector<16x128xf32>
      %24 = arith.truncf %23 : vector<16x128xf32> to vector<16x128xbf16>
      %c0_16 = arith.constant 0 : index
      %c0_17 = arith.constant 0 : index
      %25 = vector.load %arg6[%c0_16, %c0_17] : memref<16x128xbf16, #tpu.memory_space<vmem>>, vector<16x128xbf16>
      tpu.vector_store %arg6[%c0_16, %c0_17], %24 {strides = array<i32>} : memref<16x128xbf16, #tpu.memory_space<vmem>>, vector<16x128xbf16>,
    } else {
    }
    return
  }
  func.func @transform_0(%arg0: i32, %arg1: i32, %arg2: i32) -> (i32, i32) {
    %c0_i32 = arith.constant 0 : i32
    return %arg0, %arg2 : i32, i32
  }
  func.func @transform_1(%arg0: i32, %arg1: i32, %arg2: i32) -> (i32, i32) {
    %c0_i32 = arith.constant 0 : i32
    return %arg2, %arg1 : i32, i32
  }
  func.func @transform_2(%arg0: i32, %arg1: i32, %arg2: i32) -> (i32, i32) {
    %c0_i32 = arith.constant 0 : i32
    %c0_i32_0 = arith.constant 0 : i32
    return %c0_i32, %arg1 : i32, i32
  }
  func.func @transform_3(%arg0: i32, %arg1: i32, %arg2: i32) -> (i32, i32) {
    %c0_i32 = arith.constant 0 : i32
    return %arg0, %arg1 : i32, i32
  }
}

module attributes {stable_mosaic.version = 11 : i64} {
  func.func @_cfc_kernel(%arg0: memref<8x2x256xbf16, #tpu.memory_space<vmem>>, %arg1: memref<2x64xf32, #tpu.memory_space<vmem>>, %arg2: memref<256x128xbf16, #tpu.memory_space<vmem>>, %arg3: memref<64x128xbf16, #tpu.memory_space<vmem>>, %arg4: memref<1x128xf32, #tpu.memory_space<vmem>>, %arg5: memref<128x192xbf16, #tpu.memory_space<vmem>>, %arg6: memref<1x192xf32, #tpu.memory_space<vmem>>, %arg7: memref<64x128xbf16, #tpu.memory_space<vmem>>, %arg8: memref<1x1x128xf32, #tpu.memory_space<vmem>>, %arg9: memref<8x2x128xf32, #tpu.memory_space<vmem>>, %arg10: memref<2x64xf32, #tpu.memory_space<vmem>>, %arg11: memref<8x2x128xf32, #tpu.memory_space<vmem>>, %arg12: memref<8x2x64xf32, #tpu.memory_space<vmem>>) attributes {dimension_semantics = [], scalar_prefetch = 0 : i64, scratch_operands = 2 : i64, tpu.core_type = #tpu.core_type<tc>} {
    %c0 = arith.constant 0 : index
    %c0_0 = arith.constant 0 : index
    %c0_1 = arith.constant 0 : index
    %0 = vector.load %arg0[%c0, %c0_0, %c0_1] : memref<8x2x256xbf16, #tpu.memory_space<vmem>>, vector<8x2x256xbf16>
    %c0_2 = arith.constant 0 : index
    %c0_3 = arith.constant 0 : index
    %1 = vector.load %arg2[%c0_2, %c0_3] : memref<256x128xbf16, #tpu.memory_space<vmem>>, vector<256x128xbf16>
    "tpu.trace_start"() <{level = 10 : i32, message = "tbd,dk->tbk"}> : () -> ()
    %cst = arith.constant dense<0.000000e+00> : vector<8x2x128xf32>
    %2 = tpu.matmul %0, %1, %cst {dimension_numbers = #tpu.dot_dimension_numbers<[2], [0], [0, 1], [1], [0, 0, 0, 1, 1, 1], [], []>} : vector<8x2x256xbf16>, vector<256x128xbf16>, vector<8x2x128xf32> -> vector<8x2x128xf32>
    "tpu.trace_stop"() : () -> ()
    %c0_4 = arith.constant 0 : index
    %c0_5 = arith.constant 0 : index
    %3 = vector.load %arg4[%c0_4, %c0_5] : memref<1x128xf32, #tpu.memory_space<vmem>>, vector<1x128xf32>
    %4 = vector.shape_cast %3 : vector<1x128xf32> to vector<1x1x128xf32>
    %5 = vector.broadcast %4 : vector<1x1x128xf32> to vector<8x2x128xf32>
    %6 = arith.addf %2, %5 : vector<8x2x128xf32>
    %c0_6 = arith.constant 0 : index
    %c0_7 = arith.constant 0 : index
    %c0_8 = arith.constant 0 : index
    %7 = vector.load %arg11[%c0_6, %c0_7, %c0_8] : memref<8x2x128xf32, #tpu.memory_space<vmem>>, vector<8x2x128xf32>
    tpu.vector_store %arg11[%c0_6, %c0_7, %c0_8], %6 {strides = array<i32>} : memref<8x2x128xf32, #tpu.memory_space<vmem>>, vector<8x2x128xf32>,
    %c0_9 = arith.constant 0 : index
    %c0_10 = arith.constant 0 : index
    %8 = vector.load %arg1[%c0_9, %c0_10] : memref<2x64xf32, #tpu.memory_space<vmem>>, vector<2x64xf32>
    %c0_i32 = arith.constant 0 : i32
    %9 = arith.index_cast %c0_i32 : i32 to index
    %c0_11 = arith.constant 0 : index
    %c0_12 = arith.constant 0 : index
    %10 = vector.load %arg11[%9, %c0_11, %c0_12] : memref<8x2x128xf32, #tpu.memory_space<vmem>>, vector<1x2x128xf32>
    %11 = vector.shape_cast %10 : vector<1x2x128xf32> to vector<2x128xf32>
    %12 = arith.truncf %8 : vector<2x64xf32> to vector<2x64xbf16>
    %c0_13 = arith.constant 0 : index
    %c0_14 = arith.constant 0 : index
    %13 = vector.load %arg3[%c0_13, %c0_14] : memref<64x128xbf16, #tpu.memory_space<vmem>>, vector<64x128xbf16>
    %cst_15 = arith.constant dense<0.000000e+00> : vector<2x128xf32>
    %14 = tpu.matmul %12, %13, %cst_15 {dimension_numbers = #tpu.dot_dimension_numbers<[1], [0], [0], [1], [0, 0, 1, 1], [], []>} : vector<2x64xbf16>, vector<64x128xbf16>, vector<2x128xf32> -> vector<2x128xf32>
    %15 = arith.addf %11, %14 : vector<2x128xf32>
    %cst_16 = arith.constant 6.660000e-01 : f32
    %16 = vector.broadcast %cst_16 : f32 to vector<2x128xf32>
    %17 = arith.mulf %16, %15 : vector<2x128xf32>
    %18 = math.tanh %17 : vector<2x128xf32>
    %cst_17 = arith.constant 1.715900e+00 : f32
    %19 = vector.broadcast %cst_17 : f32 to vector<2x128xf32>
    %20 = arith.mulf %19, %18 : vector<2x128xf32>
    %21 = arith.truncf %20 : vector<2x128xf32> to vector<2x128xbf16>
    %c0_18 = arith.constant 0 : index
    %c0_19 = arith.constant 0 : index
    %22 = vector.load %arg5[%c0_18, %c0_19] : memref<128x192xbf16, #tpu.memory_space<vmem>>, vector<128x192xbf16>
    %cst_20 = arith.constant dense<0.000000e+00> : vector<2x192xf32>
    %23 = tpu.matmul %21, %22, %cst_20 {dimension_numbers = #tpu.dot_dimension_numbers<[1], [0], [0], [1], [0, 0, 1, 1], [], []>} : vector<2x128xbf16>, vector<128x192xbf16>, vector<2x192xf32> -> vector<2x192xf32>
    %c0_21 = arith.constant 0 : index
    %c0_22 = arith.constant 0 : index
    %24 = vector.load %arg6[%c0_21, %c0_22] : memref<1x192xf32, #tpu.memory_space<vmem>>, vector<1x192xf32>
    %25 = vector.broadcast %24 : vector<1x192xf32> to vector<2x192xf32>
    %26 = arith.addf %23, %25 : vector<2x192xf32>
    %27 = vector.extract_strided_slice %26 {offsets = [0, 0], sizes = [2, 64], strides = [1, 1]} : vector<2x192xf32> to vector<2x64xf32>
    %28 = math.tanh %27 : vector<2x64xf32>
    %29 = vector.extract_strided_slice %26 {offsets = [0, 64], sizes = [2, 64], strides = [1, 1]} : vector<2x192xf32> to vector<2x64xf32>
    %30 = math.tanh %29 : vector<2x64xf32>
    %31 = vector.extract_strided_slice %26 {offsets = [0, 128], sizes = [2, 64], strides = [1, 1]} : vector<2x192xf32> to vector<2x64xf32>
    %32 = arith.negf %31 : vector<2x64xf32>
    %33 = math.exp %32 : vector<2x64xf32>
    %cst_23 = arith.constant 1.000000e+00 : f32
    %34 = vector.broadcast %cst_23 : f32 to vector<2x64xf32>
    %35 = arith.addf %34, %33 : vector<2x64xf32>
    %36 = arith.divf %34, %35 : vector<2x64xf32>
    %cst_24 = arith.constant 1.000000e+00 : f32
    %37 = vector.broadcast %cst_24 : f32 to vector<2x64xf32>
    %38 = arith.subf %37, %36 : vector<2x64xf32>
    %39 = arith.mulf %28, %38 : vector<2x64xf32>
    %40 = arith.mulf %36, %30 : vector<2x64xf32>
    %41 = arith.addf %39, %40 : vector<2x64xf32>
    %42 = arith.index_cast %c0_i32 : i32 to index
    %c0_25 = arith.constant 0 : index
    %c0_26 = arith.constant 0 : index
    %43 = vector.load %arg12[%42, %c0_25, %c0_26] : memref<8x2x64xf32, #tpu.memory_space<vmem>>, vector<1x2x64xf32>
    %44 = vector.shape_cast %43 : vector<1x2x64xf32> to vector<2x64xf32>
    %45 = vector.shape_cast %41 : vector<2x64xf32> to vector<1x2x64xf32>
    tpu.vector_store %arg12[%42, %c0_25, %c0_26], %45 {strides = array<i32>} : memref<8x2x64xf32, #tpu.memory_space<vmem>>, vector<1x2x64xf32>,
    %c1_i32 = arith.constant 1 : i32
    %46 = arith.index_cast %c1_i32 : i32 to index
    %c0_27 = arith.constant 0 : index
    %c0_28 = arith.constant 0 : index
    %47 = vector.load %arg11[%46, %c0_27, %c0_28] : memref<8x2x128xf32, #tpu.memory_space<vmem>>, vector<1x2x128xf32>
    %48 = vector.shape_cast %47 : vector<1x2x128xf32> to vector<2x128xf32>
    %49 = arith.truncf %41 : vector<2x64xf32> to vector<2x64xbf16>
    %c0_29 = arith.constant 0 : index
    %c0_30 = arith.constant 0 : index
    %50 = vector.load %arg3[%c0_29, %c0_30] : memref<64x128xbf16, #tpu.memory_space<vmem>>, vector<64x128xbf16>
    %cst_31 = arith.constant dense<0.000000e+00> : vector<2x128xf32>
    %51 = tpu.matmul %49, %50, %cst_31 {dimension_numbers = #tpu.dot_dimension_numbers<[1], [0], [0], [1], [0, 0, 1, 1], [], []>} : vector<2x64xbf16>, vector<64x128xbf16>, vector<2x128xf32> -> vector<2x128xf32>
    %52 = arith.addf %48, %51 : vector<2x128xf32>
    %cst_32 = arith.constant 6.660000e-01 : f32
    %53 = vector.broadcast %cst_32 : f32 to vector<2x128xf32>
    %54 = arith.mulf %53, %52 : vector<2x128xf32>
    %55 = math.tanh %54 : vector<2x128xf32>
    %cst_33 = arith.constant 1.715900e+00 : f32
    %56 = vector.broadcast %cst_33 : f32 to vector<2x128xf32>
    %57 = arith.mulf %56, %55 : vector<2x128xf32>
    %58 = arith.truncf %57 : vector<2x128xf32> to vector<2x128xbf16>
    %c0_34 = arith.constant 0 : index
    %c0_35 = arith.constant 0 : index
    %59 = vector.load %arg5[%c0_34, %c0_35] : memref<128x192xbf16, #tpu.memory_space<vmem>>, vector<128x192xbf16>
    %cst_36 = arith.constant dense<0.000000e+00> : vector<2x192xf32>
    %60 = tpu.matmul %58, %59, %cst_36 {dimension_numbers = #tpu.dot_dimension_numbers<[1], [0], [0], [1], [0, 0, 1, 1], [], []>} : vector<2x128xbf16>, vector<128x192xbf16>, vector<2x192xf32> -> vector<2x192xf32>
    %c0_37 = arith.constant 0 : index
    %c0_38 = arith.constant 0 : index
    %61 = vector.load %arg6[%c0_37, %c0_38] : memref<1x192xf32, #tpu.memory_space<vmem>>, vector<1x192xf32>
    %62 = vector.broadcast %61 : vector<1x192xf32> to vector<2x192xf32>
    %63 = arith.addf %60, %62 : vector<2x192xf32>
    %64 = vector.extract_strided_slice %63 {offsets = [0, 0], sizes = [2, 64], strides = [1, 1]} : vector<2x192xf32> to vector<2x64xf32>
    %65 = math.tanh %64 : vector<2x64xf32>
    %66 = vector.extract_strided_slice %63 {offsets = [0, 64], sizes = [2, 64], strides = [1, 1]} : vector<2x192xf32> to vector<2x64xf32>
    %67 = math.tanh %66 : vector<2x64xf32>
    %68 = vector.extract_strided_slice %63 {offsets = [0, 128], sizes = [2, 64], strides = [1, 1]} : vector<2x192xf32> to vector<2x64xf32>
    %69 = arith.negf %68 : vector<2x64xf32>
    %70 = math.exp %69 : vector<2x64xf32>
    %cst_39 = arith.constant 1.000000e+00 : f32
    %71 = vector.broadcast %cst_39 : f32 to vector<2x64xf32>
    %72 = arith.addf %71, %70 : vector<2x64xf32>
    %73 = arith.divf %71, %72 : vector<2x64xf32>
    %cst_40 = arith.constant 1.000000e+00 : f32
    %74 = vector.broadcast %cst_40 : f32 to vector<2x64xf32>
    %75 = arith.subf %74, %73 : vector<2x64xf32>
    %76 = arith.mulf %65, %75 : vector<2x64xf32>
    %77 = arith.mulf %73, %67 : vector<2x64xf32>
    %78 = arith.addf %76, %77 : vector<2x64xf32>
    %79 = arith.index_cast %c1_i32 : i32 to index
    %c0_41 = arith.constant 0 : index
    %c0_42 = arith.constant 0 : index
    %80 = vector.load %arg12[%79, %c0_41, %c0_42] : memref<8x2x64xf32, #tpu.memory_space<vmem>>, vector<1x2x64xf32>
    %81 = vector.shape_cast %80 : vector<1x2x64xf32> to vector<2x64xf32>
    %82 = vector.shape_cast %78 : vector<2x64xf32> to vector<1x2x64xf32>
    tpu.vector_store %arg12[%79, %c0_41, %c0_42], %82 {strides = array<i32>} : memref<8x2x64xf32, #tpu.memory_space<vmem>>, vector<1x2x64xf32>,
    %c2_i32 = arith.constant 2 : i32
    %83 = arith.index_cast %c2_i32 : i32 to index
    %c0_43 = arith.constant 0 : index
    %c0_44 = arith.constant 0 : index
    %84 = vector.load %arg11[%83, %c0_43, %c0_44] : memref<8x2x128xf32, #tpu.memory_space<vmem>>, vector<1x2x128xf32>
    %85 = vector.shape_cast %84 : vector<1x2x128xf32> to vector<2x128xf32>
    %86 = arith.truncf %78 : vector<2x64xf32> to vector<2x64xbf16>
    %c0_45 = arith.constant 0 : index
    %c0_46 = arith.constant 0 : index
    %87 = vector.load %arg3[%c0_45, %c0_46] : memref<64x128xbf16, #tpu.memory_space<vmem>>, vector<64x128xbf16>
    %cst_47 = arith.constant dense<0.000000e+00> : vector<2x128xf32>
    %88 = tpu.matmul %86, %87, %cst_47 {dimension_numbers = #tpu.dot_dimension_numbers<[1], [0], [0], [1], [0, 0, 1, 1], [], []>} : vector<2x64xbf16>, vector<64x128xbf16>, vector<2x128xf32> -> vector<2x128xf32>
    %89 = arith.addf %85, %88 : vector<2x128xf32>
    %cst_48 = arith.constant 6.660000e-01 : f32
    %90 = vector.broadcast %cst_48 : f32 to vector<2x128xf32>
    %91 = arith.mulf %90, %89 : vector<2x128xf32>
    %92 = math.tanh %91 : vector<2x128xf32>
    %cst_49 = arith.constant 1.715900e+00 : f32
    %93 = vector.broadcast %cst_49 : f32 to vector<2x128xf32>
    %94 = arith.mulf %93, %92 : vector<2x128xf32>
    %95 = arith.truncf %94 : vector<2x128xf32> to vector<2x128xbf16>
    %c0_50 = arith.constant 0 : index
    %c0_51 = arith.constant 0 : index
    %96 = vector.load %arg5[%c0_50, %c0_51] : memref<128x192xbf16, #tpu.memory_space<vmem>>, vector<128x192xbf16>
    %cst_52 = arith.constant dense<0.000000e+00> : vector<2x192xf32>
    %97 = tpu.matmul %95, %96, %cst_52 {dimension_numbers = #tpu.dot_dimension_numbers<[1], [0], [0], [1], [0, 0, 1, 1], [], []>} : vector<2x128xbf16>, vector<128x192xbf16>, vector<2x192xf32> -> vector<2x192xf32>
    %c0_53 = arith.constant 0 : index
    %c0_54 = arith.constant 0 : index
    %98 = vector.load %arg6[%c0_53, %c0_54] : memref<1x192xf32, #tpu.memory_space<vmem>>, vector<1x192xf32>
    %99 = vector.broadcast %98 : vector<1x192xf32> to vector<2x192xf32>
    %100 = arith.addf %97, %99 : vector<2x192xf32>
    %101 = vector.extract_strided_slice %100 {offsets = [0, 0], sizes = [2, 64], strides = [1, 1]} : vector<2x192xf32> to vector<2x64xf32>
    %102 = math.tanh %101 : vector<2x64xf32>
    %103 = vector.extract_strided_slice %100 {offsets = [0, 64], sizes = [2, 64], strides = [1, 1]} : vector<2x192xf32> to vector<2x64xf32>
    %104 = math.tanh %103 : vector<2x64xf32>
    %105 = vector.extract_strided_slice %100 {offsets = [0, 128], sizes = [2, 64], strides = [1, 1]} : vector<2x192xf32> to vector<2x64xf32>
    %106 = arith.negf %105 : vector<2x64xf32>
    %107 = math.exp %106 : vector<2x64xf32>
    %cst_55 = arith.constant 1.000000e+00 : f32
    %108 = vector.broadcast %cst_55 : f32 to vector<2x64xf32>
    %109 = arith.addf %108, %107 : vector<2x64xf32>
    %110 = arith.divf %108, %109 : vector<2x64xf32>
    %cst_56 = arith.constant 1.000000e+00 : f32
    %111 = vector.broadcast %cst_56 : f32 to vector<2x64xf32>
    %112 = arith.subf %111, %110 : vector<2x64xf32>
    %113 = arith.mulf %102, %112 : vector<2x64xf32>
    %114 = arith.mulf %110, %104 : vector<2x64xf32>
    %115 = arith.addf %113, %114 : vector<2x64xf32>
    %116 = arith.index_cast %c2_i32 : i32 to index
    %c0_57 = arith.constant 0 : index
    %c0_58 = arith.constant 0 : index
    %117 = vector.load %arg12[%116, %c0_57, %c0_58] : memref<8x2x64xf32, #tpu.memory_space<vmem>>, vector<1x2x64xf32>
    %118 = vector.shape_cast %117 : vector<1x2x64xf32> to vector<2x64xf32>
    %119 = vector.shape_cast %115 : vector<2x64xf32> to vector<1x2x64xf32>
    tpu.vector_store %arg12[%116, %c0_57, %c0_58], %119 {strides = array<i32>} : memref<8x2x64xf32, #tpu.memory_space<vmem>>, vector<1x2x64xf32>,
    %c3_i32 = arith.constant 3 : i32
    %120 = arith.index_cast %c3_i32 : i32 to index
    %c0_59 = arith.constant 0 : index
    %c0_60 = arith.constant 0 : index
    %121 = vector.load %arg11[%120, %c0_59, %c0_60] : memref<8x2x128xf32, #tpu.memory_space<vmem>>, vector<1x2x128xf32>
    %122 = vector.shape_cast %121 : vector<1x2x128xf32> to vector<2x128xf32>
    %123 = arith.truncf %115 : vector<2x64xf32> to vector<2x64xbf16>
    %c0_61 = arith.constant 0 : index
    %c0_62 = arith.constant 0 : index
    %124 = vector.load %arg3[%c0_61, %c0_62] : memref<64x128xbf16, #tpu.memory_space<vmem>>, vector<64x128xbf16>
    %cst_63 = arith.constant dense<0.000000e+00> : vector<2x128xf32>
    %125 = tpu.matmul %123, %124, %cst_63 {dimension_numbers = #tpu.dot_dimension_numbers<[1], [0], [0], [1], [0, 0, 1, 1], [], []>} : vector<2x64xbf16>, vector<64x128xbf16>, vector<2x128xf32> -> vector<2x128xf32>
    %126 = arith.addf %122, %125 : vector<2x128xf32>
    %cst_64 = arith.constant 6.660000e-01 : f32
    %127 = vector.broadcast %cst_64 : f32 to vector<2x128xf32>
    %128 = arith.mulf %127, %126 : vector<2x128xf32>
    %129 = math.tanh %128 : vector<2x128xf32>
    %cst_65 = arith.constant 1.715900e+00 : f32
    %130 = vector.broadcast %cst_65 : f32 to vector<2x128xf32>
    %131 = arith.mulf %130, %129 : vector<2x128xf32>
    %132 = arith.truncf %131 : vector<2x128xf32> to vector<2x128xbf16>
    %c0_66 = arith.constant 0 : index
    %c0_67 = arith.constant 0 : index
    %133 = vector.load %arg5[%c0_66, %c0_67] : memref<128x192xbf16, #tpu.memory_space<vmem>>, vector<128x192xbf16>
    %cst_68 = arith.constant dense<0.000000e+00> : vector<2x192xf32>
    %134 = tpu.matmul %132, %133, %cst_68 {dimension_numbers = #tpu.dot_dimension_numbers<[1], [0], [0], [1], [0, 0, 1, 1], [], []>} : vector<2x128xbf16>, vector<128x192xbf16>, vector<2x192xf32> -> vector<2x192xf32>
    %c0_69 = arith.constant 0 : index
    %c0_70 = arith.constant 0 : index
    %135 = vector.load %arg6[%c0_69, %c0_70] : memref<1x192xf32, #tpu.memory_space<vmem>>, vector<1x192xf32>
    %136 = vector.broadcast %135 : vector<1x192xf32> to vector<2x192xf32>
    %137 = arith.addf %134, %136 : vector<2x192xf32>
    %138 = vector.extract_strided_slice %137 {offsets = [0, 0], sizes = [2, 64], strides = [1, 1]} : vector<2x192xf32> to vector<2x64xf32>
    %139 = math.tanh %138 : vector<2x64xf32>
    %140 = vector.extract_strided_slice %137 {offsets = [0, 64], sizes = [2, 64], strides = [1, 1]} : vector<2x192xf32> to vector<2x64xf32>
    %141 = math.tanh %140 : vector<2x64xf32>
    %142 = vector.extract_strided_slice %137 {offsets = [0, 128], sizes = [2, 64], strides = [1, 1]} : vector<2x192xf32> to vector<2x64xf32>
    %143 = arith.negf %142 : vector<2x64xf32>
    %144 = math.exp %143 : vector<2x64xf32>
    %cst_71 = arith.constant 1.000000e+00 : f32
    %145 = vector.broadcast %cst_71 : f32 to vector<2x64xf32>
    %146 = arith.addf %145, %144 : vector<2x64xf32>
    %147 = arith.divf %145, %146 : vector<2x64xf32>
    %cst_72 = arith.constant 1.000000e+00 : f32
    %148 = vector.broadcast %cst_72 : f32 to vector<2x64xf32>
    %149 = arith.subf %148, %147 : vector<2x64xf32>
    %150 = arith.mulf %139, %149 : vector<2x64xf32>
    %151 = arith.mulf %147, %141 : vector<2x64xf32>
    %152 = arith.addf %150, %151 : vector<2x64xf32>
    %153 = arith.index_cast %c3_i32 : i32 to index
    %c0_73 = arith.constant 0 : index
    %c0_74 = arith.constant 0 : index
    %154 = vector.load %arg12[%153, %c0_73, %c0_74] : memref<8x2x64xf32, #tpu.memory_space<vmem>>, vector<1x2x64xf32>
    %155 = vector.shape_cast %154 : vector<1x2x64xf32> to vector<2x64xf32>
    %156 = vector.shape_cast %152 : vector<2x64xf32> to vector<1x2x64xf32>
    tpu.vector_store %arg12[%153, %c0_73, %c0_74], %156 {strides = array<i32>} : memref<8x2x64xf32, #tpu.memory_space<vmem>>, vector<1x2x64xf32>,
    %c4_i32 = arith.constant 4 : i32
    %157 = arith.index_cast %c4_i32 : i32 to index
    %c0_75 = arith.constant 0 : index
    %c0_76 = arith.constant 0 : index
    %158 = vector.load %arg11[%157, %c0_75, %c0_76] : memref<8x2x128xf32, #tpu.memory_space<vmem>>, vector<1x2x128xf32>
    %159 = vector.shape_cast %158 : vector<1x2x128xf32> to vector<2x128xf32>
    %160 = arith.truncf %152 : vector<2x64xf32> to vector<2x64xbf16>
    %c0_77 = arith.constant 0 : index
    %c0_78 = arith.constant 0 : index
    %161 = vector.load %arg3[%c0_77, %c0_78] : memref<64x128xbf16, #tpu.memory_space<vmem>>, vector<64x128xbf16>
    %cst_79 = arith.constant dense<0.000000e+00> : vector<2x128xf32>
    %162 = tpu.matmul %160, %161, %cst_79 {dimension_numbers = #tpu.dot_dimension_numbers<[1], [0], [0], [1], [0, 0, 1, 1], [], []>} : vector<2x64xbf16>, vector<64x128xbf16>, vector<2x128xf32> -> vector<2x128xf32>
    %163 = arith.addf %159, %162 : vector<2x128xf32>
    %cst_80 = arith.constant 6.660000e-01 : f32
    %164 = vector.broadcast %cst_80 : f32 to vector<2x128xf32>
    %165 = arith.mulf %164, %163 : vector<2x128xf32>
    %166 = math.tanh %165 : vector<2x128xf32>
    %cst_81 = arith.constant 1.715900e+00 : f32
    %167 = vector.broadcast %cst_81 : f32 to vector<2x128xf32>
    %168 = arith.mulf %167, %166 : vector<2x128xf32>
    %169 = arith.truncf %168 : vector<2x128xf32> to vector<2x128xbf16>
    %c0_82 = arith.constant 0 : index
    %c0_83 = arith.constant 0 : index
    %170 = vector.load %arg5[%c0_82, %c0_83] : memref<128x192xbf16, #tpu.memory_space<vmem>>, vector<128x192xbf16>
    %cst_84 = arith.constant dense<0.000000e+00> : vector<2x192xf32>
    %171 = tpu.matmul %169, %170, %cst_84 {dimension_numbers = #tpu.dot_dimension_numbers<[1], [0], [0], [1], [0, 0, 1, 1], [], []>} : vector<2x128xbf16>, vector<128x192xbf16>, vector<2x192xf32> -> vector<2x192xf32>
    %c0_85 = arith.constant 0 : index
    %c0_86 = arith.constant 0 : index
    %172 = vector.load %arg6[%c0_85, %c0_86] : memref<1x192xf32, #tpu.memory_space<vmem>>, vector<1x192xf32>
    %173 = vector.broadcast %172 : vector<1x192xf32> to vector<2x192xf32>
    %174 = arith.addf %171, %173 : vector<2x192xf32>
    %175 = vector.extract_strided_slice %174 {offsets = [0, 0], sizes = [2, 64], strides = [1, 1]} : vector<2x192xf32> to vector<2x64xf32>
    %176 = math.tanh %175 : vector<2x64xf32>
    %177 = vector.extract_strided_slice %174 {offsets = [0, 64], sizes = [2, 64], strides = [1, 1]} : vector<2x192xf32> to vector<2x64xf32>
    %178 = math.tanh %177 : vector<2x64xf32>
    %179 = vector.extract_strided_slice %174 {offsets = [0, 128], sizes = [2, 64], strides = [1, 1]} : vector<2x192xf32> to vector<2x64xf32>
    %180 = arith.negf %179 : vector<2x64xf32>
    %181 = math.exp %180 : vector<2x64xf32>
    %cst_87 = arith.constant 1.000000e+00 : f32
    %182 = vector.broadcast %cst_87 : f32 to vector<2x64xf32>
    %183 = arith.addf %182, %181 : vector<2x64xf32>
    %184 = arith.divf %182, %183 : vector<2x64xf32>
    %cst_88 = arith.constant 1.000000e+00 : f32
    %185 = vector.broadcast %cst_88 : f32 to vector<2x64xf32>
    %186 = arith.subf %185, %184 : vector<2x64xf32>
    %187 = arith.mulf %176, %186 : vector<2x64xf32>
    %188 = arith.mulf %184, %178 : vector<2x64xf32>
    %189 = arith.addf %187, %188 : vector<2x64xf32>
    %190 = arith.index_cast %c4_i32 : i32 to index
    %c0_89 = arith.constant 0 : index
    %c0_90 = arith.constant 0 : index
    %191 = vector.load %arg12[%190, %c0_89, %c0_90] : memref<8x2x64xf32, #tpu.memory_space<vmem>>, vector<1x2x64xf32>
    %192 = vector.shape_cast %191 : vector<1x2x64xf32> to vector<2x64xf32>
    %193 = vector.shape_cast %189 : vector<2x64xf32> to vector<1x2x64xf32>
    tpu.vector_store %arg12[%190, %c0_89, %c0_90], %193 {strides = array<i32>} : memref<8x2x64xf32, #tpu.memory_space<vmem>>, vector<1x2x64xf32>,
    %c5_i32 = arith.constant 5 : i32
    %194 = arith.index_cast %c5_i32 : i32 to index
    %c0_91 = arith.constant 0 : index
    %c0_92 = arith.constant 0 : index
    %195 = vector.load %arg11[%194, %c0_91, %c0_92] : memref<8x2x128xf32, #tpu.memory_space<vmem>>, vector<1x2x128xf32>
    %196 = vector.shape_cast %195 : vector<1x2x128xf32> to vector<2x128xf32>
    %197 = arith.truncf %189 : vector<2x64xf32> to vector<2x64xbf16>
    %c0_93 = arith.constant 0 : index
    %c0_94 = arith.constant 0 : index
    %198 = vector.load %arg3[%c0_93, %c0_94] : memref<64x128xbf16, #tpu.memory_space<vmem>>, vector<64x128xbf16>
    %cst_95 = arith.constant dense<0.000000e+00> : vector<2x128xf32>
    %199 = tpu.matmul %197, %198, %cst_95 {dimension_numbers = #tpu.dot_dimension_numbers<[1], [0], [0], [1], [0, 0, 1, 1], [], []>} : vector<2x64xbf16>, vector<64x128xbf16>, vector<2x128xf32> -> vector<2x128xf32>
    %200 = arith.addf %196, %199 : vector<2x128xf32>
    %cst_96 = arith.constant 6.660000e-01 : f32
    %201 = vector.broadcast %cst_96 : f32 to vector<2x128xf32>
    %202 = arith.mulf %201, %200 : vector<2x128xf32>
    %203 = math.tanh %202 : vector<2x128xf32>
    %cst_97 = arith.constant 1.715900e+00 : f32
    %204 = vector.broadcast %cst_97 : f32 to vector<2x128xf32>
    %205 = arith.mulf %204, %203 : vector<2x128xf32>
    %206 = arith.truncf %205 : vector<2x128xf32> to vector<2x128xbf16>
    %c0_98 = arith.constant 0 : index
    %c0_99 = arith.constant 0 : index
    %207 = vector.load %arg5[%c0_98, %c0_99] : memref<128x192xbf16, #tpu.memory_space<vmem>>, vector<128x192xbf16>
    %cst_100 = arith.constant dense<0.000000e+00> : vector<2x192xf32>
    %208 = tpu.matmul %206, %207, %cst_100 {dimension_numbers = #tpu.dot_dimension_numbers<[1], [0], [0], [1], [0, 0, 1, 1], [], []>} : vector<2x128xbf16>, vector<128x192xbf16>, vector<2x192xf32> -> vector<2x192xf32>
    %c0_101 = arith.constant 0 : index
    %c0_102 = arith.constant 0 : index
    %209 = vector.load %arg6[%c0_101, %c0_102] : memref<1x192xf32, #tpu.memory_space<vmem>>, vector<1x192xf32>
    %210 = vector.broadcast %209 : vector<1x192xf32> to vector<2x192xf32>
    %211 = arith.addf %208, %210 : vector<2x192xf32>
    %212 = vector.extract_strided_slice %211 {offsets = [0, 0], sizes = [2, 64], strides = [1, 1]} : vector<2x192xf32> to vector<2x64xf32>
    %213 = math.tanh %212 : vector<2x64xf32>
    %214 = vector.extract_strided_slice %211 {offsets = [0, 64], sizes = [2, 64], strides = [1, 1]} : vector<2x192xf32> to vector<2x64xf32>
    %215 = math.tanh %214 : vector<2x64xf32>
    %216 = vector.extract_strided_slice %211 {offsets = [0, 128], sizes = [2, 64], strides = [1, 1]} : vector<2x192xf32> to vector<2x64xf32>
    %217 = arith.negf %216 : vector<2x64xf32>
    %218 = math.exp %217 : vector<2x64xf32>
    %cst_103 = arith.constant 1.000000e+00 : f32
    %219 = vector.broadcast %cst_103 : f32 to vector<2x64xf32>
    %220 = arith.addf %219, %218 : vector<2x64xf32>
    %221 = arith.divf %219, %220 : vector<2x64xf32>
    %cst_104 = arith.constant 1.000000e+00 : f32
    %222 = vector.broadcast %cst_104 : f32 to vector<2x64xf32>
    %223 = arith.subf %222, %221 : vector<2x64xf32>
    %224 = arith.mulf %213, %223 : vector<2x64xf32>
    %225 = arith.mulf %221, %215 : vector<2x64xf32>
    %226 = arith.addf %224, %225 : vector<2x64xf32>
    %227 = arith.index_cast %c5_i32 : i32 to index
    %c0_105 = arith.constant 0 : index
    %c0_106 = arith.constant 0 : index
    %228 = vector.load %arg12[%227, %c0_105, %c0_106] : memref<8x2x64xf32, #tpu.memory_space<vmem>>, vector<1x2x64xf32>
    %229 = vector.shape_cast %228 : vector<1x2x64xf32> to vector<2x64xf32>
    %230 = vector.shape_cast %226 : vector<2x64xf32> to vector<1x2x64xf32>
    tpu.vector_store %arg12[%227, %c0_105, %c0_106], %230 {strides = array<i32>} : memref<8x2x64xf32, #tpu.memory_space<vmem>>, vector<1x2x64xf32>,
    %c6_i32 = arith.constant 6 : i32
    %231 = arith.index_cast %c6_i32 : i32 to index
    %c0_107 = arith.constant 0 : index
    %c0_108 = arith.constant 0 : index
    %232 = vector.load %arg11[%231, %c0_107, %c0_108] : memref<8x2x128xf32, #tpu.memory_space<vmem>>, vector<1x2x128xf32>
    %233 = vector.shape_cast %232 : vector<1x2x128xf32> to vector<2x128xf32>
    %234 = arith.truncf %226 : vector<2x64xf32> to vector<2x64xbf16>
    %c0_109 = arith.constant 0 : index
    %c0_110 = arith.constant 0 : index
    %235 = vector.load %arg3[%c0_109, %c0_110] : memref<64x128xbf16, #tpu.memory_space<vmem>>, vector<64x128xbf16>
    %cst_111 = arith.constant dense<0.000000e+00> : vector<2x128xf32>
    %236 = tpu.matmul %234, %235, %cst_111 {dimension_numbers = #tpu.dot_dimension_numbers<[1], [0], [0], [1], [0, 0, 1, 1], [], []>} : vector<2x64xbf16>, vector<64x128xbf16>, vector<2x128xf32> -> vector<2x128xf32>
    %237 = arith.addf %233, %236 : vector<2x128xf32>
    %cst_112 = arith.constant 6.660000e-01 : f32
    %238 = vector.broadcast %cst_112 : f32 to vector<2x128xf32>
    %239 = arith.mulf %238, %237 : vector<2x128xf32>
    %240 = math.tanh %239 : vector<2x128xf32>
    %cst_113 = arith.constant 1.715900e+00 : f32
    %241 = vector.broadcast %cst_113 : f32 to vector<2x128xf32>
    %242 = arith.mulf %241, %240 : vector<2x128xf32>
    %243 = arith.truncf %242 : vector<2x128xf32> to vector<2x128xbf16>
    %c0_114 = arith.constant 0 : index
    %c0_115 = arith.constant 0 : index
    %244 = vector.load %arg5[%c0_114, %c0_115] : memref<128x192xbf16, #tpu.memory_space<vmem>>, vector<128x192xbf16>
    %cst_116 = arith.constant dense<0.000000e+00> : vector<2x192xf32>
    %245 = tpu.matmul %243, %244, %cst_116 {dimension_numbers = #tpu.dot_dimension_numbers<[1], [0], [0], [1], [0, 0, 1, 1], [], []>} : vector<2x128xbf16>, vector<128x192xbf16>, vector<2x192xf32> -> vector<2x192xf32>
    %c0_117 = arith.constant 0 : index
    %c0_118 = arith.constant 0 : index
    %246 = vector.load %arg6[%c0_117, %c0_118] : memref<1x192xf32, #tpu.memory_space<vmem>>, vector<1x192xf32>
    %247 = vector.broadcast %246 : vector<1x192xf32> to vector<2x192xf32>
    %248 = arith.addf %245, %247 : vector<2x192xf32>
    %249 = vector.extract_strided_slice %248 {offsets = [0, 0], sizes = [2, 64], strides = [1, 1]} : vector<2x192xf32> to vector<2x64xf32>
    %250 = math.tanh %249 : vector<2x64xf32>
    %251 = vector.extract_strided_slice %248 {offsets = [0, 64], sizes = [2, 64], strides = [1, 1]} : vector<2x192xf32> to vector<2x64xf32>
    %252 = math.tanh %251 : vector<2x64xf32>
    %253 = vector.extract_strided_slice %248 {offsets = [0, 128], sizes = [2, 64], strides = [1, 1]} : vector<2x192xf32> to vector<2x64xf32>
    %254 = arith.negf %253 : vector<2x64xf32>
    %255 = math.exp %254 : vector<2x64xf32>
    %cst_119 = arith.constant 1.000000e+00 : f32
    %256 = vector.broadcast %cst_119 : f32 to vector<2x64xf32>
    %257 = arith.addf %256, %255 : vector<2x64xf32>
    %258 = arith.divf %256, %257 : vector<2x64xf32>
    %cst_120 = arith.constant 1.000000e+00 : f32
    %259 = vector.broadcast %cst_120 : f32 to vector<2x64xf32>
    %260 = arith.subf %259, %258 : vector<2x64xf32>
    %261 = arith.mulf %250, %260 : vector<2x64xf32>
    %262 = arith.mulf %258, %252 : vector<2x64xf32>
    %263 = arith.addf %261, %262 : vector<2x64xf32>
    %264 = arith.index_cast %c6_i32 : i32 to index
    %c0_121 = arith.constant 0 : index
    %c0_122 = arith.constant 0 : index
    %265 = vector.load %arg12[%264, %c0_121, %c0_122] : memref<8x2x64xf32, #tpu.memory_space<vmem>>, vector<1x2x64xf32>
    %266 = vector.shape_cast %265 : vector<1x2x64xf32> to vector<2x64xf32>
    %267 = vector.shape_cast %263 : vector<2x64xf32> to vector<1x2x64xf32>
    tpu.vector_store %arg12[%264, %c0_121, %c0_122], %267 {strides = array<i32>} : memref<8x2x64xf32, #tpu.memory_space<vmem>>, vector<1x2x64xf32>,
    %c7_i32 = arith.constant 7 : i32
    %268 = arith.index_cast %c7_i32 : i32 to index
    %c0_123 = arith.constant 0 : index
    %c0_124 = arith.constant 0 : index
    %269 = vector.load %arg11[%268, %c0_123, %c0_124] : memref<8x2x128xf32, #tpu.memory_space<vmem>>, vector<1x2x128xf32>
    %270 = vector.shape_cast %269 : vector<1x2x128xf32> to vector<2x128xf32>
    %271 = arith.truncf %263 : vector<2x64xf32> to vector<2x64xbf16>
    %c0_125 = arith.constant 0 : index
    %c0_126 = arith.constant 0 : index
    %272 = vector.load %arg3[%c0_125, %c0_126] : memref<64x128xbf16, #tpu.memory_space<vmem>>, vector<64x128xbf16>
    %cst_127 = arith.constant dense<0.000000e+00> : vector<2x128xf32>
    %273 = tpu.matmul %271, %272, %cst_127 {dimension_numbers = #tpu.dot_dimension_numbers<[1], [0], [0], [1], [0, 0, 1, 1], [], []>} : vector<2x64xbf16>, vector<64x128xbf16>, vector<2x128xf32> -> vector<2x128xf32>
    %274 = arith.addf %270, %273 : vector<2x128xf32>
    %cst_128 = arith.constant 6.660000e-01 : f32
    %275 = vector.broadcast %cst_128 : f32 to vector<2x128xf32>
    %276 = arith.mulf %275, %274 : vector<2x128xf32>
    %277 = math.tanh %276 : vector<2x128xf32>
    %cst_129 = arith.constant 1.715900e+00 : f32
    %278 = vector.broadcast %cst_129 : f32 to vector<2x128xf32>
    %279 = arith.mulf %278, %277 : vector<2x128xf32>
    %280 = arith.truncf %279 : vector<2x128xf32> to vector<2x128xbf16>
    %c0_130 = arith.constant 0 : index
    %c0_131 = arith.constant 0 : index
    %281 = vector.load %arg5[%c0_130, %c0_131] : memref<128x192xbf16, #tpu.memory_space<vmem>>, vector<128x192xbf16>
    %cst_132 = arith.constant dense<0.000000e+00> : vector<2x192xf32>
    %282 = tpu.matmul %280, %281, %cst_132 {dimension_numbers = #tpu.dot_dimension_numbers<[1], [0], [0], [1], [0, 0, 1, 1], [], []>} : vector<2x128xbf16>, vector<128x192xbf16>, vector<2x192xf32> -> vector<2x192xf32>
    %c0_133 = arith.constant 0 : index
    %c0_134 = arith.constant 0 : index
    %283 = vector.load %arg6[%c0_133, %c0_134] : memref<1x192xf32, #tpu.memory_space<vmem>>, vector<1x192xf32>
    %284 = vector.broadcast %283 : vector<1x192xf32> to vector<2x192xf32>
    %285 = arith.addf %282, %284 : vector<2x192xf32>
    %286 = vector.extract_strided_slice %285 {offsets = [0, 0], sizes = [2, 64], strides = [1, 1]} : vector<2x192xf32> to vector<2x64xf32>
    %287 = math.tanh %286 : vector<2x64xf32>
    %288 = vector.extract_strided_slice %285 {offsets = [0, 64], sizes = [2, 64], strides = [1, 1]} : vector<2x192xf32> to vector<2x64xf32>
    %289 = math.tanh %288 : vector<2x64xf32>
    %290 = vector.extract_strided_slice %285 {offsets = [0, 128], sizes = [2, 64], strides = [1, 1]} : vector<2x192xf32> to vector<2x64xf32>
    %291 = arith.negf %290 : vector<2x64xf32>
    %292 = math.exp %291 : vector<2x64xf32>
    %cst_135 = arith.constant 1.000000e+00 : f32
    %293 = vector.broadcast %cst_135 : f32 to vector<2x64xf32>
    %294 = arith.addf %293, %292 : vector<2x64xf32>
    %295 = arith.divf %293, %294 : vector<2x64xf32>
    %cst_136 = arith.constant 1.000000e+00 : f32
    %296 = vector.broadcast %cst_136 : f32 to vector<2x64xf32>
    %297 = arith.subf %296, %295 : vector<2x64xf32>
    %298 = arith.mulf %287, %297 : vector<2x64xf32>
    %299 = arith.mulf %295, %289 : vector<2x64xf32>
    %300 = arith.addf %298, %299 : vector<2x64xf32>
    %301 = arith.index_cast %c7_i32 : i32 to index
    %c0_137 = arith.constant 0 : index
    %c0_138 = arith.constant 0 : index
    %302 = vector.load %arg12[%301, %c0_137, %c0_138] : memref<8x2x64xf32, #tpu.memory_space<vmem>>, vector<1x2x64xf32>
    %303 = vector.shape_cast %302 : vector<1x2x64xf32> to vector<2x64xf32>
    %304 = vector.shape_cast %300 : vector<2x64xf32> to vector<1x2x64xf32>
    tpu.vector_store %arg12[%301, %c0_137, %c0_138], %304 {strides = array<i32>} : memref<8x2x64xf32, #tpu.memory_space<vmem>>, vector<1x2x64xf32>,
    %c8_i32 = arith.constant 8 : i32
    %c0_139 = arith.constant 0 : index
    %c0_140 = arith.constant 0 : index
    %305 = vector.load %arg10[%c0_139, %c0_140] : memref<2x64xf32, #tpu.memory_space<vmem>>, vector<2x64xf32>
    tpu.vector_store %arg10[%c0_139, %c0_140], %300 {strides = array<i32>} : memref<2x64xf32, #tpu.memory_space<vmem>>, vector<2x64xf32>,
    %c0_141 = arith.constant 0 : index
    %c0_142 = arith.constant 0 : index
    %c0_143 = arith.constant 0 : index
    %306 = vector.load %arg12[%c0_141, %c0_142, %c0_143] : memref<8x2x64xf32, #tpu.memory_space<vmem>>, vector<8x2x64xf32>
    %307 = arith.truncf %306 : vector<8x2x64xf32> to vector<8x2x64xbf16>
    %c0_144 = arith.constant 0 : index
    %c0_145 = arith.constant 0 : index
    %308 = vector.load %arg7[%c0_144, %c0_145] : memref<64x128xbf16, #tpu.memory_space<vmem>>, vector<64x128xbf16>
    "tpu.trace_start"() <{level = 10 : i32, message = "tbh,ha->tba"}> : () -> ()
    %cst_146 = arith.constant dense<0.000000e+00> : vector<8x2x128xf32>
    %309 = tpu.matmul %307, %308, %cst_146 {dimension_numbers = #tpu.dot_dimension_numbers<[2], [0], [0, 1], [1], [0, 0, 0, 1, 1, 1], [], []>} : vector<8x2x64xbf16>, vector<64x128xbf16>, vector<8x2x128xf32> -> vector<8x2x128xf32>
    "tpu.trace_stop"() : () -> ()
    %c0_147 = arith.constant 0 : index
    %c0_148 = arith.constant 0 : index
    %c0_149 = arith.constant 0 : index
    %310 = vector.load %arg8[%c0_147, %c0_148, %c0_149] : memref<1x1x128xf32, #tpu.memory_space<vmem>>, vector<1x1x128xf32>
    %311 = vector.broadcast %310 : vector<1x1x128xf32> to vector<8x2x128xf32>
    %312 = arith.addf %309, %311 : vector<8x2x128xf32>
    %c0_150 = arith.constant 0 : index
    %c0_151 = arith.constant 0 : index
    %c0_152 = arith.constant 0 : index
    %313 = vector.load %arg9[%c0_150, %c0_151, %c0_152] : memref<8x2x128xf32, #tpu.memory_space<vmem>>, vector<8x2x128xf32>
    tpu.vector_store %arg9[%c0_150, %c0_151, %c0_152], %312 {strides = array<i32>} : memref<8x2x128xf32, #tpu.memory_space<vmem>>, vector<8x2x128xf32>,
    return
  }
}

</mosaic_0001>

<bundles_post_ra>
// kernel: conv_cfc_forward.5
= control target key start
LH: loop header
LB: loop body
LE: loop exit
PB: predicated region body
PF: predicated region fallthrough
CT: control target
= control target key end

     0   :  { %s2738_s12 = smov 0   ;;  %s2740_s13 = smov 0   ;;  %s3162_s0 = inlined_call_operand.vmem [shape: bf16[1024,256], index: 0, kind: input, shape index: {}]   ;;  %s3163_s1 = inlined_call_operand.vmem [shape: bf16[256,128], index: 1, kind: input, shape index: {}]   ;;  %s3164_s2 = inlined_call_operand.vmem [shape: f32[3,128], index: 2, kind: input, shape index: {}]   ;;  %s3165_s3 = inlined_call_operand.vmem [shape: bf16[1024,128], index: 3, kind: output, shape index: {}]  }
   0x1   :  { %s2742_s14 = smov 0  }
   0x2 LB: > { %s32_s15 = sadd.s32 1, %s2711_s13  ;;  %p2113_p0 = scmp.ge.s32.totalorder %s2715_s14, 1  ;;  %s2715_s14 = sphi %s2742_s14, %s13_s14   ;;  %s2711_s13 = sphi %s2740_s13, %s3167_s13   ;;  %s2707_s12 = sphi %s2738_s12, %s3166_s12  }
   0x3   : > { %p34_p1 = scmp.ge.s32.totalorder %s32_s15, 2  ;;  %p192_p2 = scmp.lt.s32.totalorder %s2715_s14, 3 }
   0x5   : > { %s3169_s15 = smov (%p34_p1, %s32_s15), 0  ;;  %p193_p3 = pnand %p2113_p0, %p192_p2 }
   0x6   : > { %v2581_v0 = vld [vmem:[%s3163_s1] sm:$0xff] (!%p193_p3)   ;;  %v2717_v1 = vmov (!%p193_p3), 0   ;;  %s2114_s18 = sshll.u32 (!%p193_p3), %s2707_s12, 6  ;;  %v2582_v2 = vld [vmem:[%s3163_s1 + $0x8] sm:$0xff] (!%p193_p3)   ;;  %v2583_v3 = vld [vmem:[%s3163_s1 + $0x10] sm:$0xff] (!%p193_p3)  }
   0x7   : > { %196 = sbr.rel (%p193_p3) target bundleno = 417 (0x1a1), region = 32  ;;  %915 = vmatprep.subr.bf16.mxu0 (!%p193_p3), %v2717_v1  ;;  %2524 = vmatprep.subr.bf16.mxu1 (!%p193_p3), %v2717_v1  ;;  %p238_p4 = scmp.lt.s32.totalorder (!%p193_p3), %s2114_s18, 127  ;;  %v2584_v4 = vld [vmem:[%s3163_s1 + $0x18] sm:$0xff] (!%p193_p3)   ;;  %v2585_v5 = vld [vmem:[%s3163_s1 + $0x20] sm:$0xff] (!%p193_p3)   ;;  %v2586_v7 = vld [vmem:[%s3163_s1 + $0x28] sm:$0xff] (!%p193_p3)  }
   0x8   : > { %916 = vmatpush1.bf16.msra.mxu0 (!%p193_p3), %v2581_v0  ;;  %2540 = vmatpush1.bf16.msra.mxu1 (!%p193_p3), %v2581_v0  ;;  %v2587_v9 = vld [vmem:[%s3163_s1 + $0x30] sm:$0xff] (!%p193_p3)   ;;  %v2588_v10 = vld [vmem:[%s3163_s1 + $0x38] sm:$0xff] (!%p193_p3)   ;;  %v2589_v11 = vld [vmem:[%s3163_s1 + $0x40] sm:$0xff] (!%p193_p3)  }
   0x9   : > { %917 = vmatprep.subr.bf16.mxu0 (!%p193_p3), %v2717_v1  ;;  %2525 = vmatprep.subr.bf16.mxu1 (!%p193_p3), %v2717_v1  ;;  %v2590_v12 = vld [vmem:[%s3163_s1 + $0x48] sm:$0xff] (!%p193_p3)   ;;  %v2591_v13 = vld [vmem:[%s3163_s1 + $0x50] sm:$0xff] (!%p193_p3)   ;;  %v2592_v14 = vld [vmem:[%s3163_s1 + $0x58] sm:$0xff] (!%p193_p3)  }
   0xa   : > { %v2593_v15 = vld [vmem:[%s3163_s1 + $0x60] sm:$0xff] (!%p193_p3)   ;;  %v2594_v16 = vld [vmem:[%s3163_s1 + $0x68] sm:$0xff] (!%p193_p3)   ;;  %v2595_v17 = vld [vmem:[%s3163_s1 + $0x70] sm:$0xff] (!%p193_p3)  }
   0xb   : > { %v2596_v18 = vld [vmem:[%s3163_s1 + $0x78] sm:$0xff] (!%p193_p3)  }
   0xc   : > { %918 = vmatpush1.bf16.msra.mxu0 (!%p193_p3), %v2582_v2  ;;  %2541 = vmatpush1.bf16.msra.mxu1 (!%p193_p3), %v2582_v2 }
   0xd   : > { %919 = vmatprep.subr.bf16.mxu0 (!%p193_p3), %v2717_v1  ;;  %2526 = vmatprep.subr.bf16.mxu1 (!%p193_p3), %v2717_v1 }
   0xe   : > { %s3171_s18 = smov (!%p238_p4, %s2114_s18), 127 }
   0xf   : > { %s2268_s25 = sshll.u32 %s3171_s18, 3  ;;  %s2118_s9 = sshll.u32 %s3171_s18, 2 }
  0x10   : > { %920 = vmatpush1.bf16.msra.mxu0 %v2583_v3  ;;  %2542 = vmatpush1.bf16.msra.mxu1 %v2583_v3  ;;  %s2785_s30 = scalar_lea.vmem %s3162_s0, %s2268_s25  ;;  %s2941_s11 = scalar_lea.vmem %s3165_s3, %s2118_s9 }
  0x11   : > { %921 = vmatprep.subr.bf16.mxu0 %v2717_v1  ;;  %2527 = vmatprep.subr.bf16.mxu1 %v2717_v1  ;;  %v2599_v6 = vld [vmem:[%s2785_s30 + $0x4] ss:$8 sps:$4 sm:$0xff]   ;;  %v2597_v19 = vld [vmem:[%s2785_s30] ss:$8 sps:$4 sm:$0xff]   ;;  %v2603_v21 = vld [vmem:[%s2785_s30 + $0x14] ss:$8 sps:$4 sm:$0xff]  }
  0x12   : > { %v2602_v8 = vld [vmem:[%s2785_s30 + $0x104] ss:$8 sps:$4 sm:$0xff]   ;;  %947 = vmatprep.mubr.bf16.mxu0 %v2599_v6  ;;  %v2600_v20 = vld [vmem:[%s2785_s30 + $0x100] ss:$8 sps:$4 sm:$0xff]   ;;  %v2605_v22 = vld [vmem:[%s2785_s30 + $0x114] ss:$8 sps:$4 sm:$0xff]  }
  0x13   : > { %1075 = vmatprep.mubr.bf16.mxu1 %v2602_v8  ;;  %v2607_v23 = vld [vmem:[%s2785_s30 + $0x10] ss:$8 sps:$4 sm:$0xff]   ;;  %v2609_v25 = vld [vmem:[%s2785_s30 + $0x24] ss:$8 sps:$4 sm:$0xff]   ;;  %v2613_v27 = vld [vmem:[%s2785_s30 + $0x20] ss:$8 sps:$4 sm:$0xff]  }
  0x14   : > { %922 = vmatpush1.bf16.msra.mxu0 %v2584_v4  ;;  %2543 = vmatpush1.bf16.msra.mxu1 %v2584_v4  ;;  %v2608_v24 = vld [vmem:[%s2785_s30 + $0x110] ss:$8 sps:$4 sm:$0xff]   ;;  %v2611_v26 = vld [vmem:[%s2785_s30 + $0x124] ss:$8 sps:$4 sm:$0xff]   ;;  %v2614_v28 = vld [vmem:[%s2785_s30 + $0x120] ss:$8 sps:$4 sm:$0xff]  }
  0x15   : > { %923 = vmatprep.subr.bf16.mxu0 %v2717_v1  ;;  %2528 = vmatprep.subr.bf16.mxu1 %v2717_v1  ;;  %v2615_v29 = vld [vmem:[%s2785_s30 + $0x34] ss:$8 sps:$4 sm:$0xff]   ;;  %v2619_v31 = vld [vmem:[%s2785_s30 + $0x30] ss:$8 sps:$4 sm:$0xff]   ;;  %v2621_v33 = vld [vmem:[%s2785_s30 + $0x44] ss:$8 sps:$4 sm:$0xff]  }
  0x16   : > { %v2617_v30 = vld [vmem:[%s2785_s30 + $0x134] ss:$8 sps:$4 sm:$0xff]   ;;  %v2620_v32 = vld [vmem:[%s2785_s30 + $0x130] ss:$8 sps:$4 sm:$0xff]   ;;  %v2623_v34 = vld [vmem:[%s2785_s30 + $0x144] ss:$8 sps:$4 sm:$0xff]  }
  0x17   : > { %v2625_v35 = vld [vmem:[%s2785_s30 + $0x40] ss:$8 sps:$4 sm:$0xff]   ;;  %v2627_v37 = vld [vmem:[%s2785_s30 + $0x54] ss:$8 sps:$4 sm:$0xff]   ;;  %v2631_v39 = vld [vmem:[%s2785_s30 + $0x50] ss:$8 sps:$4 sm:$0xff]  }
  0x18   : > { %924 = vmatpush1.bf16.msra.mxu0 %v2585_v5  ;;  %2544 = vmatpush1.bf16.msra.mxu1 %v2585_v5  ;;  %v2626_v36 = vld [vmem:[%s2785_s30 + $0x140] ss:$8 sps:$4 sm:$0xff]   ;;  %v2629_v38 = vld [vmem:[%s2785_s30 + $0x154] ss:$8 sps:$4 sm:$0xff]   ;;  %v2632_v40 = vld [vmem:[%s2785_s30 + $0x150] ss:$8 sps:$4 sm:$0xff]  }
  0x19   : > { %925 = vmatprep.subr.bf16.mxu0 %v2717_v1  ;;  %2529 = vmatprep.subr.bf16.mxu1 %v2717_v1  ;;  %v2633_v41 = vld [vmem:[%s2785_s30 + $0x64] ss:$8 sps:$4 sm:$0xff]   ;;  %v2637_v43 = vld [vmem:[%s2785_s30 + $0x60] ss:$8 sps:$4 sm:$0xff]   ;;  %v2639_v45 = vld [vmem:[%s2785_s30 + $0x74] ss:$8 sps:$4 sm:$0xff]  }
  0x1a   : > { %v2635_v42 = vld [vmem:[%s2785_s30 + $0x164] ss:$8 sps:$4 sm:$0xff]   ;;  %v2638_v44 = vld [vmem:[%s2785_s30 + $0x160] ss:$8 sps:$4 sm:$0xff]   ;;  %v2641_v46 = vld [vmem:[%s2785_s30 + $0x174] ss:$8 sps:$4 sm:$0xff]  }
  0x1b   : > { %v2643_v47 = vld [vmem:[%s2785_s30 + $0x70] ss:$8 sps:$4 sm:$0xff]   ;;  %v2645_v49 = vld [vmem:[%s2785_s30 + $0x84] ss:$8 sps:$4 sm:$0xff]   ;;  %v2649_v51 = vld [vmem:[%s2785_s30 + $0x80] ss:$8 sps:$4 sm:$0xff]  }
  0x1c   : > { %926 = vmatpush1.bf16.msra.mxu0 %v2586_v7  ;;  %2545 = vmatpush1.bf16.msra.mxu1 %v2586_v7  ;;  %v2644_v48 = vld [vmem:[%s2785_s30 + $0x170] ss:$8 sps:$4 sm:$0xff]   ;;  %v2647_v50 = vld [vmem:[%s2785_s30 + $0x184] ss:$8 sps:$4 sm:$0xff]   ;;  %v2650_v52 = vld [vmem:[%s2785_s30 + $0x180] ss:$8 sps:$4 sm:$0xff]  }
  0x1d   : > { %927 = vmatprep.subr.bf16.mxu0 %v2717_v1  ;;  %2530 = vmatprep.subr.bf16.mxu1 %v2717_v1  ;;  %v2651_v53 = vld [vmem:[%s2785_s30 + $0x94] ss:$8 sps:$4 sm:$0xff]   ;;  %v2655_v55 = vld [vmem:[%s2785_s30 + $0x90] ss:$8 sps:$4 sm:$0xff]   ;;  %v2657_v57 = vld [vmem:[%s2785_s30 + $0xa4] ss:$8 sps:$4 sm:$0xff]  }
  0x1e   : > { %v2653_v54 = vld [vmem:[%s2785_s30 + $0x194] ss:$8 sps:$4 sm:$0xff]   ;;  %v2656_v56 = vld [vmem:[%s2785_s30 + $0x190] ss:$8 sps:$4 sm:$0xff]   ;;  %v2659_v58 = vld [vmem:[%s2785_s30 + $0x1a4] ss:$8 sps:$4 sm:$0xff]  }
  0x1f   : > { %v2661_v59 = vld [vmem:[%s2785_s30 + $0xa0] ss:$8 sps:$4 sm:$0xff]   ;;  %v2663_v61 = vld [vmem:[%s2785_s30 + $0xb4] ss:$8 sps:$4 sm:$0xff]   ;;  %v2667_v63 = vld [vmem:[%s2785_s30 + $0xb0] ss:$8 sps:$4 sm:$0xff]  }
  0x20   : > { %928 = vmatpush1.bf16.msra.mxu0 %v2587_v9  ;;  %2546 = vmatpush1.bf16.msra.mxu1 %v2587_v9  ;;  %v2662_v60 = vld [vmem:[%s2785_s30 + $0x1a0] ss:$8 sps:$4 sm:$0xff]   ;;  %v2665_v62 = vld [vmem:[%s2785_s30 + $0x1b4] ss:$8 sps:$4 sm:$0xff]   ;;  %v2668_v0 = vld [vmem:[%s2785_s30 + $0x1b0] ss:$8 sps:$4 sm:$0xff]  }
  0x21   : > { %929 = vmatprep.subr.bf16.mxu0 %v2717_v1  ;;  %2531 = vmatprep.subr.bf16.mxu1 %v2717_v1  ;;  %v2671_v2 = vld [vmem:[%s2785_s30 + $0x1c4] ss:$8 sps:$4 sm:$0xff]   ;;  %v2673_v3 = vld [vmem:[%s2785_s30 + $0xc0] ss:$8 sps:$4 sm:$0xff]   ;;  %v2675_v5 = vld [vmem:[%s2785_s30 + $0xd4] ss:$8 sps:$4 sm:$0xff]  }
  0x22   : > { %v2674_v4 = vld [vmem:[%s2785_s30 + $0x1c0] ss:$8 sps:$4 sm:$0xff]   ;;  %v2677_v6 = vld [vmem:[%s2785_s30 + $0x1d4] ss:$8 sps:$4 sm:$0xff]   ;;  %v2679_v7 = vld [vmem:[%s2785_s30 + $0xd0] ss:$8 sps:$4 sm:$0xff]  }
  0x23   : > { %v2680_v8 = vld [vmem:[%s2785_s30 + $0x1d0] ss:$8 sps:$4 sm:$0xff]   ;;  %v2681_v9 = vld [vmem:[%s2785_s30 + $0xe4] ss:$8 sps:$4 sm:$0xff]  }
  0x24   : > { %930 = vmatpush1.bf16.msra.mxu0 %v2588_v10  ;;  %2547 = vmatpush1.bf16.msra.mxu1 %v2588_v10  ;;  %v2683_v10 = vld [vmem:[%s2785_s30 + $0x1e4] ss:$8 sps:$4 sm:$0xff]  }
  0x25   : > { %931 = vmatprep.subr.bf16.mxu0 %v2717_v1  ;;  %2532 = vmatprep.subr.bf16.mxu1 %v2717_v1 }
  0x28   : > { %932 = vmatpush1.bf16.msra.mxu0 %v2589_v11  ;;  %2548 = vmatpush1.bf16.msra.mxu1 %v2589_v11  ;;  %v2685_v11 = vld [vmem:[%s2785_s30 + $0xe0] ss:$8 sps:$4 sm:$0xff]  }
  0x29   : > { %933 = vmatprep.subr.bf16.mxu0 %v2717_v1  ;;  %2533 = vmatprep.subr.bf16.mxu1 %v2717_v1 }
  0x2c   : > { %934 = vmatpush1.bf16.msra.mxu0 %v2590_v12  ;;  %2549 = vmatpush1.bf16.msra.mxu1 %v2590_v12  ;;  %v2686_v12 = vld [vmem:[%s2785_s30 + $0x1e0] ss:$8 sps:$4 sm:$0xff]  }
  0x2d   : > { %935 = vmatprep.subr.bf16.mxu0 %v2717_v1  ;;  %2534 = vmatprep.subr.bf16.mxu1 %v2717_v1 }
  0x30   : > { %936 = vmatpush1.bf16.msra.mxu0 %v2591_v13  ;;  %2550 = vmatpush1.bf16.msra.mxu1 %v2591_v13  ;;  %v2687_v13 = vld [vmem:[%s2785_s30 + $0xf4] ss:$8 sps:$4 sm:$0xff]  }
  0x31   : > { %937 = vmatprep.subr.bf16.mxu0 %v2717_v1  ;;  %2535 = vmatprep.subr.bf16.mxu1 %v2717_v1 }
  0x34   : > { %938 = vmatpush1.bf16.msra.mxu0 %v2592_v14  ;;  %2551 = vmatpush1.bf16.msra.mxu1 %v2592_v14  ;;  %v2689_v14 = vld [vmem:[%s2785_s30 + $0x1f4] ss:$8 sps:$4 sm:$0xff]  }
  0x35   : > { %939 = vmatprep.subr.bf16.mxu0 %v2717_v1  ;;  %2536 = vmatprep.subr.bf16.mxu1 %v2717_v1 }
  0x38   : > { %940 = vmatpush1.bf16.msra.mxu0 %v2593_v15  ;;  %2552 = vmatpush1.bf16.msra.mxu1 %v2593_v15  ;;  %v2691_v15 = vld [vmem:[%s2785_s30 + $0xf0] ss:$8 sps:$4 sm:$0xff]  }
  0x39   : > { %941 = vmatprep.subr.bf16.mxu0 %v2717_v1  ;;  %2537 = vmatprep.subr.bf16.mxu1 %v2717_v1 }
  0x3c   : > { %942 = vmatpush1.bf16.msra.mxu0 %v2594_v16  ;;  %2553 = vmatpush1.bf16.msra.mxu1 %v2594_v16  ;;  %v2692_v16 = vld [vmem:[%s2785_s30 + $0x1f0] ss:$8 sps:$4 sm:$0xff]  }
  0x3d   : > { %943 = vmatprep.subr.bf16.mxu0 %v2717_v1  ;;  %2538 = vmatprep.subr.bf16.mxu1 %v2717_v1 }
  0x40   : > { %944 = vmatpush1.bf16.msra.mxu0 %v2595_v17  ;;  %2554 = vmatpush1.bf16.msra.mxu1 %v2595_v17  ;;  %v2911_v17 = vld [vmem:[%s3164_s2] ss:$0 sm:$0xff] }
  0x41   : > { %945 = vmatprep.subr.bf16.mxu0 %v2717_v1  ;;  %2539 = vmatprep.subr.bf16.mxu1 %v2717_v1  ;;  %v2669_v1 = vld [vmem:[%s2785_s30 + $0xc4] ss:$8 sps:$4 sm:$0xff]  }
  0x44   : > { %946 = vmatpush1.bf16.msra.mxu0 %v2596_v18  ;;  %2555 = vmatpush1.bf16.msra.mxu1 %v2596_v18 }
  0x47   : > { %948 = vmatmul.mubr.bf16.vlgmr.msra.gmra.mrb[0].mxu0 %v2597_v19  ;;  %1076 = vmatmul.mubr.bf16.vlgmr.msra.gmra.mrb[0].mxu1 %v2600_v20 }
  0x48   : > { %955 = vmatprep.mubr.bf16.mxu0 %v2603_v21  ;;  %1083 = vmatprep.mubr.bf16.mxu1 %v2605_v22 }
  0x4f   : > { %956 = vmatmul.mubr.bf16.gmra.mrb[4].mxu0 %v2607_v23  ;;  %1084 = vmatmul.mubr.bf16.gmra.mrb[4].mxu1 %v2608_v24  ;;  %v2918_v24 = vld [vmem:[%s3164_s2 + $0x1] ss:$0 sm:$0xff] }
  0x50   : > { %963 = vmatprep.mubr.bf16.mxu0 %v2609_v25  ;;  %1091 = vmatprep.mubr.bf16.mxu1 %v2611_v26 }
  0x57   : > { %964 = vmatmul.mubr.bf16.gmra.mrb[8].mxu0 %v2613_v27  ;;  %1092 = vmatmul.mubr.bf16.gmra.mrb[8].mxu1 %v2614_v28 }
  0x58   : > { %971 = vmatprep.mubr.bf16.mxu0 %v2615_v29  ;;  %1099 = vmatprep.mubr.bf16.mxu1 %v2617_v30 }
  0x5f   : > { %972 = vmatmul.mubr.bf16.gmra.mrb[12].mxu0 %v2619_v31  ;;  %1100 = vmatmul.mubr.bf16.gmra.mrb[12].mxu1 %v2620_v32 }
  0x60   : > { %979 = vmatprep.mubr.bf16.mxu0 %v2621_v33  ;;  %1107 = vmatprep.mubr.bf16.mxu1 %v2623_v34  ;;  %v2926_v34 = vld [vmem:[%s3164_s2 + $0x2] ss:$0 sm:$0xff] }
  0x67   : > { %980 = vmatmul.mubr.bf16.gmra.mrb[16].mxu0 %v2625_v35  ;;  %1108 = vmatmul.mubr.bf16.gmra.mrb[16].mxu1 %v2626_v36 }
  0x68   : > { %987 = vmatprep.mubr.bf16.mxu0 %v2627_v37  ;;  %1115 = vmatprep.mubr.bf16.mxu1 %v2629_v38 }
  0x6f   : > { %988 = vmatmul.mubr.bf16.gmra.mrb[20].mxu0 %v2631_v39  ;;  %1116 = vmatmul.mubr.bf16.gmra.mrb[20].mxu1 %v2632_v40 }
  0x70   : > { %995 = vmatprep.mubr.bf16.mxu0 %v2633_v41  ;;  %1123 = vmatprep.mubr.bf16.mxu1 %v2635_v42 }
  0x77   : > { %996 = vmatmul.mubr.bf16.gmra.mrb[24].mxu0 %v2637_v43  ;;  %1124 = vmatmul.mubr.bf16.gmra.mrb[24].mxu1 %v2638_v44 }
  0x78   : > { %1003 = vmatprep.mubr.bf16.mxu0 %v2639_v45  ;;  %1131 = vmatprep.mubr.bf16.mxu1 %v2641_v46 }
  0x7f   : > { %1004 = vmatmul.mubr.bf16.gmra.mrb[28].mxu0 %v2643_v47  ;;  %1132 = vmatmul.mubr.bf16.gmra.mrb[28].mxu1 %v2644_v48 }
  0x80   : > { %1011 = vmatprep.mubr.bf16.mxu0 %v2645_v49  ;;  %1139 = vmatprep.mubr.bf16.mxu1 %v2647_v50 }
  0x87   : > { %1012 = vmatmul.mubr.bf16.gmra.mrb[32].mxu0 %v2649_v51  ;;  %1140 = vmatmul.mubr.bf16.gmra.mrb[32].mxu1 %v2650_v52 }
  0x88   : > { %1019 = vmatprep.mubr.bf16.mxu0 %v2651_v53  ;;  %1147 = vmatprep.mubr.bf16.mxu1 %v2653_v54 }
  0x8f   : > { %1020 = vmatmul.mubr.bf16.gmra.mrb[36].mxu0 %v2655_v55  ;;  %1148 = vmatmul.mubr.bf16.gmra.mrb[36].mxu1 %v2656_v56 }
  0x90   : > { %1027 = vmatprep.mubr.bf16.mxu0 %v2657_v57  ;;  %1155 = vmatprep.mubr.bf16.mxu1 %v2659_v58 }
  0x97   : > { %1028 = vmatmul.mubr.bf16.gmra.mrb[40].mxu0 %v2661_v59  ;;  %1156 = vmatmul.mubr.bf16.gmra.mrb[40].mxu1 %v2662_v60 }
  0x98   : > { %1035 = vmatprep.mubr.bf16.mxu0 %v2663_v61  ;;  %1163 = vmatprep.mubr.bf16.mxu1 %v2665_v62 }
  0x9f   : > { %1036 = vmatmul.mubr.bf16.gmra.mrb[44].mxu0 %v2667_v63  ;;  %1164 = vmatmul.mubr.bf16.gmra.mrb[44].mxu1 %v2668_v0 }
  0xa0   : > { %1043 = vmatprep.mubr.bf16.mxu0 %v2669_v1  ;;  %1171 = vmatprep.mubr.bf16.mxu1 %v2671_v2 }
  0xa7   : > { %1044 = vmatmul.mubr.bf16.gmra.mrb[48].mxu0 %v2673_v3  ;;  %1172 = vmatmul.mubr.bf16.gmra.mrb[48].mxu1 %v2674_v4 }
  0xa8   : > { %1051 = vmatprep.mubr.bf16.mxu0 %v2675_v5  ;;  %1179 = vmatprep.mubr.bf16.mxu1 %v2677_v6 }
  0xaf   : > { %1052 = vmatmul.mubr.bf16.gmra.mrb[52].mxu0 %v2679_v7  ;;  %1180 = vmatmul.mubr.bf16.gmra.mrb[52].mxu1 %v2680_v8 }
  0xb0   : > { %1059 = vmatprep.mubr.bf16.mxu0 %v2681_v9  ;;  %1187 = vmatprep.mubr.bf16.mxu1 %v2683_v10 }
  0xb7   : > { %1060 = vmatmul.mubr.bf16.gmra.mrb[56].mxu0 %v2685_v11  ;;  %1188 = vmatmul.mubr.bf16.gmra.mrb[56].mxu1 %v2686_v12 }
  0xb8   : > { %1067 = vmatprep.mubr.bf16.mxu0 %v2687_v13  ;;  %1195 = vmatprep.mubr.bf16.mxu1 %v2689_v14 }
  0xbf   : > { %1068 = vmatmul.mubr.bf16.gmra.mrb[60].mxu0 %v2691_v15  ;;  %1196 = vmatmul.mubr.bf16.gmra.mrb[60].mxu1 %v2692_v16 }
 0x11a   : > { %v949_v18 = vpop.f32.mrb[0].mxu0  ;;  %v1077_v19 = vpop.f32.mrb[0].mxu1 }
 0x11b   : > { %v1404_v20 = vadd.f32 %v2911_v17, %v949_v18  ;;  %v1436_v21 = vadd.f32 %v2911_v17, %v1077_v19  ;;  %v951_v22 = vpop.f32.mrb[1].mxu0  ;;  %v1079_v23 = vpop.f32.mrb[1].mxu1 }
 0x11c   : > { %v952_v25 = vpop.f32.mrb[2].mxu0  ;;  %v1080_v26 = vpop.f32.mrb[2].mxu1 }
 0x11d   : > { %v1468_v27 = vmax.f32 %v1404_v20, 0.0  ;;  %v1500_v28 = vmax.f32 %v1436_v21, 0.0  ;;  %v1405_v29 = vadd.f32 %v2911_v17, %v952_v25  ;;  %v1437_v30 = vadd.f32 %v2911_v17, %v1080_v26  ;;  %v954_v31 = vpop.f32.mrb[3].mxu0  ;;  %v1082_v32 = vpop.f32.mrb[3].mxu1 }
 0x11f   : > { %v1537_v33 = vmul.f32 %v2918_v24, %v1468_v27  ;;  %v1569_v35 = vmul.f32 %v2918_v24, %v1500_v28  ;;  %v1469_v36 = vmax.f32 %v1405_v29, 0.0  ;;  %v1501_v37 = vmax.f32 %v1437_v30, 0.0 }
 0x121   : > { %v1538_v38 = vmul.f32 %v2918_v24, %v1469_v36  ;;  %v1570_v39 = vmul.f32 %v2918_v24, %v1501_v37  ;;  %v1606_v40 = vadd.f32 %v2926_v34, %v1537_v33  ;;  %v1638_v41 = vadd.f32 %v2926_v34, %v1569_v35 }
 0x122   : > { %v957_v42 = vpop.f32.mrb[4].mxu0  ;;  %v1085_v43 = vpop.f32.mrb[4].mxu1 }
 0x123   : > { %v1607_v44 = vadd.f32 %v2926_v34, %v1538_v38  ;;  %v1639_v45 = vadd.f32 %v2926_v34, %v1570_v39  ;;  %v1406_v46 = vadd.f32 %v2911_v17, %v957_v42  ;;  %v1438_v47 = vadd.f32 %v2911_v17, %v1085_v43  ;;  %v959_v48 = vpop.f32.mrb[5].mxu0  ;;  %v1087_v49 = vpop.f32.mrb[5].mxu1 }
 0x124   : > { %v960_v50 = vpop.f32.mrb[6].mxu0  ;;  %v1088_v51 = vpop.f32.mrb[6].mxu1 }
 0x125   : > { %v2336_v52 = vpack.c.bf16 %v1607_v44, %v1606_v40  ;;  %v2416_v53 = vpack.c.bf16 %v1639_v45, %v1638_v41  ;;  %v1470_v54 = vmax.f32 %v1406_v46, 0.0  ;;  %v1502_v55 = vmax.f32 %v1438_v47, 0.0  ;;  %v962_v56 = vpop.f32.mrb[7].mxu0  ;;  %v1090_v57 = vpop.f32.mrb[7].mxu1 }
 0x126   : > { %v1407_v58 = vadd.f32 %v2911_v17, %v960_v50  ;;  %v1439_v59 = vadd.f32 %v2911_v17, %v1088_v51 }
 0x127   : > { %2337 = vst [vmem:[%s2941_s11] sm:$0xff] %v2336_v52   ;;  %2508 = vst [vmem:[%s2941_s11 + $0x80] sm:$0xff] %v2416_v53   ;;  %v1539_v60 = vmul.f32 %v2918_v24, %v1470_v54  ;;  %v1571_v61 = vmul.f32 %v2918_v24, %v1502_v55 }
 0x128   : > { %v1471_v62 = vmax.f32 %v1407_v58, 0.0  ;;  %v1503_v63 = vmax.f32 %v1439_v59, 0.0 }
 0x129   : > { %v1608_v8 = vadd.f32 %v2926_v34, %v1539_v60  ;;  %v1640_v9 = vadd.f32 %v2926_v34, %v1571_v61 }
 0x12a   : > { %v1540_v0 = vmul.f32 %v2918_v24, %v1471_v62  ;;  %v1572_v1 = vmul.f32 %v2918_v24, %v1503_v63  ;;  %v965_v2 = vpop.f32.mrb[8].mxu0  ;;  %v1093_v3 = vpop.f32.mrb[8].mxu1 }
 0x12b   : > { %v1408_v4 = vadd.f32 %v2911_v17, %v965_v2  ;;  %v1440_v5 = vadd.f32 %v2911_v17, %v1093_v3  ;;  %v967_v6 = vpop.f32.mrb[9].mxu0  ;;  %v1095_v7 = vpop.f32.mrb[9].mxu1 }
 0x12c   : > { %v1609_v10 = vadd.f32 %v2926_v34, %v1540_v0  ;;  %v1641_v11 = vadd.f32 %v2926_v34, %v1572_v1  ;;  %v968_v12 = vpop.f32.mrb[10].mxu0  ;;  %v1096_v13 = vpop.f32.mrb[10].mxu1 }
 0x12d   : > { %v1472_v14 = vmax.f32 %v1408_v4, 0.0  ;;  %v1504_v15 = vmax.f32 %v1440_v5, 0.0  ;;  %v1409_v16 = vadd.f32 %v2911_v17, %v968_v12  ;;  %v1441_v18 = vadd.f32 %v2911_v17, %v1096_v13  ;;  %v970_v19 = vpop.f32.mrb[11].mxu0  ;;  %v1098_v20 = vpop.f32.mrb[11].mxu1 }
 0x12e   : > { %v2341_v21 = vpack.c.bf16 %v1609_v10, %v1608_v8  ;;  %v2421_v22 = vpack.c.bf16 %v1641_v11, %v1640_v9 }
 0x12f   : > { %v1541_v23 = vmul.f32 %v2918_v24, %v1472_v14  ;;  %v1573_v25 = vmul.f32 %v2918_v24, %v1504_v15  ;;  %v1473_v26 = vmax.f32 %v1409_v16, 0.0  ;;  %v1505_v27 = vmax.f32 %v1441_v18, 0.0 }
 0x130   : > { %2493 = vst [vmem:[%s2941_s11 + $0x8] sm:$0xff] %v2341_v21   ;;  %2509 = vst [vmem:[%s2941_s11 + $0x88] sm:$0xff] %v2421_v22  }
 0x131   : > { %v1542_v28 = vmul.f32 %v2918_v24, %v1473_v26  ;;  %v1574_v29 = vmul.f32 %v2918_v24, %v1505_v27  ;;  %v1610_v30 = vadd.f32 %v2926_v34, %v1541_v23  ;;  %v1642_v31 = vadd.f32 %v2926_v34, %v1573_v25 }
 0x132   : > { %v973_v32 = vpop.f32.mrb[12].mxu0  ;;  %v1101_v33 = vpop.f32.mrb[12].mxu1 }
 0x133   : > { %v1611_v35 = vadd.f32 %v2926_v34, %v1542_v28  ;;  %v1643_v36 = vadd.f32 %v2926_v34, %v1574_v29  ;;  %v1410_v37 = vadd.f32 %v2911_v17, %v973_v32  ;;  %v1442_v38 = vadd.f32 %v2911_v17, %v1101_v33  ;;  %v975_v39 = vpop.f32.mrb[13].mxu0  ;;  %v1103_v40 = vpop.f32.mrb[13].mxu1 }
 0x134   : > { %v976_v41 = vpop.f32.mrb[14].mxu0  ;;  %v1104_v42 = vpop.f32.mrb[14].mxu1 }
 0x135   : > { %v2346_v43 = vpack.c.bf16 %v1611_v35, %v1610_v30  ;;  %v2426_v44 = vpack.c.bf16 %v1643_v36, %v1642_v31  ;;  %v1474_v45 = vmax.f32 %v1410_v37, 0.0  ;;  %v1506_v46 = vmax.f32 %v1442_v38, 0.0  ;;  %v978_v47 = vpop.f32.mrb[15].mxu0  ;;  %v1106_v48 = vpop.f32.mrb[15].mxu1 }
 0x136   : > { %v1411_v49 = vadd.f32 %v2911_v17, %v976_v41  ;;  %v1443_v50 = vadd.f32 %v2911_v17, %v1104_v42 }
 0x137   : > { %2494 = vst [vmem:[%s2941_s11 + $0x10] sm:$0xff] %v2346_v43   ;;  %2510 = vst [vmem:[%s2941_s11 + $0x90] sm:$0xff] %v2426_v44   ;;  %v1543_v51 = vmul.f32 %v2918_v24, %v1474_v45  ;;  %v1575_v52 = vmul.f32 %v2918_v24, %v1506_v46 }
 0x138   : > { %v1475_v53 = vmax.f32 %v1411_v49, 0.0  ;;  %v1507_v54 = vmax.f32 %v1443_v50, 0.0 }
 0x139   : > { %v1612_v63 = vadd.f32 %v2926_v34, %v1543_v51  ;;  %v1644_v0 = vadd.f32 %v2926_v34, %v1575_v52 }
 0x13a   : > { %v1544_v55 = vmul.f32 %v2918_v24, %v1475_v53  ;;  %v1576_v56 = vmul.f32 %v2918_v24, %v1507_v54  ;;  %v981_v57 = vpop.f32.mrb[16].mxu0  ;;  %v1109_v58 = vpop.f32.mrb[16].mxu1 }
 0x13b   : > { %v1412_v59 = vadd.f32 %v2911_v17, %v981_v57  ;;  %v1444_v60 = vadd.f32 %v2911_v17, %v1109_v58  ;;  %v983_v61 = vpop.f32.mrb[17].mxu0  ;;  %v1111_v62 = vpop.f32.mrb[17].mxu1 }
 0x13c   : > { %v1613_v1 = vadd.f32 %v2926_v34, %v1544_v55  ;;  %v1645_v2 = vadd.f32 %v2926_v34, %v1576_v56  ;;  %v984_v3 = vpop.f32.mrb[18].mxu0  ;;  %v1112_v4 = vpop.f32.mrb[18].mxu1 }
 0x13d   : > { %v1476_v5 = vmax.f32 %v1412_v59, 0.0  ;;  %v1508_v6 = vmax.f32 %v1444_v60, 0.0  ;;  %v1413_v7 = vadd.f32 %v2911_v17, %v984_v3  ;;  %v1445_v8 = vadd.f32 %v2911_v17, %v1112_v4  ;;  %v986_v9 = vpop.f32.mrb[19].mxu0  ;;  %v1114_v10 = vpop.f32.mrb[19].mxu1 }
 0x13e   : > { %v2351_v11 = vpack.c.bf16 %v1613_v1, %v1612_v63  ;;  %v2431_v12 = vpack.c.bf16 %v1645_v2, %v1644_v0 }
 0x13f   : > { %v1545_v13 = vmul.f32 %v2918_v24, %v1476_v5  ;;  %v1577_v14 = vmul.f32 %v2918_v24, %v1508_v6  ;;  %v1477_v15 = vmax.f32 %v1413_v7, 0.0  ;;  %v1509_v16 = vmax.f32 %v1445_v8, 0.0 }
 0x140   : > { %2495 = vst [vmem:[%s2941_s11 + $0x18] sm:$0xff] %v2351_v11   ;;  %2511 = vst [vmem:[%s2941_s11 + $0x98] sm:$0xff] %v2431_v12  }
 0x141   : > { %v1546_v18 = vmul.f32 %v2918_v24, %v1477_v15  ;;  %v1578_v19 = vmul.f32 %v2918_v24, %v1509_v16  ;;  %v1614_v20 = vadd.f32 %v2926_v34, %v1545_v13  ;;  %v1646_v21 = vadd.f32 %v2926_v34, %v1577_v14 }
 0x142   : > { %v989_v22 = vpop.f32.mrb[20].mxu0  ;;  %v1117_v23 = vpop.f32.mrb[20].mxu1 }
 0x143   : > { %v1615_v25 = vadd.f32 %v2926_v34, %v1546_v18  ;;  %v1647_v26 = vadd.f32 %v2926_v34, %v1578_v19  ;;  %v1414_v27 = vadd.f32 %v2911_v17, %v989_v22  ;;  %v1446_v28 = vadd.f32 %v2911_v17, %v1117_v23  ;;  %v991_v29 = vpop.f32.mrb[21].mxu0  ;;  %v1119_v30 = vpop.f32.mrb[21].mxu1 }
 0x144   : > { %v992_v31 = vpop.f32.mrb[22].mxu0  ;;  %v1120_v32 = vpop.f32.mrb[22].mxu1 }
 0x145   : > { %v2356_v33 = vpack.c.bf16 %v1615_v25, %v1614_v20  ;;  %v2436_v35 = vpack.c.bf16 %v1647_v26, %v1646_v21  ;;  %v1478_v36 = vmax.f32 %v1414_v27, 0.0  ;;  %v1510_v37 = vmax.f32 %v1446_v28, 0.0  ;;  %v994_v38 = vpop.f32.mrb[23].mxu0  ;;  %v1122_v39 = vpop.f32.mrb[23].mxu1 }
 0x146   : > { %v1415_v40 = vadd.f32 %v2911_v17, %v992_v31  ;;  %v1447_v41 = vadd.f32 %v2911_v17, %v1120_v32 }
 0x147   : > { %2496 = vst [vmem:[%s2941_s11 + $0x20] sm:$0xff] %v2356_v33   ;;  %2512 = vst [vmem:[%s2941_s11 + $0xa0] sm:$0xff] %v2436_v35   ;;  %v1547_v42 = vmul.f32 %v2918_v24, %v1478_v36  ;;  %v1579_v43 = vmul.f32 %v2918_v24, %v1510_v37 }
 0x148   : > { %v1479_v44 = vmax.f32 %v1415_v40, 0.0  ;;  %v1511_v45 = vmax.f32 %v1447_v41, 0.0 }
 0x149   : > { %v1616_v54 = vadd.f32 %v2926_v34, %v1547_v42  ;;  %v1648_v55 = vadd.f32 %v2926_v34, %v1579_v43 }
 0x14a   : > { %v1548_v46 = vmul.f32 %v2918_v24, %v1479_v44  ;;  %v1580_v47 = vmul.f32 %v2918_v24, %v1511_v45  ;;  %v997_v48 = vpop.f32.mrb[24].mxu0  ;;  %v1125_v49 = vpop.f32.mrb[24].mxu1 }
 0x14b   : > { %v1416_v50 = vadd.f32 %v2911_v17, %v997_v48  ;;  %v1448_v51 = vadd.f32 %v2911_v17, %v1125_v49  ;;  %v999_v52 = vpop.f32.mrb[25].mxu0  ;;  %v1127_v53 = vpop.f32.mrb[25].mxu1 }
 0x14c   : > { %v1617_v56 = vadd.f32 %v2926_v34, %v1548_v46  ;;  %v1649_v57 = vadd.f32 %v2926_v34, %v1580_v47  ;;  %v1000_v58 = vpop.f32.mrb[26].mxu0  ;;  %v1128_v59 = vpop.f32.mrb[26].mxu1 }
 0x14d   : > { %v1480_v60 = vmax.f32 %v1416_v50, 0.0  ;;  %v1512_v61 = vmax.f32 %v1448_v51, 0.0  ;;  %v1417_v62 = vadd.f32 %v2911_v17, %v1000_v58  ;;  %v1449_v63 = vadd.f32 %v2911_v17, %v1128_v59  ;;  %v1002_v0 = vpop.f32.mrb[27].mxu0  ;;  %v1130_v1 = vpop.f32.mrb[27].mxu1 }
 0x14e   : > { %v2361_v2 = vpack.c.bf16 %v1617_v56, %v1616_v54  ;;  %v2441_v3 = vpack.c.bf16 %v1649_v57, %v1648_v55 }
 0x14f   : > { %v1549_v4 = vmul.f32 %v2918_v24, %v1480_v60  ;;  %v1581_v5 = vmul.f32 %v2918_v24, %v1512_v61  ;;  %v1481_v6 = vmax.f32 %v1417_v62, 0.0  ;;  %v1513_v7 = vmax.f32 %v1449_v63, 0.0 }
 0x150   : > { %2497 = vst [vmem:[%s2941_s11 + $0x28] sm:$0xff] %v2361_v2   ;;  %2513 = vst [vmem:[%s2941_s11 + $0xa8] sm:$0xff] %v2441_v3  }
 0x151   : > { %v1550_v8 = vmul.f32 %v2918_v24, %v1481_v6  ;;  %v1582_v9 = vmul.f32 %v2918_v24, %v1513_v7  ;;  %v1618_v10 = vadd.f32 %v2926_v34, %v1549_v4  ;;  %v1650_v11 = vadd.f32 %v2926_v34, %v1581_v5 }
 0x152   : > { %v1005_v12 = vpop.f32.mrb[28].mxu0  ;;  %v1133_v13 = vpop.f32.mrb[28].mxu1 }
 0x153   : > { %v1619_v14 = vadd.f32 %v2926_v34, %v1550_v8  ;;  %v1651_v15 = vadd.f32 %v2926_v34, %v1582_v9  ;;  %v1418_v16 = vadd.f32 %v2911_v17, %v1005_v12  ;;  %v1450_v18 = vadd.f32 %v2911_v17, %v1133_v13  ;;  %v1007_v19 = vpop.f32.mrb[29].mxu0  ;;  %v1135_v20 = vpop.f32.mrb[29].mxu1 }
 0x154   : > { %v1008_v21 = vpop.f32.mrb[30].mxu0  ;;  %v1136_v22 = vpop.f32.mrb[30].mxu1 }
 0x155   : > { %v2366_v23 = vpack.c.bf16 %v1619_v14, %v1618_v10  ;;  %v2446_v25 = vpack.c.bf16 %v1651_v15, %v1650_v11  ;;  %v1482_v26 = vmax.f32 %v1418_v16, 0.0  ;;  %v1514_v27 = vmax.f32 %v1450_v18, 0.0  ;;  %v1010_v28 = vpop.f32.mrb[31].mxu0  ;;  %v1138_v29 = vpop.f32.mrb[31].mxu1 }
 0x156   : > { %v1419_v30 = vadd.f32 %v2911_v17, %v1008_v21  ;;  %v1451_v31 = vadd.f32 %v2911_v17, %v1136_v22 }
 0x157   : > { %2498 = vst [vmem:[%s2941_s11 + $0x30] sm:$0xff] %v2366_v23   ;;  %2514 = vst [vmem:[%s2941_s11 + $0xb0] sm:$0xff] %v2446_v25   ;;  %v1551_v32 = vmul.f32 %v2918_v24, %v1482_v26  ;;  %v1583_v33 = vmul.f32 %v2918_v24, %v1514_v27 }
 0x158   : > { %v1483_v35 = vmax.f32 %v1419_v30, 0.0  ;;  %v1515_v36 = vmax.f32 %v1451_v31, 0.0 }
 0x159   : > { %v1620_v45 = vadd.f32 %v2926_v34, %v1551_v32  ;;  %v1652_v46 = vadd.f32 %v2926_v34, %v1583_v33 }
 0x15a   : > { %v1552_v37 = vmul.f32 %v2918_v24, %v1483_v35  ;;  %v1584_v38 = vmul.f32 %v2918_v24, %v1515_v36  ;;  %v1013_v39 = vpop.f32.mrb[32].mxu0  ;;  %v1141_v40 = vpop.f32.mrb[32].mxu1 }
 0x15b   : > { %v1420_v41 = vadd.f32 %v2911_v17, %v1013_v39  ;;  %v1452_v42 = vadd.f32 %v2911_v17, %v1141_v40  ;;  %v1015_v43 = vpop.f32.mrb[33].mxu0  ;;  %v1143_v44 = vpop.f32.mrb[33].mxu1 }
 0x15c   : > { %v1621_v47 = vadd.f32 %v2926_v34, %v1552_v37  ;;  %v1653_v48 = vadd.f32 %v2926_v34, %v1584_v38  ;;  %v1016_v49 = vpop.f32.mrb[34].mxu0  ;;  %v1144_v50 = vpop.f32.mrb[34].mxu1 }
 0x15d   : > { %v1484_v51 = vmax.f32 %v1420_v41, 0.0  ;;  %v1516_v52 = vmax.f32 %v1452_v42, 0.0  ;;  %v1421_v53 = vadd.f32 %v2911_v17, %v1016_v49  ;;  %v1453_v54 = vadd.f32 %v2911_v17, %v1144_v50  ;;  %v1018_v55 = vpop.f32.mrb[35].mxu0  ;;  %v1146_v56 = vpop.f32.mrb[35].mxu1 }
 0x15e   : > { %v2371_v57 = vpack.c.bf16 %v1621_v47, %v1620_v45  ;;  %v2451_v58 = vpack.c.bf16 %v1653_v48, %v1652_v46 }
 0x15f   : > { %v1553_v59 = vmul.f32 %v2918_v24, %v1484_v51  ;;  %v1585_v60 = vmul.f32 %v2918_v24, %v1516_v52  ;;  %v1485_v61 = vmax.f32 %v1421_v53, 0.0  ;;  %v1517_v62 = vmax.f32 %v1453_v54, 0.0 }
 0x160   : > { %2499 = vst [vmem:[%s2941_s11 + $0x38] sm:$0xff] %v2371_v57   ;;  %2515 = vst [vmem:[%s2941_s11 + $0xb8] sm:$0xff] %v2451_v58  }
 0x161   : > { %v1554_v63 = vmul.f32 %v2918_v24, %v1485_v61  ;;  %v1586_v0 = vmul.f32 %v2918_v24, %v1517_v62  ;;  %v1622_v1 = vadd.f32 %v2926_v34, %v1553_v59  ;;  %v1654_v2 = vadd.f32 %v2926_v34, %v1585_v60 }
 0x162   : > { %v1021_v3 = vpop.f32.mrb[36].mxu0  ;;  %v1149_v4 = vpop.f32.mrb[36].mxu1 }
 0x163   : > { %v1623_v5 = vadd.f32 %v2926_v34, %v1554_v63  ;;  %v1655_v6 = vadd.f32 %v2926_v34, %v1586_v0  ;;  %v1422_v7 = vadd.f32 %v2911_v17, %v1021_v3  ;;  %v1454_v8 = vadd.f32 %v2911_v17, %v1149_v4  ;;  %v1023_v9 = vpop.f32.mrb[37].mxu0  ;;  %v1151_v10 = vpop.f32.mrb[37].mxu1 }
 0x164   : > { %v1024_v11 = vpop.f32.mrb[38].mxu0  ;;  %v1152_v12 = vpop.f32.mrb[38].mxu1 }
 0x165   : > { %v2376_v13 = vpack.c.bf16 %v1623_v5, %v1622_v1  ;;  %v2456_v14 = vpack.c.bf16 %v1655_v6, %v1654_v2  ;;  %v1486_v15 = vmax.f32 %v1422_v7, 0.0  ;;  %v1518_v16 = vmax.f32 %v1454_v8, 0.0  ;;  %v1026_v18 = vpop.f32.mrb[39].mxu0  ;;  %v1154_v19 = vpop.f32.mrb[39].mxu1 }
 0x166   : > { %v1423_v20 = vadd.f32 %v2911_v17, %v1024_v11  ;;  %v1455_v21 = vadd.f32 %v2911_v17, %v1152_v12 }
 0x167   : > { %2500 = vst [vmem:[%s2941_s11 + $0x40] sm:$0xff] %v2376_v13   ;;  %2516 = vst [vmem:[%s2941_s11 + $0xc0] sm:$0xff] %v2456_v14   ;;  %v1555_v22 = vmul.f32 %v2918_v24, %v1486_v15  ;;  %v1587_v23 = vmul.f32 %v2918_v24, %v1518_v16 }
 0x168   : > { %v1487_v25 = vmax.f32 %v1423_v20, 0.0  ;;  %v1519_v26 = vmax.f32 %v1455_v21, 0.0 }
 0x169   : > { %v1624_v36 = vadd.f32 %v2926_v34, %v1555_v22  ;;  %v1656_v37 = vadd.f32 %v2926_v34, %v1587_v23 }
 0x16a   : > { %v1556_v27 = vmul.f32 %v2918_v24, %v1487_v25  ;;  %v1588_v28 = vmul.f32 %v2918_v24, %v1519_v26  ;;  %v1029_v29 = vpop.f32.mrb[40].mxu0  ;;  %v1157_v30 = vpop.f32.mrb[40].mxu1 }
 0x16b   : > { %v1424_v31 = vadd.f32 %v2911_v17, %v1029_v29  ;;  %v1456_v32 = vadd.f32 %v2911_v17, %v1157_v30  ;;  %v1031_v33 = vpop.f32.mrb[41].mxu0  ;;  %v1159_v35 = vpop.f32.mrb[41].mxu1 }
 0x16c   : > { %v1625_v38 = vadd.f32 %v2926_v34, %v1556_v27  ;;  %v1657_v39 = vadd.f32 %v2926_v34, %v1588_v28  ;;  %v1032_v40 = vpop.f32.mrb[42].mxu0  ;;  %v1160_v41 = vpop.f32.mrb[42].mxu1 }
 0x16d   : > { %v1488_v42 = vmax.f32 %v1424_v31, 0.0  ;;  %v1520_v43 = vmax.f32 %v1456_v32, 0.0  ;;  %v1425_v44 = vadd.f32 %v2911_v17, %v1032_v40  ;;  %v1457_v45 = vadd.f32 %v2911_v17, %v1160_v41  ;;  %v1034_v46 = vpop.f32.mrb[43].mxu0  ;;  %v1162_v47 = vpop.f32.mrb[43].mxu1 }
 0x16e   : > { %v2381_v48 = vpack.c.bf16 %v1625_v38, %v1624_v36  ;;  %v2461_v49 = vpack.c.bf16 %v1657_v39, %v1656_v37 }
 0x16f   : > { %v1557_v50 = vmul.f32 %v2918_v24, %v1488_v42  ;;  %v1589_v51 = vmul.f32 %v2918_v24, %v1520_v43  ;;  %v1489_v52 = vmax.f32 %v1425_v44, 0.0  ;;  %v1521_v53 = vmax.f32 %v1457_v45, 0.0 }
 0x170   : > { %2501 = vst [vmem:[%s2941_s11 + $0x48] sm:$0xff] %v2381_v48   ;;  %2517 = vst [vmem:[%s2941_s11 + $0xc8] sm:$0xff] %v2461_v49  }
 0x171   : > { %v1558_v54 = vmul.f32 %v2918_v24, %v1489_v52  ;;  %v1590_v55 = vmul.f32 %v2918_v24, %v1521_v53  ;;  %v1626_v56 = vadd.f32 %v2926_v34, %v1557_v50  ;;  %v1658_v57 = vadd.f32 %v2926_v34, %v1589_v51 }
 0x172   : > { %v1037_v58 = vpop.f32.mrb[44].mxu0  ;;  %v1165_v59 = vpop.f32.mrb[44].mxu1 }
 0x173   : > { %v1627_v60 = vadd.f32 %v2926_v34, %v1558_v54  ;;  %v1659_v61 = vadd.f32 %v2926_v34, %v1590_v55  ;;  %v1426_v62 = vadd.f32 %v2911_v17, %v1037_v58  ;;  %v1458_v63 = vadd.f32 %v2911_v17, %v1165_v59  ;;  %v1039_v0 = vpop.f32.mrb[45].mxu0  ;;  %v1167_v1 = vpop.f32.mrb[45].mxu1 }
 0x174   : > { %v1040_v2 = vpop.f32.mrb[46].mxu0  ;;  %v1168_v3 = vpop.f32.mrb[46].mxu1 }
 0x175   : > { %v2386_v4 = vpack.c.bf16 %v1627_v60, %v1626_v56  ;;  %v2466_v5 = vpack.c.bf16 %v1659_v61, %v1658_v57  ;;  %v1490_v6 = vmax.f32 %v1426_v62, 0.0  ;;  %v1522_v7 = vmax.f32 %v1458_v63, 0.0  ;;  %v1042_v8 = vpop.f32.mrb[47].mxu0  ;;  %v1170_v9 = vpop.f32.mrb[47].mxu1 }
 0x176   : > { %v1427_v10 = vadd.f32 %v2911_v17, %v1040_v2  ;;  %v1459_v11 = vadd.f32 %v2911_v17, %v1168_v3 }
 0x177   : > { %2502 = vst [vmem:[%s2941_s11 + $0x50] sm:$0xff] %v2386_v4   ;;  %2518 = vst [vmem:[%s2941_s11 + $0xd0] sm:$0xff] %v2466_v5   ;;  %v1559_v12 = vmul.f32 %v2918_v24, %v1490_v6  ;;  %v1591_v13 = vmul.f32 %v2918_v24, %v1522_v7 }
 0x178   : > { %v1491_v14 = vmax.f32 %v1427_v10, 0.0  ;;  %v1523_v15 = vmax.f32 %v1459_v11, 0.0 }
 0x179   : > { %v1628_v26 = vadd.f32 %v2926_v34, %v1559_v12  ;;  %v1660_v27 = vadd.f32 %v2926_v34, %v1591_v13 }
 0x17a   : > { %v1560_v16 = vmul.f32 %v2918_v24, %v1491_v14  ;;  %v1592_v18 = vmul.f32 %v2918_v24, %v1523_v15  ;;  %v1045_v19 = vpop.f32.mrb[48].mxu0  ;;  %v1173_v20 = vpop.f32.mrb[48].mxu1 }
 0x17b   : > { %v1428_v21 = vadd.f32 %v2911_v17, %v1045_v19  ;;  %v1460_v22 = vadd.f32 %v2911_v17, %v1173_v20  ;;  %v1047_v23 = vpop.f32.mrb[49].mxu0  ;;  %v1175_v25 = vpop.f32.mrb[49].mxu1 }
 0x17c   : > { %v1629_v28 = vadd.f32 %v2926_v34, %v1560_v16  ;;  %v1661_v29 = vadd.f32 %v2926_v34, %v1592_v18  ;;  %v1048_v30 = vpop.f32.mrb[50].mxu0  ;;  %v1176_v31 = vpop.f32.mrb[50].mxu1 }
 0x17d   : > { %v1492_v32 = vmax.f32 %v1428_v21, 0.0  ;;  %v1524_v33 = vmax.f32 %v1460_v22, 0.0  ;;  %v1429_v35 = vadd.f32 %v2911_v17, %v1048_v30  ;;  %v1461_v36 = vadd.f32 %v2911_v17, %v1176_v31  ;;  %v1050_v37 = vpop.f32.mrb[51].mxu0  ;;  %v1178_v38 = vpop.f32.mrb[51].mxu1 }
 0x17e   : > { %v2391_v39 = vpack.c.bf16 %v1629_v28, %v1628_v26  ;;  %v2471_v40 = vpack.c.bf16 %v1661_v29, %v1660_v27 }
 0x17f   : > { %v1561_v41 = vmul.f32 %v2918_v24, %v1492_v32  ;;  %v1593_v42 = vmul.f32 %v2918_v24, %v1524_v33  ;;  %v1493_v43 = vmax.f32 %v1429_v35, 0.0  ;;  %v1525_v44 = vmax.f32 %v1461_v36, 0.0 }
 0x180   : > { %2503 = vst [vmem:[%s2941_s11 + $0x58] sm:$0xff] %v2391_v39   ;;  %2519 = vst [vmem:[%s2941_s11 + $0xd8] sm:$0xff] %v2471_v40  }
 0x181   : > { %v1562_v45 = vmul.f32 %v2918_v24, %v1493_v43  ;;  %v1594_v46 = vmul.f32 %v2918_v24, %v1525_v44  ;;  %v1630_v47 = vadd.f32 %v2926_v34, %v1561_v41  ;;  %v1662_v48 = vadd.f32 %v2926_v34, %v1593_v42 }
 0x182   : > { %v1053_v49 = vpop.f32.mrb[52].mxu0  ;;  %v1181_v50 = vpop.f32.mrb[52].mxu1 }
 0x183   : > { %v1631_v51 = vadd.f32 %v2926_v34, %v1562_v45  ;;  %v1663_v52 = vadd.f32 %v2926_v34, %v1594_v46  ;;  %v1430_v53 = vadd.f32 %v2911_v17, %v1053_v49  ;;  %v1462_v54 = vadd.f32 %v2911_v17, %v1181_v50  ;;  %v1055_v55 = vpop.f32.mrb[53].mxu0  ;;  %v1183_v56 = vpop.f32.mrb[53].mxu1 }
 0x184   : > { %v1056_v57 = vpop.f32.mrb[54].mxu0  ;;  %v1184_v58 = vpop.f32.mrb[54].mxu1 }
 0x185   : > { %v2396_v59 = vpack.c.bf16 %v1631_v51, %v1630_v47  ;;  %v2476_v60 = vpack.c.bf16 %v1663_v52, %v1662_v48  ;;  %v1494_v61 = vmax.f32 %v1430_v53, 0.0  ;;  %v1526_v62 = vmax.f32 %v1462_v54, 0.0  ;;  %v1058_v63 = vpop.f32.mrb[55].mxu0  ;;  %v1186_v0 = vpop.f32.mrb[55].mxu1 }
 0x186   : > { %v1431_v1 = vadd.f32 %v2911_v17, %v1056_v57  ;;  %v1463_v2 = vadd.f32 %v2911_v17, %v1184_v58 }
 0x187   : > { %2504 = vst [vmem:[%s2941_s11 + $0x60] sm:$0xff] %v2396_v59   ;;  %2520 = vst [vmem:[%s2941_s11 + $0xe0] sm:$0xff] %v2476_v60   ;;  %v1563_v3 = vmul.f32 %v2918_v24, %v1494_v61  ;;  %v1595_v4 = vmul.f32 %v2918_v24, %v1526_v62 }
 0x188   : > { %v1495_v5 = vmax.f32 %v1431_v1, 0.0  ;;  %v1527_v6 = vmax.f32 %v1463_v2, 0.0 }
 0x189   : > { %v1632_v15 = vadd.f32 %v2926_v34, %v1563_v3  ;;  %v1664_v16 = vadd.f32 %v2926_v34, %v1595_v4 }
 0x18a   : > { %v1564_v7 = vmul.f32 %v2918_v24, %v1495_v5  ;;  %v1596_v8 = vmul.f32 %v2918_v24, %v1527_v6  ;;  %v1061_v9 = vpop.f32.mrb[56].mxu0  ;;  %v1189_v10 = vpop.f32.mrb[56].mxu1 }
 0x18b   : > { %v1432_v11 = vadd.f32 %v2911_v17, %v1061_v9  ;;  %v1464_v12 = vadd.f32 %v2911_v17, %v1189_v10  ;;  %v1063_v13 = vpop.f32.mrb[57].mxu0  ;;  %v1191_v14 = vpop.f32.mrb[57].mxu1 }
 0x18c   : > { %v1633_v18 = vadd.f32 %v2926_v34, %v1564_v7  ;;  %v1665_v19 = vadd.f32 %v2926_v34, %v1596_v8  ;;  %v1064_v20 = vpop.f32.mrb[58].mxu0  ;;  %v1192_v21 = vpop.f32.mrb[58].mxu1 }
 0x18d   : > { %v1496_v22 = vmax.f32 %v1432_v11, 0.0  ;;  %v1528_v23 = vmax.f32 %v1464_v12, 0.0  ;;  %v1433_v25 = vadd.f32 %v2911_v17, %v1064_v20  ;;  %v1465_v26 = vadd.f32 %v2911_v17, %v1192_v21  ;;  %v1066_v27 = vpop.f32.mrb[59].mxu0  ;;  %v1194_v28 = vpop.f32.mrb[59].mxu1 }
 0x18e   : > { %v2401_v29 = vpack.c.bf16 %v1633_v18, %v1632_v15  ;;  %v2481_v30 = vpack.c.bf16 %v1665_v19, %v1664_v16 }
 0x18f   : > { %v1565_v31 = vmul.f32 %v2918_v24, %v1496_v22  ;;  %v1597_v32 = vmul.f32 %v2918_v24, %v1528_v23  ;;  %v1497_v33 = vmax.f32 %v1433_v25, 0.0  ;;  %v1529_v35 = vmax.f32 %v1465_v26, 0.0 }
 0x190   : > { %2505 = vst [vmem:[%s2941_s11 + $0x68] sm:$0xff] %v2401_v29   ;;  %2521 = vst [vmem:[%s2941_s11 + $0xe8] sm:$0xff] %v2481_v30  }
 0x191   : > { %v1566_v36 = vmul.f32 %v2918_v24, %v1497_v33  ;;  %v1598_v37 = vmul.f32 %v2918_v24, %v1529_v35  ;;  %v1634_v38 = vadd.f32 %v2926_v34, %v1565_v31  ;;  %v1666_v39 = vadd.f32 %v2926_v34, %v1597_v32 }
 0x192   : > { %v1069_v40 = vpop.f32.mrb[60].mxu0  ;;  %v1197_v41 = vpop.f32.mrb[60].mxu1 }
 0x193   : > { %v1635_v42 = vadd.f32 %v2926_v34, %v1566_v36  ;;  %v1667_v43 = vadd.f32 %v2926_v34, %v1598_v37  ;;  %v1434_v44 = vadd.f32 %v2911_v17, %v1069_v40  ;;  %v1466_v45 = vadd.f32 %v2911_v17, %v1197_v41  ;;  %v1071_v46 = vpop.f32.mrb[61].mxu0  ;;  %v1199_v47 = vpop.f32.mrb[61].mxu1 }
 0x194   : > { %v1072_v48 = vpop.f32.mrb[62].mxu0  ;;  %v1200_v49 = vpop.f32.mrb[62].mxu1 }
 0x195   : > { %v2406_v50 = vpack.c.bf16 %v1635_v42, %v1634_v38  ;;  %v2486_v51 = vpack.c.bf16 %v1667_v43, %v1666_v39  ;;  %v1498_v52 = vmax.f32 %v1434_v44, 0.0  ;;  %v1530_v53 = vmax.f32 %v1466_v45, 0.0  ;;  %v1074_v54 = vpop.f32.mrb[63].mxu0  ;;  %v1202_v55 = vpop.f32.mrb[63].mxu1 }
 0x196   : > { %v1435_v56 = vadd.f32 %v2911_v17, %v1072_v48  ;;  %v1467_v57 = vadd.f32 %v2911_v17, %v1200_v49 }
 0x197   : > { %2506 = vst [vmem:[%s2941_s11 + $0x70] sm:$0xff] %v2406_v50   ;;  %2522 = vst [vmem:[%s2941_s11 + $0xf0] sm:$0xff] %v2486_v51   ;;  %v1567_v58 = vmul.f32 %v2918_v24, %v1498_v52  ;;  %v1599_v59 = vmul.f32 %v2918_v24, %v1530_v53 }
 0x198   : > { %v1499_v60 = vmax.f32 %v1435_v56, 0.0  ;;  %v1531_v61 = vmax.f32 %v1467_v57, 0.0 }
 0x199   : > { %v1636_v0 = vadd.f32 %v2926_v34, %v1567_v58  ;;  %v1668_v1 = vadd.f32 %v2926_v34, %v1599_v59 }
 0x19a   : > { %v1568_v62 = vmul.f32 %v2918_v24, %v1499_v60  ;;  %v1600_v63 = vmul.f32 %v2918_v24, %v1531_v61 }
 0x19c   : > { %v1637_v2 = vadd.f32 %v2926_v34, %v1568_v62  ;;  %v1669_v17 = vadd.f32 %v2926_v34, %v1600_v63 }
 0x19e   : > { %v2411_v3 = vpack.c.bf16 %v1637_v2, %v1636_v0  ;;  %v2491_v4 = vpack.c.bf16 %v1669_v17, %v1668_v1 }
 0x1a0   : > { %2507 = vst [vmem:[%s2941_s11 + $0x78] sm:$0xff] %v2411_v3   ;;  %2523 = vst [vmem:[%s2941_s11 + $0xf8] sm:$0xff] %v2491_v4  }
 0x1a1 PF: > { %s13_s14 = sadd.s32 1, %s2715_s14   ;;  %s3166_s12 = smov %s2711_s13 }
 0x1a2   : > { %p10_p5 = scmp.ge.s32.totalorder %s13_s14, 4   ;;  %s3167_s13 = smov %s3169_s15 }
 0x1a4   :  { %12 = sbr.rel (!%p10_p5) target bundleno = 2 (0x2), region = 76 }

// kernel: conv_cfc_forward.6
= control target key start
LH: loop header
LB: loop body
LE: loop exit
PB: predicated region body
PF: predicated region fallthrough
CT: control target
= control target key end

     0   :  { %s1429_s12 = smov 0   ;;  %s1431_s13 = smov 0   ;;  %s1650_s0 = inlined_call_operand.vmem [shape: bf16[256,1792], index: 0, kind: input, shape index: {}]   ;;  %s1651_s1 = inlined_call_operand.vmem [shape: bf16[1792,128], index: 1, kind: input, shape index: {}]   ;;  %s1652_s2 = inlined_call_operand.vmem [shape: f32[3,128], index: 2, kind: input, shape index: {}]   ;;  %s1653_s3 = inlined_call_operand.vmem [shape: bf16[256,128], index: 3, kind: output, shape index: {}]  }
   0x1   :  { %s1433_s14 = smov 0   ;;  %s1435_s15 = smov 0  }
   0x2   :  { %s1437_s16 = smov 0   ;;  %s1439_s17 = smov 0  }
   0x3   :  { %s1441_s18 = smov 0  }
   0x4 LB: > { %s25_s19 = sadd.s32 1, %s1398_s16  ;;  %s32_s20 = sadd.s32 1, %s1402_s17  ;;  %s1406_s18 = sphi %s1441_s18, %s13_s18   ;;  %s1402_s17 = sphi %s1439_s17, %s1659_s17   ;;  %s1398_s16 = sphi %s1437_s16, %s1658_s16   ;;  %s1394_s15 = sphi %s1435_s15, %s1657_s15   ;;  %s1390_s14 = sphi %s1433_s14, %s1656_s14   ;;  %s1386_s13 = sphi %s1431_s13, %s1655_s13   ;;  %s1382_s12 = sphi %s1429_s12, %s1654_s12  }
   0x5   : > { %p26_p0 = scmp.ge.s32.totalorder %s25_s19, 7  ;;  %p48_p1 = scmp.ne.s32.totalorder %s1386_s13, %s1382_s12 }
   0x6   : > { %p49_p2 = scmp.eq.s32.totalorder %s1406_s18, 0  ;;  %s41_s24 = sadd.s32 1, %s1386_s13 }
   0x7   : > { %s1661_s19 = smov (%p26_p0, %s25_s19), 0  ;;  %s1663_s20 = smov (!%p26_p0, %s32_s20), %s1402_s17 }
   0x8   : > { %p50_p3 = por %p49_p2, %p48_p1  ;;  %p34_p4 = scmp.ge.s32.totalorder %s1663_s20, 2 }
   0x9   : > { %s37_s21 = ssub.s32 %s1398_s16, %s1661_s19  ;;  %p1044_p6 = scmp.ge.s32.totalorder %s1406_s18, 14 }
   0xa   : > { %s1665_s20 = smov (%p34_p4, %s1663_s20), 0 }
   0xb   : > { %s36_s22 = ssub.s32 %s1402_s17, %s1665_s20  ;;  %163 = sbr.rel (%p1044_p6) target bundleno = 34 (0x22), region = 20 }
   0xc   : > { %s38_s23 = sor.u32 %s37_s21, %s36_s22 }
   0xd   : > { %p39_p5 = scmp.eq.s32.totalorder %s38_s23, 0 }
   0xf   : > { %s1480_s25 = scalar_select %p39_p5, %s1386_s13, %s41_s24  }
  0x12   : > { %166 = sbr.rel (!%p50_p3) target bundleno = 34 (0x22), region = 24  ;;  %s168_s26 = sand.u32 (%p50_p3), 1, %s1386_s13  }
  0x13   : > { %s1047_s27 = sshll.u32 (%p50_p3), %s1398_s16, 1  ;;  %s1045_s28 = sshll.u32 (%p50_p3), %s168_s26, 7 }
  0x14   : > { %s1254_s29 = smul.u32 (%p50_p3), 224, %s1402_s17  ;;  %s170_s8 = scalar_lea.vmem (%p50_p3), [#allocation3], %s1045_s28 }
  0x16   : > { %s174_s30 = sadd.s32 (%p50_p3), %s1254_s29, %s1047_s27 }
  0x17   : > { %s1049_s4 = sshll.u32 (%p50_p3), %s174_s30, 2 }
  0x18   : > { %s1489_s7 = scalar_lea.vmem (%p50_p3), %s1650_s0, %s1049_s4 }
  0x19   : > { %v234_v0 = vld [vmem:[%s1489_s7] sm:$0xff]  ;;  %v236_v1 = vld [vmem:[%s1489_s7 + $0x38] sm:$0xff]  ;;  %v238_v2 = vld [vmem:[%s1489_s7 + $0x70] sm:$0xff] }
  0x1a   : > { %235 = vst [vmem:[%s170_s8] sm:$0xff] %v234_v0  ;;  %237 = vst [vmem:[%s170_s8 + $0x8] sm:$0xff] %v236_v1  ;;  %v240_v3 = vld [vmem:[%s1489_s7 + $0xa8] sm:$0xff]  ;;  %v242_v4 = vld [vmem:[%s1489_s7 + $0xe0] sm:$0xff] }
  0x1b   : > { %239 = vst [vmem:[%s170_s8 + $0x10] sm:$0xff] %v238_v2  ;;  %v244_v5 = vld [vmem:[%s1489_s7 + $0x118] sm:$0xff]  ;;  %241 = vst [vmem:[%s170_s8 + $0x18] sm:$0xff] %v240_v3  ;;  %v246_v6 = vld [vmem:[%s1489_s7 + $0x150] sm:$0xff] }
  0x1c   : > { %243 = vst [vmem:[%s170_s8 + $0x20] sm:$0xff] %v242_v4  ;;  %245 = vst [vmem:[%s170_s8 + $0x28] sm:$0xff] %v244_v5  ;;  %v248_v7 = vld [vmem:[%s1489_s7 + $0x188] sm:$0xff]  ;;  %v250_v8 = vld [vmem:[%s1489_s7 + $0x1c0] sm:$0xff] }
  0x1d   : > { %247 = vst [vmem:[%s170_s8 + $0x30] sm:$0xff] %v246_v6  ;;  %249 = vst [vmem:[%s170_s8 + $0x38] sm:$0xff] %v248_v7  ;;  %v252_v9 = vld [vmem:[%s1489_s7 + $0x1f8] sm:$0xff]  ;;  %v254_v10 = vld [vmem:[%s1489_s7 + $0x230] sm:$0xff] }
  0x1e   : > { %251 = vst [vmem:[%s170_s8 + $0x40] sm:$0xff] %v250_v8  ;;  %v256_v11 = vld [vmem:[%s1489_s7 + $0x268] sm:$0xff]  ;;  %253 = vst [vmem:[%s170_s8 + $0x48] sm:$0xff] %v252_v9  ;;  %v258_v12 = vld [vmem:[%s1489_s7 + $0x2a0] sm:$0xff] }
  0x1f   : > { %255 = vst [vmem:[%s170_s8 + $0x50] sm:$0xff] %v254_v10  ;;  %257 = vst [vmem:[%s170_s8 + $0x58] sm:$0xff] %v256_v11  ;;  %v260_v13 = vld [vmem:[%s1489_s7 + $0x2d8] sm:$0xff]  ;;  %v262_v14 = vld [vmem:[%s1489_s7 + $0x310] sm:$0xff] }
  0x20   : > { %259 = vst [vmem:[%s170_s8 + $0x60] sm:$0xff] %v258_v12  ;;  %261 = vst [vmem:[%s170_s8 + $0x68] sm:$0xff] %v260_v13  ;;  %v264_v15 = vld [vmem:[%s1489_s7 + $0x348] sm:$0xff] }
  0x21   : > { %263 = vst [vmem:[%s170_s8 + $0x70] sm:$0xff] %v262_v14  ;;  %265 = vst [vmem:[%s170_s8 + $0x78] sm:$0xff] %v264_v15 }
  0x22 PF: > { %p1050_p7 = scmp.ge.s32.totalorder %s1406_s18, 1  ;;  %p282_p8 = scmp.lt.s32.totalorder %s1406_s18, 15 }
  0x24   : > { %p283_p9 = pnand %p1050_p7, %p282_p8 }
  0x25   : > { %s289_s9 = sand.u32 (!%p283_p9), 1, %s1382_s12   ;;  %s1052_s10 = sshll.u32 (!%p283_p9), %s1390_s14, 5 }
  0x26   : > { %286 = sbr.rel (%p283_p9) target bundleno = 351 (0x15f), region = 66  ;;  %s1051_s11 = sshll.u32 (!%p283_p9), %s289_s9, 7 }
  0x27   : > { %p330_p10 = scmp.lt.s32.totalorder (!%p283_p9), %s1052_s10, 223  ;;  %s1054_s21 = sshll.u32 (!%p283_p9), %s1394_s15, 4 }
  0x28   : > { %p343_p11 = scmp.lt.s32.totalorder (!%p283_p9), %s1054_s21, 31  ;;  %s1522_s12 = scalar_lea.vmem (!%p283_p9), [#allocation3], %s1051_s11 }
  0x29   : > { %p1056_p12 = scmp.ne.s32.totalorder (!%p283_p9), %s1390_s14, 0 }
  0x2d   : > { %s1667_s10 = smov (!%p330_p10, %s1052_s10), 223  ;;  %s1669_s21 = smov (!%p343_p11, %s1054_s21), 31 }
  0x2e   : > { %s1053_s22 = sshll.u32 %s1667_s10, 2  ;;  %s1055_s27 = sshll.u32 %s1669_s21, 2  ;;  %v1408_v16 = vmov (!%p1056_p12), 0.0  }
  0x2f   : > { %s1515_s26 = scalar_lea.vmem %s1651_s1, %s1053_s22  ;;  %s1520_s30 = scalar_lea.vmem %s1653_s3, %s1055_s27  ;;  %356 = vst [vmem:[#allocation2] sm:$0xff] (!%p1056_p12), %v1408_v16  ;;  %357 = vst [vmem:[#allocation2 + $0x8] sm:$0xff] (!%p1056_p12), %v1408_v16 }
  0x30   : > { %355 = sbr.rel (%p1056_p12) target bundleno = 55 (0x37), region = 74  ;;  %358 = vst [vmem:[#allocation2 + $0x10] sm:$0xff] (!%p1056_p12), %v1408_v16  ;;  %359 = vst [vmem:[#allocation2 + $0x18] sm:$0xff] (!%p1056_p12), %v1408_v16 }
  0x31   : > { %360 = vst [vmem:[#allocation2 + $0x20] sm:$0xff] (!%p1056_p12), %v1408_v16  ;;  %361 = vst [vmem:[#allocation2 + $0x28] sm:$0xff] (!%p1056_p12), %v1408_v16 }
  0x32   : > { %362 = vst [vmem:[#allocation2 + $0x30] sm:$0xff] (!%p1056_p12), %v1408_v16  ;;  %363 = vst [vmem:[#allocation2 + $0x38] sm:$0xff] (!%p1056_p12), %v1408_v16 }
  0x33   : > { %364 = vst [vmem:[#allocation2 + $0x40] sm:$0xff] (!%p1056_p12), %v1408_v16  ;;  %365 = vst [vmem:[#allocation2 + $0x48] sm:$0xff] (!%p1056_p12), %v1408_v16 }
  0x34   : > { %366 = vst [vmem:[#allocation2 + $0x50] sm:$0xff] (!%p1056_p12), %v1408_v16  ;;  %367 = vst [vmem:[#allocation2 + $0x58] sm:$0xff] (!%p1056_p12), %v1408_v16 }
  0x35   : > { %368 = vst [vmem:[#allocation2 + $0x60] sm:$0xff] (!%p1056_p12), %v1408_v16  ;;  %369 = vst [vmem:[#allocation2 + $0x68] sm:$0xff] (!%p1056_p12), %v1408_v16 }
  0x36   : > { %370 = vst [vmem:[#allocation2 + $0x70] sm:$0xff] (!%p1056_p12), %v1408_v16  ;;  %371 = vst [vmem:[#allocation2 + $0x78] sm:$0xff] (!%p1056_p12), %v1408_v16 }
  0x37 PF: > { %v1312_v17 = vld [vmem:[%s1515_s26 + $0x40] sm:$0xff]   ;;  %v1314_v19 = vld [vmem:[%s1515_s26 + $0x48] sm:$0xff]   ;;  %v1316_v21 = vld [vmem:[%s1515_s26 + $0x50] sm:$0xff]   ;;  %p1089_p13 = scmp.ne.s32.totalorder %s1390_s14, 6 }
  0x38   : > { %v1313_v18 = vld [vmem:[%s1515_s26] sm:$0xff]   ;;  %1174 = vmatprep.subr.bf16.mxu0 %v1312_v17  ;;  %1238 = vmatprep.subr.bf16.mxu1 %v1312_v17  ;;  %v1315_v20 = vld [vmem:[%s1515_s26 + $0x8] sm:$0xff]   ;;  %v1317_v22 = vld [vmem:[%s1515_s26 + $0x10] sm:$0xff]  }
  0x39   : > { %1175 = vmatpush3.bf16.msra.mxu0 %v1313_v18  ;;  %1246 = vmatpush3.bf16.msra.mxu1 %v1313_v18  ;;  %v1318_v23 = vld [vmem:[%s1515_s26 + $0x58] sm:$0xff]   ;;  %v1320_v25 = vld [vmem:[%s1515_s26 + $0x60] sm:$0xff]   ;;  %v1322_v27 = vld [vmem:[%s1515_s26 + $0x68] sm:$0xff]  }
  0x3a   : > { %1176 = vmatprep.subr.bf16.mxu0 %v1314_v19  ;;  %1239 = vmatprep.subr.bf16.mxu1 %v1314_v19  ;;  %v1319_v24 = vld [vmem:[%s1515_s26 + $0x18] sm:$0xff]   ;;  %v1321_v26 = vld [vmem:[%s1515_s26 + $0x20] sm:$0xff]   ;;  %v1323_v30 = vld [vmem:[%s1515_s26 + $0x28] sm:$0xff]  }
  0x3b   : > { %v1330_v28 = vld [vmem:[%s1522_s12 + $0x4] ss:$8 sps:$4 sm:$0xff]   ;;  %v1324_v31 = vld [vmem:[%s1515_s26 + $0x70] sm:$0xff]   ;;  %v1326_v33 = vld [vmem:[%s1515_s26 + $0x78] sm:$0xff]  }
  0x3c   : > { %v1333_v29 = vld [vmem:[%s1522_s12 + $0x44] ss:$8 sps:$4 sm:$0xff]   ;;  %644 = vmatprep.mubr.bf16.mxu0 %v1330_v28  ;;  %v1325_v32 = vld [vmem:[%s1515_s26 + $0x30] sm:$0xff]   ;;  %v1327_v34 = vld [vmem:[%s1515_s26 + $0x38] sm:$0xff]  }
  0x3d   : > { %1177 = vmatpush3.bf16.msra.mxu0 %v1315_v20  ;;  %1247 = vmatpush3.bf16.msra.mxu1 %v1315_v20  ;;  %v1328_v35 = vld [vmem:[%s1522_s12] ss:$8 sps:$4 sm:$0xff]   ;;  %v1334_v37 = vld [vmem:[%s1522_s12 + $0x14] ss:$8 sps:$4 sm:$0xff]   ;;  %v1338_v39 = vld [vmem:[%s1522_s12 + $0x10] ss:$8 sps:$4 sm:$0xff]  }
  0x3e   : > { %1178 = vmatprep.subr.bf16.mxu0 %v1316_v21  ;;  %1240 = vmatprep.subr.bf16.mxu1 %v1316_v21  ;;  %v1331_v36 = vld [vmem:[%s1522_s12 + $0x40] ss:$8 sps:$4 sm:$0xff]   ;;  %v1336_v38 = vld [vmem:[%s1522_s12 + $0x54] ss:$8 sps:$4 sm:$0xff]   ;;  %v1339_v40 = vld [vmem:[%s1522_s12 + $0x50] ss:$8 sps:$4 sm:$0xff]  }
  0x3f   : > { %676 = vmatprep.mubr.bf16.mxu1 %v1333_v29  ;;  %v1340_v41 = vld [vmem:[%s1522_s12 + $0x24] ss:$8 sps:$4 sm:$0xff]   ;;  %v1344_v43 = vld [vmem:[%s1522_s12 + $0x20] ss:$8 sps:$4 sm:$0xff]   ;;  %v1346_v45 = vld [vmem:[%s1522_s12 + $0x34] ss:$8 sps:$4 sm:$0xff]  }
  0x40   : > { %v1342_v42 = vld [vmem:[%s1522_s12 + $0x64] ss:$8 sps:$4 sm:$0xff]   ;;  %v1345_v44 = vld [vmem:[%s1522_s12 + $0x60] ss:$8 sps:$4 sm:$0xff]   ;;  %v1348_v46 = vld [vmem:[%s1522_s12 + $0x74] ss:$8 sps:$4 sm:$0xff]  }
  0x41   : > { %1179 = vmatpush3.bf16.msra.mxu0 %v1317_v22  ;;  %1248 = vmatpush3.bf16.msra.mxu1 %v1317_v22  ;;  %v1350_v47 = vld [vmem:[%s1522_s12 + $0x30] ss:$8 sps:$4 sm:$0xff]   ;;  %v372_v51 = vld [vmem:[#allocation2] sm:$0xff]  ;;  %v373_v59 = vld [vmem:[#allocation2 + $0x8] sm:$0xff] }
  0x42   : > { %1180 = vmatprep.subr.bf16.mxu0 %v1318_v23  ;;  %1241 = vmatprep.subr.bf16.mxu1 %v1318_v23  ;;  %v1351_v48 = vld [vmem:[%s1522_s12 + $0x70] ss:$8 sps:$4 sm:$0xff]   ;;  %v380_v53 = vld [vmem:[#allocation2 + $0x40] sm:$0xff]  ;;  %v381_v61 = vld [vmem:[#allocation2 + $0x48] sm:$0xff] }
  0x43   : > { %v374_v7 = vld [vmem:[#allocation2 + $0x10] sm:$0xff]  ;;  %v375_v15 = vld [vmem:[#allocation2 + $0x18] sm:$0xff]  ;;  %v384_v29 = vld [vmem:[#allocation2 + $0x60] sm:$0xff] }
  0x44   : > { %v382_v9 = vld [vmem:[#allocation2 + $0x50] sm:$0xff]  ;;  %v383_v17 = vld [vmem:[#allocation2 + $0x58] sm:$0xff] }
  0x45   : > { %1181 = vmatpush3.bf16.msra.mxu0 %v1319_v24  ;;  %1249 = vmatpush3.bf16.msra.mxu1 %v1319_v24 }
  0x46   : > { %1182 = vmatprep.subr.bf16.mxu0 %v1320_v25  ;;  %1242 = vmatprep.subr.bf16.mxu1 %v1320_v25 }
  0x49   : > { %1183 = vmatpush3.bf16.msra.mxu0 %v1321_v26  ;;  %1250 = vmatpush3.bf16.msra.mxu1 %v1321_v26 }
  0x4a   : > { %1184 = vmatprep.subr.bf16.mxu0 %v1322_v27  ;;  %1243 = vmatprep.subr.bf16.mxu1 %v1322_v27  ;;  %v376_v27 = vld [vmem:[#allocation2 + $0x20] sm:$0xff] }
  0x4d   : > { %1185 = vmatpush3.bf16.msra.mxu0 %v1323_v30  ;;  %1251 = vmatpush3.bf16.msra.mxu1 %v1323_v30 }
  0x4e   : > { %1186 = vmatprep.subr.bf16.mxu0 %v1324_v31  ;;  %1244 = vmatprep.subr.bf16.mxu1 %v1324_v31 }
  0x51   : > { %1187 = vmatpush3.bf16.msra.mxu0 %v1325_v32  ;;  %1252 = vmatpush3.bf16.msra.mxu1 %v1325_v32 }
  0x52   : > { %1188 = vmatprep.subr.bf16.mxu0 %v1326_v33  ;;  %1245 = vmatprep.subr.bf16.mxu1 %v1326_v33 }
  0x55   : > { %1189 = vmatpush3.bf16.msra.mxu0 %v1327_v34  ;;  %1253 = vmatpush3.bf16.msra.mxu1 %v1327_v34 }
  0x58   : > { %645 = vmatmul.mubr.bf16.vlgmr.msra.gmra.mrb[0].mxu0 %v1328_v35  ;;  %677 = vmatmul.mubr.bf16.vlgmr.msra.gmra.mrb[0].mxu1 %v1331_v36  ;;  %v377_v35 = vld [vmem:[#allocation2 + $0x28] sm:$0xff] }
  0x59   : > { %652 = vmatprep.mubr.bf16.mxu0 %v1334_v37  ;;  %684 = vmatprep.mubr.bf16.mxu1 %v1336_v38  ;;  %v385_v37 = vld [vmem:[#allocation2 + $0x68] sm:$0xff] }
  0x60   : > { %653 = vmatmul.mubr.bf16.gmra.mrb[4].mxu0 %v1338_v39  ;;  %685 = vmatmul.mubr.bf16.gmra.mrb[4].mxu1 %v1339_v40 }
  0x61   : > { %660 = vmatprep.mubr.bf16.mxu0 %v1340_v41  ;;  %692 = vmatprep.mubr.bf16.mxu1 %v1342_v42 }
  0x68   : > { %661 = vmatmul.mubr.bf16.gmra.mrb[8].mxu0 %v1344_v43  ;;  %693 = vmatmul.mubr.bf16.gmra.mrb[8].mxu1 %v1345_v44 }
  0x69   : > { %668 = vmatprep.mubr.bf16.mxu0 %v1346_v45  ;;  %700 = vmatprep.mubr.bf16.mxu1 %v1348_v46 }
  0x70   : > { %669 = vmatmul.mubr.bf16.gmra.mrb[12].mxu0 %v1350_v47  ;;  %701 = vmatmul.mubr.bf16.gmra.mrb[12].mxu1 %v1351_v48  ;;  %v378_v47 = vld [vmem:[#allocation2 + $0x30] sm:$0xff] }
 0x12b   : > { %v1190_v49 = vpop.f32.mrb[0].mxu0  ;;  %v1214_v50 = vpop.f32.mrb[0].mxu1 }
 0x12c   : > { %v1191_v52 = vpop.f32.mrb[1].mxu0  ;;  %v1215_v54 = vpop.f32.mrb[1].mxu1 }
 0x12d   : > { %v1192_v55 = vadd.f32 %v1191_v52, %v1190_v49  ;;  %v1216_v56 = vadd.f32 %v1215_v54, %v1214_v50  ;;  %v1193_v57 = vpop.f32.mrb[2].mxu0  ;;  %v1217_v58 = vpop.f32.mrb[2].mxu1  ;;  %v386_v49 = vld [vmem:[#allocation2 + $0x70] sm:$0xff] }
 0x12e   : > { %v1194_v60 = vpop.f32.mrb[3].mxu0  ;;  %v1218_v62 = vpop.f32.mrb[3].mxu1 }
 0x12f   : > { %v709_v63 = vadd.f32 %v1192_v55, %v372_v51  ;;  %v717_v0 = vadd.f32 %v1216_v56, %v380_v53  ;;  %v1195_v1 = vadd.f32 %v1194_v60, %v1193_v57  ;;  %v1219_v2 = vadd.f32 %v1218_v62, %v1217_v58  ;;  %v379_v55 = vld [vmem:[#allocation2 + $0x38] sm:$0xff] }
 0x130   : > { %v387_v57 = vld [vmem:[#allocation2 + $0x78] sm:$0xff] }
 0x131   : > { %725 = vst [vmem:[#allocation2] sm:$0xff] %v709_v63  ;;  %733 = vst [vmem:[#allocation2 + $0x40] sm:$0xff] %v717_v0  ;;  %v710_v3 = vadd.f32 %v1195_v1, %v373_v59  ;;  %v718_v4 = vadd.f32 %v1219_v2, %v381_v61 }
 0x133   : > { %726 = vst [vmem:[#allocation2 + $0x8] sm:$0xff] %v710_v3  ;;  %734 = vst [vmem:[#allocation2 + $0x48] sm:$0xff] %v718_v4  ;;  %v1196_v5 = vpop.f32.mrb[4].mxu0  ;;  %v1220_v6 = vpop.f32.mrb[4].mxu1  ;;  %v1561_v3 = vld [vmem:[%s1652_s2] ss:$0 sm:$0xff] (!%p1089_p13) }
 0x134   : > { %v1197_v8 = vpop.f32.mrb[5].mxu0  ;;  %v1221_v10 = vpop.f32.mrb[5].mxu1 }
 0x135   : > { %v1198_v11 = vadd.f32 %v1197_v8, %v1196_v5  ;;  %v1222_v12 = vadd.f32 %v1221_v10, %v1220_v6  ;;  %v1199_v13 = vpop.f32.mrb[6].mxu0  ;;  %v1223_v14 = vpop.f32.mrb[6].mxu1  ;;  %v1568_v6 = vld [vmem:[%s1652_s2 + $0x1] ss:$0 sm:$0xff] (!%p1089_p13) }
 0x136   : > { %v1200_v16 = vpop.f32.mrb[7].mxu0  ;;  %v1224_v18 = vpop.f32.mrb[7].mxu1 }
 0x137   : > { %v711_v19 = vadd.f32 %v1198_v11, %v374_v7  ;;  %v719_v20 = vadd.f32 %v1222_v12, %v382_v9  ;;  %v1201_v21 = vadd.f32 %v1200_v16, %v1199_v13  ;;  %v1225_v22 = vadd.f32 %v1224_v18, %v1223_v14  ;;  %v1576_v18 = vld [vmem:[%s1652_s2 + $0x2] ss:$0 sm:$0xff] (!%p1089_p13) }
 0x138   : > { %v745_v1 = vld [vmem:[#allocation2] sm:$0xff] (!%p1089_p13) }
 0x139   : > { %727 = vst [vmem:[#allocation2 + $0x10] sm:$0xff] %v711_v19  ;;  %735 = vst [vmem:[#allocation2 + $0x50] sm:$0xff] %v719_v20  ;;  %v712_v23 = vadd.f32 %v1201_v21, %v375_v15  ;;  %v720_v24 = vadd.f32 %v1225_v22, %v383_v17  ;;  %v766_v4 = vadd.f32 (!%p1089_p13), %v1561_v3, %v745_v1 }
 0x13a   : > { %v746_v2 = vld [vmem:[#allocation2 + $0x8] sm:$0xff] (!%p1089_p13) }
 0x13b   : > { %728 = vst [vmem:[#allocation2 + $0x18] sm:$0xff] %v712_v23  ;;  %736 = vst [vmem:[#allocation2 + $0x58] sm:$0xff] %v720_v24  ;;  %v1202_v25 = vpop.f32.mrb[8].mxu0  ;;  %v1226_v26 = vpop.f32.mrb[8].mxu1  ;;  %v767_v5 = vadd.f32 (!%p1089_p13), %v1561_v3, %v746_v2  ;;  %v782_v12 = vmax.f32 (!%p1089_p13), %v766_v4, 0.0 }
 0x13c   : > { %v1203_v28 = vpop.f32.mrb[9].mxu0  ;;  %v1227_v30 = vpop.f32.mrb[9].mxu1 }
 0x13d   : > { %v1204_v31 = vadd.f32 %v1203_v28, %v1202_v25  ;;  %v1228_v32 = vadd.f32 %v1227_v30, %v1226_v26  ;;  %v1205_v33 = vpop.f32.mrb[10].mxu0  ;;  %v1229_v34 = vpop.f32.mrb[10].mxu1  ;;  %v783_v13 = vmax.f32 (!%p1089_p13), %v767_v5, 0.0  ;;  %v803_v23 = vmul.f32 (!%p1089_p13), %v1568_v6, %v782_v12 }
 0x13e   : > { %v1206_v36 = vpop.f32.mrb[11].mxu0  ;;  %v1230_v38 = vpop.f32.mrb[11].mxu1 }
 0x13f   : > { %v713_v39 = vadd.f32 %v1204_v31, %v376_v27  ;;  %v721_v40 = vadd.f32 %v1228_v32, %v384_v29  ;;  %v1207_v41 = vadd.f32 %v1206_v36, %v1205_v33  ;;  %v1231_v42 = vadd.f32 %v1230_v38, %v1229_v34  ;;  %v753_v31 = vld [vmem:[#allocation2 + $0x40] sm:$0xff] (!%p1089_p13)  ;;  %v754_v36 = vld [vmem:[#allocation2 + $0x48] sm:$0xff] (!%p1089_p13) }
 0x140   : > { %v747_v7 = vld [vmem:[#allocation2 + $0x10] sm:$0xff] (!%p1089_p13)  ;;  %v804_v24 = vmul.f32 (!%p1089_p13), %v1568_v6, %v783_v13  ;;  %v824_v32 = vadd.f32 (!%p1089_p13), %v1576_v18, %v803_v23 }
 0x141   : > { %729 = vst [vmem:[#allocation2 + $0x20] sm:$0xff] %v713_v39  ;;  %737 = vst [vmem:[#allocation2 + $0x60] sm:$0xff] %v721_v40  ;;  %v714_v43 = vadd.f32 %v1207_v41, %v377_v35  ;;  %v722_v44 = vadd.f32 %v1231_v42, %v385_v37  ;;  %v768_v9 = vadd.f32 (!%p1089_p13), %v1561_v3, %v747_v7  ;;  %v755_v41 = vld [vmem:[#allocation2 + $0x50] sm:$0xff] (!%p1089_p13) }
 0x142   : > { %v748_v8 = vld [vmem:[#allocation2 + $0x18] sm:$0xff] (!%p1089_p13)  ;;  %v825_v33 = vadd.f32 (!%p1089_p13), %v1576_v18, %v804_v24 }
 0x143   : > { %730 = vst [vmem:[#allocation2 + $0x28] sm:$0xff] %v714_v43  ;;  %738 = vst [vmem:[#allocation2 + $0x68] sm:$0xff] %v722_v44  ;;  %v1208_v45 = vpop.f32.mrb[12].mxu0  ;;  %v1232_v46 = vpop.f32.mrb[12].mxu1  ;;  %v769_v14 = vadd.f32 (!%p1089_p13), %v1561_v3, %v748_v8  ;;  %v784_v19 = vmax.f32 (!%p1089_p13), %v768_v9, 0.0  ;;  %v756_v42 = vld [vmem:[#allocation2 + $0x58] sm:$0xff] (!%p1089_p13) }
 0x144   : > { %v1209_v48 = vpop.f32.mrb[13].mxu0  ;;  %v1233_v50 = vpop.f32.mrb[13].mxu1  ;;  %v1130_v43 = vpack.c.bf16 (!%p1089_p13), %v825_v33, %v824_v32 }
 0x145   : > { %v1210_v51 = vadd.f32 %v1209_v48, %v1208_v45  ;;  %v1234_v52 = vadd.f32 %v1233_v50, %v1232_v46  ;;  %v1211_v53 = vpop.f32.mrb[14].mxu0  ;;  %v1235_v54 = vpop.f32.mrb[14].mxu1  ;;  %744 = sbr.rel (%p1089_p13) target bundleno = 351 (0x15f), region = 78  ;;  %v785_v25 = vmax.f32 (!%p1089_p13), %v769_v14, 0.0  ;;  %v805_v27 = vmul.f32 (!%p1089_p13), %v1568_v6, %v784_v19 }
 0x146   : > { %v1212_v56 = vpop.f32.mrb[15].mxu0  ;;  %v1236_v58 = vpop.f32.mrb[15].mxu1  ;;  %v774_v46 = vadd.f32 (!%p1089_p13), %v1561_v3, %v753_v31  ;;  %1131 = vst [vmem:[%s1520_s30] sm:$0xff] (!%p1089_p13), %v1130_v43  }
 0x147   : > { %v715_v59 = vadd.f32 %v1210_v51, %v378_v47  ;;  %v723_v60 = vadd.f32 %v1234_v52, %v386_v49  ;;  %v1213_v61 = vadd.f32 %v1212_v56, %v1211_v53  ;;  %v1237_v62 = vadd.f32 %v1236_v58, %v1235_v54 }
 0x148   : > { %v749_v10 = vld [vmem:[#allocation2 + $0x20] sm:$0xff] (!%p1089_p13)  ;;  %v806_v34 = vmul.f32 (!%p1089_p13), %v1568_v6, %v785_v25  ;;  %v826_v37 = vadd.f32 (!%p1089_p13), %v1576_v18, %v805_v27  ;;  %v775_v51 = vadd.f32 (!%p1089_p13), %v1561_v3, %v754_v36  ;;  %v790_v54 = vmax.f32 (!%p1089_p13), %v774_v46, 0.0 }
 0x149   : > { %731 = vst [vmem:[#allocation2 + $0x30] sm:$0xff] %v715_v59  ;;  %739 = vst [vmem:[#allocation2 + $0x70] sm:$0xff] %v723_v60  ;;  %v716_v63 = vadd.f32 %v1213_v61, %v379_v55  ;;  %v724_v0 = vadd.f32 %v1237_v62, %v387_v57  ;;  %v770_v15 = vadd.f32 (!%p1089_p13), %v1561_v3, %v749_v10  ;;  %v757_v47 = vld [vmem:[#allocation2 + $0x60] sm:$0xff] (!%p1089_p13) }
 0x14a   : > { %v750_v11 = vld [vmem:[#allocation2 + $0x28] sm:$0xff] (!%p1089_p13)  ;;  %v827_v44 = vadd.f32 (!%p1089_p13), %v1576_v18, %v806_v34  ;;  %v776_v55 = vadd.f32 (!%p1089_p13), %v1561_v3, %v755_v41  ;;  %v777_v56 = vadd.f32 (!%p1089_p13), %v1561_v3, %v756_v42  ;;  %v791_v61 = vmax.f32 (!%p1089_p13), %v775_v51, 0.0 }
 0x14b   : > { %732 = vst [vmem:[#allocation2 + $0x38] sm:$0xff] %v716_v63  ;;  %740 = vst [vmem:[#allocation2 + $0x78] sm:$0xff] %v724_v0  ;;  %v771_v20 = vadd.f32 (!%p1089_p13), %v1561_v3, %v750_v11  ;;  %v786_v26 = vmax.f32 (!%p1089_p13), %v770_v15, 0.0  ;;  %v758_v52 = vld [vmem:[#allocation2 + $0x68] sm:$0xff] (!%p1089_p13)  ;;  %v778_v62 = vadd.f32 (!%p1089_p13), %v1561_v3, %v757_v47  ;;  %v811_v63 = vmul.f32 (!%p1089_p13), %v1568_v6, %v790_v54 }
 0x14c   : > { %v1135_v53 = vpack.c.bf16 %v827_v44, %v826_v37  ;;  %v792_v0 = vmax.f32 %v776_v55, 0.0  ;;  %v793_v1 = vmax.f32 %v777_v56, 0.0  ;;  %v779_v2 = vadd.f32 %v1561_v3, %v758_v52 }
 0x14d   : > { %v787_v28 = vmax.f32 %v771_v20, 0.0  ;;  %v807_v35 = vmul.f32 %v1568_v6, %v786_v26  ;;  %v812_v4 = vmul.f32 %v1568_v6, %v791_v61  ;;  %v794_v5 = vmax.f32 %v778_v62, 0.0 }
 0x14e   : > { %1167 = vst [vmem:[%s1520_s30 + $0x8] sm:$0xff] %v1135_v53   ;;  %v832_v9 = vadd.f32 %v1576_v18, %v811_v63  ;;  %v813_v10 = vmul.f32 %v1568_v6, %v792_v0  ;;  %v814_v11 = vmul.f32 %v1568_v6, %v793_v1  ;;  %v795_v12 = vmax.f32 %v779_v2, 0.0 }
 0x14f   : > { %v808_v38 = vmul.f32 %v1568_v6, %v787_v28  ;;  %v828_v45 = vadd.f32 %v1576_v18, %v807_v35  ;;  %v833_v13 = vadd.f32 %v1576_v18, %v812_v4  ;;  %v815_v14 = vmul.f32 %v1568_v6, %v794_v5 }
 0x150   : > { %v751_v16 = vld [vmem:[#allocation2 + $0x30] sm:$0xff]  ;;  %v816_v19 = vmul.f32 %v1568_v6, %v795_v12 }
 0x151   : > { %v772_v21 = vadd.f32 %v1561_v3, %v751_v16  ;;  %v829_v48 = vadd.f32 %v1576_v18, %v808_v38  ;;  %v759_v57 = vld [vmem:[#allocation2 + $0x70] sm:$0xff]  ;;  %v1150_v20 = vpack.c.bf16 %v833_v13, %v832_v9 }
 0x152   : > { %v752_v17 = vld [vmem:[#allocation2 + $0x38] sm:$0xff]  ;;  %v780_v7 = vadd.f32 %v1561_v3, %v759_v57  ;;  %v837_v25 = vadd.f32 %v1576_v18, %v816_v19 }
 0x153   : > { %v773_v22 = vadd.f32 %v1561_v3, %v752_v17  ;;  %v788_v29 = vmax.f32 %v772_v21, 0.0  ;;  %v760_v58 = vld [vmem:[#allocation2 + $0x78] sm:$0xff]  ;;  %v1140_v59 = vpack.c.bf16 %v829_v48, %v828_v45  ;;  %v834_v17 = vadd.f32 %v1576_v18, %v813_v10  ;;  %1170 = vst [vmem:[%s1520_s30 + $0x20] sm:$0xff] %v1150_v20  }
 0x154   : > { %v781_v8 = vadd.f32 %v1561_v3, %v760_v58  ;;  %v796_v15 = vmax.f32 %v780_v7, 0.0  ;;  %v835_v3 = vadd.f32 %v1576_v18, %v814_v11  ;;  %v836_v21 = vadd.f32 %v1576_v18, %v815_v14 }
 0x155   : > { %v789_v30 = vmax.f32 %v773_v22, 0.0  ;;  %v809_v39 = vmul.f32 %v1568_v6, %v788_v29  ;;  %1168 = vst [vmem:[%s1520_s30 + $0x10] sm:$0xff] %v1140_v59  }
 0x156   : > { %v797_v16 = vmax.f32 %v781_v8, 0.0  ;;  %v817_v22 = vmul.f32 %v1568_v6, %v796_v15  ;;  %v1155_v24 = vpack.c.bf16 %v835_v3, %v834_v17  ;;  %v1160_v28 = vpack.c.bf16 %v837_v25, %v836_v21 }
 0x157   : > { %v810_v40 = vmul.f32 %v1568_v6, %v789_v30  ;;  %v830_v49 = vadd.f32 %v1576_v18, %v809_v39 }
 0x158   : > { %v818_v23 = vmul.f32 %v1568_v6, %v797_v16  ;;  %v838_v26 = vadd.f32 %v1576_v18, %v817_v22  ;;  %1171 = vst [vmem:[%s1520_s30 + $0x28] sm:$0xff] %v1155_v24   ;;  %1172 = vst [vmem:[%s1520_s30 + $0x30] sm:$0xff] %v1160_v28  }
 0x159   : > { %v831_v50 = vadd.f32 %v1576_v18, %v810_v40 }
 0x15a   : > { %v839_v27 = vadd.f32 %v1576_v18, %v818_v23 }
 0x15b   : > { %v1145_v60 = vpack.c.bf16 %v831_v50, %v830_v49 }
 0x15c   : > { %v1165_v29 = vpack.c.bf16 %v839_v27, %v838_v26 }
 0x15d   : > { %1169 = vst [vmem:[%s1520_s30 + $0x18] sm:$0xff] %v1145_v60  }
 0x15e   : > { %1173 = vst [vmem:[%s1520_s30 + $0x38] sm:$0xff] %v1165_v29  }
 0x15f PF: > { %s13_s18 = sadd.s32 1, %s1406_s18   ;;  %s1654_s12 = smov %s1386_s13 }
 0x160   : > { %p10_p0 = scmp.ge.s32.totalorder %s13_s18, 16   ;;  %s1655_s13 = smov %s1480_s25 }
 0x161   : > { %s1656_s14 = smov %s1398_s16  ;;  %s1657_s15 = smov %s1402_s17 }
 0x162   : > { %s1658_s16 = smov %s1661_s19  ;;  %s1659_s17 = smov %s1665_s20 }
 0x163   :  { %12 = sbr.rel (!%p10_p0) target bundleno = 4 (0x4), region = 119 }

// kernel: conv_cfc_forward.7
= control target key start
LH: loop header
LB: loop body
LE: loop exit
PB: predicated region body
PF: predicated region fallthrough
CT: control target
= control target key end

     0   :  { %s967_s12 = smov 0   ;;  %s969_s13 = smov 0   ;;  %s1098_s0 = inlined_call_operand.vmem [shape: bf16[64,3328], index: 0, kind: input, shape index: {}]   ;;  %s1099_s1 = inlined_call_operand.vmem [shape: bf16[3328,128], index: 1, kind: input, shape index: {}]   ;;  %s1100_s2 = inlined_call_operand.vmem [shape: f32[3,128], index: 2, kind: input, shape index: {}]   ;;  %s1101_s3 = inlined_call_operand.vmem [shape: bf16[64,128], index: 3, kind: output, shape index: {}]  }
   0x1   :  { %s971_s14 = smov 0   ;;  %s973_s15 = smov 0  }
   0x2   :  { %s975_s16 = smov 0   ;;  %s977_s17 = smov 0  }
   0x3   :  { %s979_s18 = smov 0  }
   0x4 LB: > { %s25_s19 = sadd.s32 1, %s936_s16  ;;  %s32_s20 = sadd.s32 1, %s940_s17  ;;  %s944_s18 = sphi %s979_s18, %s13_s18   ;;  %s940_s17 = sphi %s977_s17, %s1107_s17   ;;  %s936_s16 = sphi %s975_s16, %s1106_s16   ;;  %s932_s15 = sphi %s973_s15, %s1105_s15   ;;  %s928_s14 = sphi %s971_s14, %s1104_s14   ;;  %s924_s13 = sphi %s969_s13, %s1103_s13   ;;  %s920_s12 = sphi %s967_s12, %s1102_s12  }
   0x5   : > { %p26_p0 = scmp.ge.s32.totalorder %s25_s19, 13  ;;  %p48_p1 = scmp.ne.s32.totalorder %s924_s13, %s920_s12 }
   0x6   : > { %p49_p2 = scmp.eq.s32.totalorder %s944_s18, 0  ;;  %s41_s24 = sadd.s32 1, %s924_s13 }
   0x7   : > { %s1109_s19 = smov (%p26_p0, %s25_s19), 0  ;;  %s1111_s20 = smov (!%p26_p0, %s32_s20), %s940_s17 }
   0x8   : > { %p50_p3 = por %p49_p2, %p48_p1  ;;  %p34_p4 = scmp.ge.s32.totalorder %s1111_s20, 2 }
   0x9   : > { %s37_s21 = ssub.s32 %s936_s16, %s1109_s19  ;;  %p708_p6 = scmp.ge.s32.totalorder %s944_s18, 26 }
   0xa   : > { %s1113_s20 = smov (%p34_p4, %s1111_s20), 0 }
   0xb   : > { %s36_s22 = ssub.s32 %s940_s17, %s1113_s20  ;;  %163 = sbr.rel (%p708_p6) target bundleno = 28 (0x1c), region = 20 }
   0xc   : > { %s38_s23 = sor.u32 %s37_s21, %s36_s22 }
   0xd   : > { %p39_p5 = scmp.eq.s32.totalorder %s38_s23, 0 }
   0xf   : > { %s1018_s25 = scalar_select %p39_p5, %s924_s13, %s41_s24  }
  0x12   : > { %166 = sbr.rel (!%p50_p3) target bundleno = 28 (0x1c), region = 24  ;;  %s168_s26 = sand.u32 (%p50_p3), 1, %s924_s13  }
  0x13   : > { %s711_s27 = sshll.u32 (%p50_p3), %s936_s16, 1  ;;  %s709_s28 = sshll.u32 (%p50_p3), %s168_s26, 5 }
  0x14   : > { %s810_s29 = smul.u32 (%p50_p3), 104, %s940_s17  ;;  %s170_s8 = scalar_lea.vmem (%p50_p3), [#allocation3], %s709_s28 }
  0x16   : > { %s174_s30 = sadd.s32 (%p50_p3), %s810_s29, %s711_s27 }
  0x17   : > { %s713_s4 = sshll.u32 (%p50_p3), %s174_s30, 2 }
  0x18   : > { %s176_s7 = scalar_lea.vmem (%p50_p3), %s1098_s0, %s713_s4 }
  0x19   : > { %v210_v0 = vld [vmem:[%s176_s7] sm:$0xff]  ;;  %v212_v1 = vld [vmem:[%s176_s7 + $0x68] sm:$0xff]  ;;  %v214_v2 = vld [vmem:[%s176_s7 + $0xd0] sm:$0xff] }
  0x1a   : > { %211 = vst [vmem:[%s170_s8] sm:$0xff] %v210_v0  ;;  %213 = vst [vmem:[%s170_s8 + $0x8] sm:$0xff] %v212_v1  ;;  %v216_v3 = vld [vmem:[%s176_s7 + $0x138] sm:$0xff] }
  0x1b   : > { %215 = vst [vmem:[%s170_s8 + $0x10] sm:$0xff] %v214_v2  ;;  %217 = vst [vmem:[%s170_s8 + $0x18] sm:$0xff] %v216_v3 }
  0x1c PF: > { %p714_p7 = scmp.ge.s32.totalorder %s944_s18, 1  ;;  %p234_p8 = scmp.lt.s32.totalorder %s944_s18, 27 }
  0x1e   : > { %p235_p9 = pnand %p714_p7, %p234_p8 }
  0x1f   : > { %s241_s9 = sand.u32 (!%p235_p9), 1, %s920_s12   ;;  %s716_s10 = sshll.u32 (!%p235_p9), %s928_s14, 5 }
  0x20   : > { %238 = sbr.rel (%p235_p9) target bundleno = 320 (0x140), region = 66  ;;  %s715_s11 = sshll.u32 (!%p235_p9), %s241_s9, 5 }
  0x21   : > { %p282_p10 = scmp.lt.s32.totalorder (!%p235_p9), %s716_s10, 415  ;;  %s718_s21 = sshll.u32 (!%p235_p9), %s932_s15, 2 }
  0x22   : > { %p295_p11 = scmp.lt.s32.totalorder (!%p235_p9), %s718_s21, 7  ;;  %s1042_s12 = scalar_lea.vmem (!%p235_p9), [#allocation3], %s715_s11 }
  0x23   : > { %p720_p12 = scmp.ne.s32.totalorder (!%p235_p9), %s928_s14, 0 }
  0x27   : > { %s1115_s10 = smov (!%p282_p10, %s716_s10), 415  ;;  %s1117_s21 = smov (!%p295_p11, %s718_s21), 7 }
  0x28   : > { %s717_s22 = sshll.u32 %s1115_s10, 2  ;;  %s719_s27 = sshll.u32 %s1117_s21, 2  ;;  %v946_v4 = vmov (!%p720_p12), 0.0  }
  0x29   : > { %s1035_s26 = scalar_lea.vmem %s1099_s1, %s717_s22  ;;  %s1040_s30 = scalar_lea.vmem %s1101_s3, %s719_s27  ;;  %308 = vst [vmem:[#allocation2] sm:$0xff] (!%p720_p12), %v946_v4  ;;  %309 = vst [vmem:[#allocation2 + $0x8] sm:$0xff] (!%p720_p12), %v946_v4 }
  0x2a   : > { %307 = sbr.rel (%p720_p12) target bundleno = 49 (0x31), region = 74  ;;  %310 = vst [vmem:[#allocation2 + $0x10] sm:$0xff] (!%p720_p12), %v946_v4  ;;  %311 = vst [vmem:[#allocation2 + $0x18] sm:$0xff] (!%p720_p12), %v946_v4 }
  0x31 PF: > { %v868_v5 = vld [vmem:[%s1035_s26 + $0x40] sm:$0xff]   ;;  %v870_v7 = vld [vmem:[%s1035_s26 + $0x48] sm:$0xff]   ;;  %v872_v9 = vld [vmem:[%s1035_s26 + $0x50] sm:$0xff]   ;;  %p741_p13 = scmp.ne.s32.totalorder %s928_s14, 12 }
  0x32   : > { %v869_v6 = vld [vmem:[%s1035_s26] sm:$0xff]   ;;  %766 = vmatprep.subr.bf16.mxu0 %v868_v5  ;;  %794 = vmatprep.subr.bf16.mxu1 %v868_v5  ;;  %v871_v8 = vld [vmem:[%s1035_s26 + $0x8] sm:$0xff]   ;;  %v873_v10 = vld [vmem:[%s1035_s26 + $0x10] sm:$0xff]  }
  0x33   : > { %767 = vmatpush3.bf16.msra.mxu0 %v869_v6  ;;  %802 = vmatpush3.bf16.msra.mxu1 %v869_v6  ;;  %v874_v11 = vld [vmem:[%s1035_s26 + $0x58] sm:$0xff]   ;;  %v876_v13 = vld [vmem:[%s1035_s26 + $0x60] sm:$0xff]   ;;  %v878_v15 = vld [vmem:[%s1035_s26 + $0x68] sm:$0xff]  }
  0x34   : > { %768 = vmatprep.subr.bf16.mxu0 %v870_v7  ;;  %795 = vmatprep.subr.bf16.mxu1 %v870_v7  ;;  %v875_v12 = vld [vmem:[%s1035_s26 + $0x18] sm:$0xff]   ;;  %v877_v14 = vld [vmem:[%s1035_s26 + $0x20] sm:$0xff]   ;;  %v879_v18 = vld [vmem:[%s1035_s26 + $0x28] sm:$0xff]  }
  0x35   : > { %v886_v16 = vld [vmem:[%s1042_s12 + $0x4] ss:$8 sps:$4 sm:$0xff]   ;;  %v889_v17 = vld [vmem:[%s1042_s12 + $0x14] ss:$8 sps:$4 sm:$0xff]   ;;  %v884_v23 = vld [vmem:[%s1042_s12] ss:$8 sps:$4 sm:$0xff]  }
  0x36   : > { %v880_v19 = vld [vmem:[%s1035_s26 + $0x70] sm:$0xff]   ;;  %500 = vmatprep.mubr.bf16.mxu0 %v886_v16  ;;  %508 = vmatprep.mubr.bf16.mxu1 %v889_v17  ;;  %v882_v21 = vld [vmem:[%s1035_s26 + $0x78] sm:$0xff]   ;;  %v312_v27 = vld [vmem:[#allocation2] sm:$0xff] }
  0x37   : > { %769 = vmatpush3.bf16.msra.mxu0 %v871_v8  ;;  %803 = vmatpush3.bf16.msra.mxu1 %v871_v8  ;;  %v881_v20 = vld [vmem:[%s1035_s26 + $0x30] sm:$0xff]   ;;  %v883_v22 = vld [vmem:[%s1035_s26 + $0x38] sm:$0xff]   ;;  %v313_v35 = vld [vmem:[#allocation2 + $0x8] sm:$0xff] }
  0x38   : > { %770 = vmatprep.subr.bf16.mxu0 %v872_v9  ;;  %796 = vmatprep.subr.bf16.mxu1 %v872_v9  ;;  %v887_v24 = vld [vmem:[%s1042_s12 + $0x10] ss:$8 sps:$4 sm:$0xff]   ;;  %v742_v47 = vld [vmem:[%s1100_s2] ss:$0 sm:$0xff] (!%p741_p13)  ;;  %v743_v51 = vld [vmem:[%s1100_s2 + $0x1] ss:$0 sm:$0xff] (!%p741_p13) }
  0x39   : > { %v314_v29 = vld [vmem:[#allocation2 + $0x10] sm:$0xff]  ;;  %v315_v37 = vld [vmem:[#allocation2 + $0x18] sm:$0xff]  ;;  %v744_v57 = vld [vmem:[%s1100_s2 + $0x2] ss:$0 sm:$0xff] (!%p741_p13) }
  0x3b   : > { %771 = vmatpush3.bf16.msra.mxu0 %v873_v10  ;;  %804 = vmatpush3.bf16.msra.mxu1 %v873_v10 }
  0x3c   : > { %772 = vmatprep.subr.bf16.mxu0 %v874_v11  ;;  %797 = vmatprep.subr.bf16.mxu1 %v874_v11 }
  0x3f   : > { %773 = vmatpush3.bf16.msra.mxu0 %v875_v12  ;;  %805 = vmatpush3.bf16.msra.mxu1 %v875_v12 }
  0x40   : > { %774 = vmatprep.subr.bf16.mxu0 %v876_v13  ;;  %798 = vmatprep.subr.bf16.mxu1 %v876_v13 }
  0x43   : > { %775 = vmatpush3.bf16.msra.mxu0 %v877_v14  ;;  %806 = vmatpush3.bf16.msra.mxu1 %v877_v14 }
  0x44   : > { %776 = vmatprep.subr.bf16.mxu0 %v878_v15  ;;  %799 = vmatprep.subr.bf16.mxu1 %v878_v15 }
  0x47   : > { %777 = vmatpush3.bf16.msra.mxu0 %v879_v18  ;;  %807 = vmatpush3.bf16.msra.mxu1 %v879_v18 }
  0x48   : > { %778 = vmatprep.subr.bf16.mxu0 %v880_v19  ;;  %800 = vmatprep.subr.bf16.mxu1 %v880_v19 }
  0x4b   : > { %779 = vmatpush3.bf16.msra.mxu0 %v881_v20  ;;  %808 = vmatpush3.bf16.msra.mxu1 %v881_v20 }
  0x4c   : > { %780 = vmatprep.subr.bf16.mxu0 %v882_v21  ;;  %801 = vmatprep.subr.bf16.mxu1 %v882_v21 }
  0x4f   : > { %781 = vmatpush3.bf16.msra.mxu0 %v883_v22  ;;  %809 = vmatpush3.bf16.msra.mxu1 %v883_v22 }
  0x52   : > { %501 = vmatmul.mubr.bf16.vlgmr.msra.gmra.mrb[0].mxu0 %v884_v23  ;;  %509 = vmatmul.mubr.bf16.vlgmr.msra.gmra.mrb[0].mxu1 %v887_v24 }
 0x125   : > { %v782_v25 = vpop.f32.mrb[0].mxu0  ;;  %v788_v26 = vpop.f32.mrb[0].mxu1 }
 0x126   : > { %v783_v28 = vpop.f32.mrb[1].mxu0  ;;  %v789_v30 = vpop.f32.mrb[1].mxu1 }
 0x127   : > { %v784_v31 = vadd.f32 %v783_v28, %v782_v25  ;;  %v790_v32 = vadd.f32 %v789_v30, %v788_v26  ;;  %v785_v33 = vpop.f32.mrb[2].mxu0  ;;  %v791_v34 = vpop.f32.mrb[2].mxu1  ;;  %528 = sbr.rel (%p741_p13) target bundleno = 320 (0x140), region = 78 }
 0x128   : > { %v786_v36 = vpop.f32.mrb[3].mxu0  ;;  %v792_v38 = vpop.f32.mrb[3].mxu1 }
 0x129   : > { %v517_v39 = vadd.f32 %v784_v31, %v312_v27  ;;  %v519_v40 = vadd.f32 %v790_v32, %v314_v29  ;;  %v787_v41 = vadd.f32 %v786_v36, %v785_v33  ;;  %v793_v42 = vadd.f32 %v792_v38, %v791_v34 }
 0x12b   : > { %521 = vst [vmem:[#allocation2] sm:$0xff] %v517_v39  ;;  %523 = vst [vmem:[#allocation2 + $0x10] sm:$0xff] %v519_v40  ;;  %v518_v43 = vadd.f32 %v787_v41, %v313_v35  ;;  %v520_v44 = vadd.f32 %v793_v42, %v315_v37 }
 0x12d   : > { %522 = vst [vmem:[#allocation2 + $0x8] sm:$0xff] %v518_v43  ;;  %524 = vst [vmem:[#allocation2 + $0x18] sm:$0xff] %v520_v44 }
 0x132   : > { %v529_v45 = vld [vmem:[#allocation2] sm:$0xff]  ;;  %v531_v50 = vld [vmem:[#allocation2 + $0x10] sm:$0xff] }
 0x133   : > { %v538_v48 = vadd.f32 %v742_v47, %v529_v45  ;;  %v540_v53 = vadd.f32 %v742_v47, %v531_v50 }
 0x134   : > { %v530_v46 = vld [vmem:[#allocation2 + $0x8] sm:$0xff]  ;;  %v532_v52 = vld [vmem:[#allocation2 + $0x18] sm:$0xff] }
 0x135   : > { %v539_v49 = vadd.f32 %v742_v47, %v530_v46  ;;  %v542_v54 = vmax.f32 %v538_v48, 0.0  ;;  %v541_v56 = vadd.f32 %v742_v47, %v532_v52  ;;  %v544_v58 = vmax.f32 %v540_v53, 0.0 }
 0x137   : > { %v543_v55 = vmax.f32 %v539_v49, 0.0  ;;  %v551_v59 = vmul.f32 %v743_v51, %v542_v54  ;;  %v545_v61 = vmax.f32 %v541_v56, 0.0  ;;  %v553_v62 = vmul.f32 %v743_v51, %v544_v58 }
 0x139   : > { %v552_v60 = vmul.f32 %v743_v51, %v543_v55  ;;  %v560_v63 = vadd.f32 %v744_v57, %v551_v59  ;;  %v554_v1 = vmul.f32 %v743_v51, %v545_v61  ;;  %v562_v2 = vadd.f32 %v744_v57, %v553_v62 }
 0x13b   : > { %v561_v0 = vadd.f32 %v744_v57, %v552_v60  ;;  %v563_v4 = vadd.f32 %v744_v57, %v554_v1 }
 0x13d   : > { %v758_v3 = vpack.c.bf16 %v561_v0, %v560_v63  ;;  %v763_v5 = vpack.c.bf16 %v563_v4, %v562_v2 }
 0x13f   : > { %759 = vst [vmem:[%s1040_s30] sm:$0xff] %v758_v3   ;;  %765 = vst [vmem:[%s1040_s30 + $0x8] sm:$0xff] %v763_v5  }
 0x140 PF: > { %s13_s18 = sadd.s32 1, %s944_s18   ;;  %s1102_s12 = smov %s924_s13 }
 0x141   : > { %p10_p0 = scmp.ge.s32.totalorder %s13_s18, 28   ;;  %s1103_s13 = smov %s1018_s25 }
 0x142   : > { %s1104_s14 = smov %s936_s16  ;;  %s1105_s15 = smov %s940_s17 }
 0x143   : > { %s1106_s16 = smov %s1109_s19  ;;  %s1107_s17 = smov %s1113_s20 }
 0x144   :  { %12 = sbr.rel (!%p10_p0) target bundleno = 4 (0x4), region = 119 }

// kernel: conv_cfc_forward.8
= control target key start
LH: loop header
LB: loop body
LE: loop exit
PB: predicated region body
PF: predicated region fallthrough
CT: control target
= control target key end

     0   :  { %s1398_s0 = inlined_call_operand.vmem [shape: bf16[16,3328], index: 0, kind: input, shape index: {}]   ;;  %s1399_s1 = inlined_call_operand.vmem [shape: bf16[3328,256], index: 1, kind: input, shape index: {}]   ;;  %s1400_s2 = inlined_call_operand.vmem [shape: f32[3,256], index: 2, kind: input, shape index: {}]   ;;  %s1401_s3 = inlined_call_operand.vmem [shape: bf16[16,256], index: 3, kind: output, shape index: {}]  }
   0x1   :  { %1404 = sst [smem:[#allocation9_spill]] %s1398_s0 }
   0x2   :  { %s1130_s12 = smov 0   ;;  %s1132_s13 = smov 0  }
   0x3   :  { %s1134_s14 = smov 0   ;;  %s1136_s15 = smov 0  }
   0x4   :  { %s1138_s16 = smov 0   ;;  %s1140_s17 = smov 0  }
   0x5   :  { %s1142_s18 = smov 0   ;;  %s1144_s19 = smov 0  }
   0x6   :  { %s1146_s20 = smov 0   ;;  %s1148_s21 = smov 0  }
   0x7   :  { %s1150_s22 = smov 0  }
   0x8 LB: > { %s837_s23 = sadd.s32 4294967295, %s1107_s22   ;;  %s25_s24 = sadd.s32 1, %s1099_s20  ;;  %s1107_s22 = sphi %s1150_s22, %s13_s22   ;;  %s1103_s21 = sphi %s1148_s21, %s1424_s21   ;;  %s1099_s20 = sphi %s1146_s20, %s1423_s20   ;;  %s1095_s19 = sphi %s1144_s19, %s1422_s19   ;;  %s1091_s18 = sphi %s1142_s18, %s1421_s18   ;;  %s1087_s17 = sphi %s1140_s17, %s1420_s17   ;;  %s1083_s16 = sphi %s1138_s16, %s1419_s16   ;;  %s1079_s15 = sphi %s1136_s15, %s1418_s15   ;;  %s1075_s14 = sphi %s1134_s14, %s1417_s14   ;;  %s1071_s13 = sphi %s1132_s13, %s1416_s13   ;;  %s1067_s12 = sphi %s1130_s12, %s1415_s12  }
   0x9   : > { %p26_p0 = scmp.ge.s32.totalorder %s25_s24, 13  ;;  %s28_s25 = sadd.s32 1, %s1103_s21 }
   0xa   : > { %s41_s26 = sadd.s32 1, %s1087_s17  ;;  %p48_p1 = scmp.ne.s32.totalorder %s1087_s17, %s1083_s16 }
   0xb   : > { %s1426_s24 = smov (%p26_p0, %s25_s24), 0  ;;  %s1428_s25 = smov (!%p26_p0, %s28_s25), %s1103_s21 }
   0xc   : > { %1405 = sst [smem:[#allocation6_spill]] %s1426_s24  ;;  %s37_s27 = ssub.s32 %s1099_s20, %s1426_s24 }
   0xd   : > { %p49_p2 = scmp.eq.s32.totalorder %s1107_s22, 0  ;;  %p30_p3 = scmp.ge.s32.totalorder %s1428_s25, 2 }
   0xe   : > { %p39_p4 = scmp.eq.s32.totalorder %s37_s27, 0  ;;  %s69_s29 = sadd.s32 1, %s1079_s15 }
   0xf   : > { %p1197_p5 = por %p49_p2, %p48_p1  ;;  %s1430_s25 = smov (%p30_p3, %s1428_s25), 0 }
  0x10   : > { %1407 = sst [smem:[#allocation7_spill]] %s1430_s25  ;;  %s65_s4 = ssub.s32 %s1103_s21, %s1430_s25 }
  0x11   : > { %s1205_s30 = scalar_select %p39_p4, %s1087_s17, %s41_s26  }
  0x12   : > { %p76_p6 = scmp.ne.s32.totalorder %s1079_s15, %s1075_s14  ;;  %s66_s5 = sor.u32 %s65_s4, %s37_s27 }
  0x13   : > { %1408 = sst [smem:[#allocation8_spill]] %s1205_s30  ;;  %p121_p7 = scmp.eq.s32.totalorder %s65_s4, 0 }
  0x14   : > { %p67_p8 = scmp.eq.s32.totalorder %s66_s5, 0  ;;  %p1211_p9 = por %p76_p6, %p49_p2 }
  0x15   : > { %s123_s7 = sadd.s32 1, %s1071_s13  ;;  %p133_p10 = scmp.ne.s32.totalorder %s1071_s13, %s1067_s12 }
  0x16   : > { %s1219_s8 = scalar_select %p67_p8, %s1079_s15, %s69_s29  }
  0x17   : > { %s1222_s9 = scalar_select %p121_p7, %s1071_s13, %s123_s7  }
  0x18   : > { %p134_p11 = scmp.eq.s32.totalorder %s837_s23, 25  ;;  %p840_p13 = scmp.ge.s32.totalorder %s1107_s22, 26 }
  0x1a   : > { %p1224_p12 = por %p134_p11, %p133_p10  ;;  %156 = sbr.rel (%p840_p13) target bundleno = 71 (0x47), region = 16 }
  0x21   : > { %159 = sbr.rel (!%p1197_p5) target bundleno = 44 (0x2c), region = 20  ;;  %s161_s11 = sand.u32 (%p1197_p5), 1, %s1087_s17  }
  0x22   : > { %s882_s26 = sshll.u32 (%p1197_p5), %s1099_s20, 3  ;;  %s841_s27 = sshll.u32 (%p1197_p5), %s161_s11, 4 }
  0x23   : > { %s1411_s0 = sld [smem:[#allocation9_spill]] (%p1197_p5)  ;;  %s163_s23 = scalar_lea.vmem (%p1197_p5), [#allocation3], %s841_s27 }
  0x29   : > { %s169_s5 = scalar_lea.vmem %s1411_s0, %s882_s26 }
  0x2a   : > { %v199_v0 = vld [vmem:[%s169_s5] sm:$0xff]  ;;  %v201_v1 = vld [vmem:[%s169_s5 + $0x68] sm:$0xff] }
  0x2b   : > { %200 = vst [vmem:[%s163_s23] sm:$0xff] %v199_v0  ;;  %202 = vst [vmem:[%s163_s23 + $0x8] sm:$0xff] %v201_v1 }
  0x2c PF: > { %208 = sbr.rel (!%p1211_p9) target bundleno = 71 (0x47), region = 58  ;;  %s210_s28 = sand.u32 (%p1211_p9), 1, %s1079_s15  }
  0x2d   : > { %s883_s7 = sshll.u32 (%p1211_p9), %s1099_s20, 6  ;;  %s844_s25 = sshll.u32 (%p1211_p9), %s210_s28, 7 }
  0x2e   : > { %s215_s11 = sadd.s32 (%p1211_p9), %s1103_s21, %s883_s7  ;;  %s1249_s6 = scalar_lea.vmem (%p1211_p9), [#allocation4], %s844_s25 }
  0x2f   : > { %s847_s24 = sshll.u32 (%p1211_p9), %s215_s11, 2 }
  0x30   : > { %s1244_s26 = scalar_lea.vmem (%p1211_p9), %s1399_s1, %s847_s24 }
  0x31   : > { %v233_v2 = vld [vmem:[%s1244_s26] sm:$0xf] (%p1211_p9)  ;;  %v235_v3 = vld [vmem:[%s1244_s26 + $0x8] sm:$0xf] (%p1211_p9)  ;;  %v237_v4 = vld [vmem:[%s1244_s26 + $0x10] sm:$0xf] (%p1211_p9) }
  0x32   : > { %234 = vst [vmem:[%s1249_s6] sm:$0xf] (%p1211_p9), %v233_v2  ;;  %236 = vst [vmem:[%s1249_s6 + $0x4] sm:$0xf] (%p1211_p9), %v235_v3  ;;  %v239_v5 = vld [vmem:[%s1244_s26 + $0x18] sm:$0xf] (%p1211_p9) }
  0x33   : > { %238 = vst [vmem:[%s1249_s6 + $0x8] sm:$0xf] %v237_v4  ;;  %v241_v6 = vld [vmem:[%s1244_s26 + $0x20] sm:$0xf]  ;;  %v243_v7 = vld [vmem:[%s1244_s26 + $0x28] sm:$0xf] }
  0x34   : > { %240 = vst [vmem:[%s1249_s6 + $0xc] sm:$0xf] %v239_v5  ;;  %242 = vst [vmem:[%s1249_s6 + $0x10] sm:$0xf] %v241_v6  ;;  %v245_v8 = vld [vmem:[%s1244_s26 + $0x30] sm:$0xf] }
  0x35   : > { %244 = vst [vmem:[%s1249_s6 + $0x14] sm:$0xf] %v243_v7  ;;  %v247_v9 = vld [vmem:[%s1244_s26 + $0x38] sm:$0xf]  ;;  %v249_v10 = vld [vmem:[%s1244_s26 + $0x40] sm:$0xf] }
  0x36   : > { %246 = vst [vmem:[%s1249_s6 + $0x18] sm:$0xf] %v245_v8  ;;  %248 = vst [vmem:[%s1249_s6 + $0x1c] sm:$0xf] %v247_v9  ;;  %v251_v11 = vld [vmem:[%s1244_s26 + $0x48] sm:$0xf] }
  0x37   : > { %250 = vst [vmem:[%s1249_s6 + $0x20] sm:$0xf] %v249_v10  ;;  %v253_v12 = vld [vmem:[%s1244_s26 + $0x50] sm:$0xf]  ;;  %v255_v13 = vld [vmem:[%s1244_s26 + $0x58] sm:$0xf] }
  0x38   : > { %252 = vst [vmem:[%s1249_s6 + $0x24] sm:$0xf] %v251_v11  ;;  %254 = vst [vmem:[%s1249_s6 + $0x28] sm:$0xf] %v253_v12  ;;  %v257_v14 = vld [vmem:[%s1244_s26 + $0x60] sm:$0xf] }
  0x39   : > { %256 = vst [vmem:[%s1249_s6 + $0x2c] sm:$0xf] %v255_v13  ;;  %v259_v15 = vld [vmem:[%s1244_s26 + $0x68] sm:$0xf]  ;;  %v261_v16 = vld [vmem:[%s1244_s26 + $0x70] sm:$0xf] }
  0x3a   : > { %258 = vst [vmem:[%s1249_s6 + $0x30] sm:$0xf] %v257_v14  ;;  %260 = vst [vmem:[%s1249_s6 + $0x34] sm:$0xf] %v259_v15  ;;  %v263_v17 = vld [vmem:[%s1244_s26 + $0x78] sm:$0xf] }
  0x3b   : > { %262 = vst [vmem:[%s1249_s6 + $0x38] sm:$0xf] %v261_v16  ;;  %v265_v18 = vld [vmem:[%s1244_s26 + $0x80] sm:$0xf]  ;;  %v267_v19 = vld [vmem:[%s1244_s26 + $0x88] sm:$0xf] }
  0x3c   : > { %264 = vst [vmem:[%s1249_s6 + $0x3c] sm:$0xf] %v263_v17  ;;  %266 = vst [vmem:[%s1249_s6 + $0x40] sm:$0xf] %v265_v18  ;;  %v269_v20 = vld [vmem:[%s1244_s26 + $0x90] sm:$0xf] }
  0x3d   : > { %268 = vst [vmem:[%s1249_s6 + $0x44] sm:$0xf] %v267_v19  ;;  %v271_v21 = vld [vmem:[%s1244_s26 + $0x98] sm:$0xf]  ;;  %v273_v22 = vld [vmem:[%s1244_s26 + $0xa0] sm:$0xf] }
  0x3e   : > { %270 = vst [vmem:[%s1249_s6 + $0x48] sm:$0xf] %v269_v20  ;;  %272 = vst [vmem:[%s1249_s6 + $0x4c] sm:$0xf] %v271_v21  ;;  %v275_v23 = vld [vmem:[%s1244_s26 + $0xa8] sm:$0xf] }
  0x3f   : > { %274 = vst [vmem:[%s1249_s6 + $0x50] sm:$0xf] %v273_v22  ;;  %v277_v24 = vld [vmem:[%s1244_s26 + $0xb0] sm:$0xf]  ;;  %v279_v25 = vld [vmem:[%s1244_s26 + $0xb8] sm:$0xf] }
  0x40   : > { %276 = vst [vmem:[%s1249_s6 + $0x54] sm:$0xf] %v275_v23  ;;  %278 = vst [vmem:[%s1249_s6 + $0x58] sm:$0xf] %v277_v24  ;;  %v281_v26 = vld [vmem:[%s1244_s26 + $0xc0] sm:$0xf] }
  0x41   : > { %280 = vst [vmem:[%s1249_s6 + $0x5c] sm:$0xf] %v279_v25  ;;  %v283_v27 = vld [vmem:[%s1244_s26 + $0xc8] sm:$0xf]  ;;  %v285_v28 = vld [vmem:[%s1244_s26 + $0xd0] sm:$0xf] }
  0x42   : > { %282 = vst [vmem:[%s1249_s6 + $0x60] sm:$0xf] %v281_v26  ;;  %284 = vst [vmem:[%s1249_s6 + $0x64] sm:$0xf] %v283_v27  ;;  %v287_v29 = vld [vmem:[%s1244_s26 + $0xd8] sm:$0xf] }
  0x43   : > { %286 = vst [vmem:[%s1249_s6 + $0x68] sm:$0xf] %v285_v28  ;;  %v289_v30 = vld [vmem:[%s1244_s26 + $0xe0] sm:$0xf]  ;;  %v291_v31 = vld [vmem:[%s1244_s26 + $0xe8] sm:$0xf] }
  0x44   : > { %288 = vst [vmem:[%s1249_s6 + $0x6c] sm:$0xf] %v287_v29  ;;  %290 = vst [vmem:[%s1249_s6 + $0x70] sm:$0xf] %v289_v30  ;;  %v293_v32 = vld [vmem:[%s1244_s26 + $0xf0] sm:$0xf] }
  0x45   : > { %292 = vst [vmem:[%s1249_s6 + $0x74] sm:$0xf] %v291_v31  ;;  %v295_v33 = vld [vmem:[%s1244_s26 + $0xf8] sm:$0xf]  ;;  %294 = vst [vmem:[%s1249_s6 + $0x78] sm:$0xf] %v293_v32 }
  0x46   : > { %296 = vst [vmem:[%s1249_s6 + $0x7c] sm:$0xf] %v295_v33 }
  0x47 PF: > { %p848_p0 = scmp.ge.s32.totalorder %s1107_s22, 1  ;;  %p389_p1 = scmp.lt.s32.totalorder %s1107_s22, 27 }
  0x49   : > { %p390_p2 = pnand %p848_p0, %p389_p1 }
  0x4a   : > { %s396_s24 = sand.u32 (!%p390_p2), 1, %s1083_s16   ;;  %s403_s25 = sand.u32 (!%p390_p2), 1, %s1075_s14  }
  0x4b   : > { %393 = sbr.rel (%p390_p2) target bundleno = 369 (0x171), region = 103  ;;  %s1316_s30 = sshll.u32 (!%p390_p2), %s396_s24, 4 }
  0x4c   : > { %s850_s27 = sshll.u32 (!%p390_p2), %s403_s25, 7  ;;  %s430_s4 = sand.u32 (!%p390_p2), 1, %s1067_s12  }
  0x4d   : > { %p436_p3 = scmp.lt.s32.totalorder (!%p390_p2), %s1095_s19, 1  ;;  %s851_s5 = sshll.u32 (!%p390_p2), %s430_s4, 3 }
  0x4e   : > { %s398_s26 = scalar_lea.vmem (!%p390_p2), [#allocation3], %s1316_s30  ;;  %s1327_s6 = scalar_lea.vmem (!%p390_p2), [#allocation4], %s850_s27 }
  0x4f   : > { %s1329_s0 = scalar_lea.vmem (!%p390_p2), [#allocation5], %s851_s5  ;;  %p853_p4 = scmp.ne.s32.totalorder (!%p390_p2), %s1091_s18, 0 }
  0x52   : > { %s437_s23 = scalar_select %p436_p3, %s1095_s19, 1 }
  0x53   : > { %445 = sbr.rel (%p853_p4) target bundleno = 90 (0x5a), region = 115  ;;  %v1109_v34 = vmov (!%p853_p4), 0.0  }
  0x54   : > { %s852_s28 = sshll.u32 %s437_s23, 2  ;;  %446 = vst [vmem:[#allocation2] sm:$0xff] (!%p853_p4), %v1109_v34  ;;  %447 = vst [vmem:[#allocation2 + $0x8] sm:$0xff] (!%p853_p4), %v1109_v34 }
  0x55   : > { %s1324_s29 = scalar_lea.vmem %s1400_s2, %s852_s28 }
  0x5a PF: > { %v1002_v35 = vld [vmem:[%s1327_s6 + $0x40] sm:$0xff]   ;;  %v1004_v37 = vld [vmem:[%s1327_s6 + $0x48] sm:$0xff]   ;;  %v1006_v39 = vld [vmem:[%s1327_s6 + $0x50] sm:$0xff]   ;;  %p872_p5 = scmp.ne.s32.totalorder %s1091_s18, 12 }
  0x5b   : > { %v1003_v36 = vld [vmem:[%s1327_s6] sm:$0xff]   ;;  %891 = vmatprep.subr.bf16.mxu0 %v1002_v35  ;;  %v1005_v38 = vld [vmem:[%s1327_s6 + $0x8] sm:$0xff]   ;;  %v1007_v40 = vld [vmem:[%s1327_s6 + $0x10] sm:$0xff]  }
  0x5c   : > { %892 = vmatpush3.bf16.msra.mxu0 %v1003_v36  ;;  %v1008_v41 = vld [vmem:[%s1327_s6 + $0x58] sm:$0xff]   ;;  %v1010_v43 = vld [vmem:[%s1327_s6 + $0x60] sm:$0xff]   ;;  %v1012_v45 = vld [vmem:[%s1327_s6 + $0x68] sm:$0xff]  }
  0x5d   : > { %893 = vmatprep.subr.bf16.mxu0 %v1004_v37  ;;  %v1009_v42 = vld [vmem:[%s1327_s6 + $0x18] sm:$0xff]   ;;  %v1011_v44 = vld [vmem:[%s1327_s6 + $0x20] sm:$0xff]   ;;  %v1013_v47 = vld [vmem:[%s1327_s6 + $0x28] sm:$0xff]  }
  0x5e   : > { %v1020_v46 = vld [vmem:[%s398_s26 + $0x4] ss:$8 sps:$4 sm:$0xff]   ;;  %v1018_v52 = vld [vmem:[%s398_s26] ss:$8 sps:$4 sm:$0xff]  }
  0x5f   : > { %622 = vmatprep.mubr.bf16.mxu0 %v1020_v46  ;;  %v1014_v48 = vld [vmem:[%s1327_s6 + $0x70] sm:$0xff]   ;;  %v1016_v50 = vld [vmem:[%s1327_s6 + $0x78] sm:$0xff]  }
  0x60   : > { %894 = vmatpush3.bf16.msra.mxu0 %v1005_v38  ;;  %v1015_v49 = vld [vmem:[%s1327_s6 + $0x30] sm:$0xff]   ;;  %v1017_v51 = vld [vmem:[%s1327_s6 + $0x38] sm:$0xff]  }
  0x61   : > { %895 = vmatprep.subr.bf16.mxu0 %v1006_v39  ;;  %v448_v54 = vld [vmem:[#allocation2] sm:$0xff]  ;;  %v449_v58 = vld [vmem:[#allocation2 + $0x8] sm:$0xff] }
  0x62   : > { %v873_v1 = vld [vmem:[%s1324_s29] ss:$0 sm:$0xff] (!%p872_p5)  ;;  %v874_v4 = vld [vmem:[%s1324_s29 + $0x1] ss:$0 sm:$0xff] (!%p872_p5)  ;;  %v875_v7 = vld [vmem:[%s1324_s29 + $0x2] ss:$0 sm:$0xff] (!%p872_p5) }
  0x64   : > { %896 = vmatpush3.bf16.msra.mxu0 %v1007_v40 }
  0x65   : > { %897 = vmatprep.subr.bf16.mxu0 %v1008_v41 }
  0x68   : > { %898 = vmatpush3.bf16.msra.mxu0 %v1009_v42 }
  0x69   : > { %899 = vmatprep.subr.bf16.mxu0 %v1010_v43 }
  0x6c   : > { %900 = vmatpush3.bf16.msra.mxu0 %v1011_v44 }
  0x6d   : > { %901 = vmatprep.subr.bf16.mxu0 %v1012_v45 }
  0x70   : > { %902 = vmatpush3.bf16.msra.mxu0 %v1013_v47 }
  0x71   : > { %903 = vmatprep.subr.bf16.mxu0 %v1014_v48 }
  0x74   : > { %904 = vmatpush3.bf16.msra.mxu0 %v1015_v49 }
  0x75   : > { %905 = vmatprep.subr.bf16.mxu0 %v1016_v50 }
  0x78   : > { %906 = vmatpush3.bf16.msra.mxu0 %v1017_v51 }
  0x7b   : > { %623 = vmatmul.mubr.bf16.vlgmr.msra.gmra.mrb[0].mxu0 %v1018_v52 }
 0x14e   : > { %v907_v53 = vpop.f32.mrb[0].mxu0 }
 0x14f   : > { %v908_v55 = vpop.f32.mrb[1].mxu0 }
 0x150   : > { %v909_v56 = vadd.f32 %v908_v55, %v907_v53  ;;  %v910_v57 = vpop.f32.mrb[2].mxu0  ;;  %638 = sbr.rel (%p872_p5) target bundleno = 361 (0x169), region = 119 }
 0x151   : > { %v911_v59 = vpop.f32.mrb[3].mxu0 }
 0x152   : > { %v631_v60 = vadd.f32 %v909_v56, %v448_v54  ;;  %v912_v61 = vadd.f32 %v911_v59, %v910_v57 }
 0x154   : > { %633 = vst [vmem:[#allocation2] sm:$0xff] %v631_v60  ;;  %v632_v62 = vadd.f32 %v912_v61, %v449_v58 }
 0x156   : > { %634 = vst [vmem:[#allocation2 + $0x8] sm:$0xff] %v632_v62 }
 0x15b   : > { %v639_v63 = vld [vmem:[#allocation2] sm:$0xff] }
 0x15c   : > { %v646_v2 = vadd.f32 %v873_v1, %v639_v63 }
 0x15d   : > { %v640_v0 = vld [vmem:[#allocation2 + $0x8] sm:$0xff] }
 0x15e   : > { %v647_v3 = vadd.f32 %v873_v1, %v640_v0  ;;  %v648_v5 = vmax.f32 %v646_v2, 0.0 }
 0x160   : > { %v649_v6 = vmax.f32 %v647_v3, 0.0  ;;  %v655_v8 = vmul.f32 %v874_v4, %v648_v5 }
 0x162   : > { %v656_v9 = vmul.f32 %v874_v4, %v649_v6  ;;  %v662_v10 = vadd.f32 %v875_v7, %v655_v8 }
 0x164   : > { %v663_v11 = vadd.f32 %v875_v7, %v656_v9 }
 0x166   : > { %v889_v12 = vpack.c.bf16 %v663_v11, %v662_v10 }
 0x168   : > { %890 = vst [vmem:[%s1329_s0] sm:$0xff] %v889_v12  }
 0x169 PF: > { %680 = sbr.rel (!%p1224_p12) target bundleno = 369 (0x171), region = 123  ;;  %s879_s12 = sshll.u32 (%p1224_p12), %s1095_s19, 2 }
 0x16a   : > { %s685_s18 = scalar_lea.vmem (%p1224_p12), %s1401_s3, %s879_s12 }
 0x16f   : > { %v701_v13 = vld [vmem:[%s1329_s0] sm:$0xf] (%p1224_p12)  ;;  %v703_v14 = vld [vmem:[%s1329_s0 + $0x4] sm:$0xf] (%p1224_p12) }
 0x170   : > { %702 = vst [vmem:[%s685_s18] sm:$0xf] %v701_v13  ;;  %704 = vst [vmem:[%s685_s18 + $0x8] sm:$0xf] %v703_v14 }
 0x171 PF: > { %s13_s22 = sadd.s32 1, %s1107_s22   ;;  %s1412_s10 = sld [smem:[#allocation8_spill]] }
 0x172   : > { %p10_p6 = scmp.ge.s32.totalorder %s13_s22, 28   ;;  %s1413_s0 = sld [smem:[#allocation6_spill]] }
 0x173   : > { %s1414_s24 = sld [smem:[#allocation7_spill]]  ;;  %s1415_s12 = smov %s1071_s13 }
 0x174   : > { %s1416_s13 = smov %s1222_s9  ;;  %s1417_s14 = smov %s1079_s15 }
 0x175   : > { %s1418_s15 = smov %s1219_s8  ;;  %s1419_s16 = smov %s1087_s17 }
 0x176   : > { %s1421_s18 = smov %s1099_s20  ;;  %s1422_s19 = smov %s1103_s21 }
 0x177   : > { %s1420_s17 = smov %s1412_s10  ;;  %12 = sbr.rel (!%p10_p6) target bundleno = 8 (0x8), region = 206 }
 0x178   : > { %s1423_s20 = smov %s1413_s0 }
 0x179   : > { %s1424_s21 = smov %s1414_s24 }

// kernel: conv_cfc_forward.9
= control target key start
LH: loop header
LB: loop body
LE: loop exit
PB: predicated region body
PF: predicated region fallthrough
CT: control target
= control target key end

     0   :  { %v3167_v2 = vmov 0.0   ;;  %vm3168_vm0 = vmmov 0   ;;  %v97_v13 = vlaneseq  ;;  %v3169_v24 = vmov 1966171168   ;;  %s3908_s0 = inlined_call_operand.vmem [shape: bf16[8,2,256], index: 0, kind: input, shape index: {}]   ;;  %s3909_s1 = inlined_call_operand.vmem [shape: f32[2,64], index: 1, kind: input, shape index: {}]   ;;  %s3910_s2 = inlined_call_operand.vmem [shape: bf16[256,128], index: 2, kind: input, shape index: {}]   ;;  %s3911_s3 = inlined_call_operand.vmem [shape: bf16[64,128], index: 3, kind: input, shape index: {}]   ;;  %s3912_s4 = inlined_call_operand.vmem [shape: f32[1,128], index: 4, kind: input, shape index: {}]   ;;  %s3913_s5 = inlined_call_operand.vmem [shape: bf16[128,192], index: 5, kind: input, shape index: {}]   ;;  %s3914_s6 = inlined_call_operand.vmem [shape: f32[1,192], index: 6, kind: input, shape index: {}]   ;;  %s3915_s7 = inlined_call_operand.vmem [shape: bf16[64,128], index: 7, kind: input, shape index: {}]   ;;  %s3916_s8 = inlined_call_operand.vmem [shape: f32[1,1,128], index: 8, kind: input, shape index: {}]   ;;  %s3917_s9 = inlined_call_operand.vmem [shape: f32[8,2,128], index: 9, kind: output, shape index: {0}]   ;;  %s3918_s10 = inlined_call_operand.hbm [shape: f32[2,64], index: 10, kind: output, shape index: {1}]  }
   0x1   :  { %v2979_v0 = vld [vmem:[%s3910_s2 + $0x40] sm:$0xff]   ;;  %2864 = vmatprep.subr.bf16.mxu1 %v3167_v2  ;;  %v2981_v3 = vld [vmem:[%s3910_s2 + $0x48] sm:$0xff]   ;;  %2872 = vmatprep.mubr.msk.bf16.mxu1 %vm3168_vm0, %v3167_v2  ;;  %v2983_v5 = vld [vmem:[%s3910_s2 + $0x50] sm:$0xff]   ;;  %v95_v25 = vunpack.c.l.s4 %v3169_v24  ;;  %vm392_vm1 = vcmask 523264  }
   0x2   :  { %v2980_v1 = vld [vmem:[%s3910_s2] sm:$0xff]   ;;  %2797 = vmatprep.subr.bf16.mxu0 %v2979_v0  ;;  %v2982_v4 = vld [vmem:[%s3910_s2 + $0x8] sm:$0xff]   ;;  %v2984_v6 = vld [vmem:[%s3910_s2 + $0x10] sm:$0xff]   ;;  %v3299_v26 = vshrl.u32 %v97_v13, 7 }
   0x3   :  { %2798 = vmatpush3.bf16.msra.mxu0 %v2980_v1  ;;  %v2985_v7 = vld [vmem:[%s3910_s2 + $0x58] sm:$0xff]   ;;  %v2987_v9 = vld [vmem:[%s3910_s2 + $0x60] sm:$0xff]   ;;  %v2989_v12 = vld [vmem:[%s3910_s2 + $0x68] sm:$0xff]   ;;  %v96_v33 = vunpack.c.0.s8 %v95_v25 }
   0x4   :  { %2799 = vmatprep.subr.bf16.mxu0 %v2981_v3  ;;  %v2986_v8 = vld [vmem:[%s3910_s2 + $0x18] sm:$0xff]   ;;  %v2993_v10 = vld [vmem:[%s3911_s3] sm:$0xff]   ;;  %v2990_v14 = vld [vmem:[%s3910_s2 + $0x28] sm:$0xff]  }
   0x5   :  { %v2988_v11 = vld [vmem:[%s3910_s2 + $0x20] sm:$0xff]   ;;  %2865 = vmatpush3.bf16.msra.mxu1 %v2993_v10  ;;  %v2991_v18 = vld [vmem:[%s3910_s2 + $0x70] sm:$0xff]   ;;  %v40_v20 = vld [vmem:[%s3908_s0 + $0x8] sm:$0x3]  ;;  %v3315_v36 = vsub.s32 %v96_v33, %v3299_v26 }
   0x6   :  { %2866 = vmatprep.subr.bf16.mxu1 %v3167_v2  ;;  %v36_v15 = vld [vmem:[%s3908_s0] sm:$0x3]  ;;  %v37_v16 = vld [vmem:[%s3908_s0 + $0x2] sm:$0x3]  ;;  %v38_v17 = vld [vmem:[%s3908_s0 + $0x4] sm:$0x3] }
   0x7   :  { %2800 = vmatpush3.bf16.msra.mxu0 %v2982_v4  ;;  %v39_v19 = vld [vmem:[%s3908_s0 + $0x6] sm:$0x3]  ;;  %v41_v21 = vld [vmem:[%s3908_s0 + $0xa] sm:$0x3]  ;;  %v42_v22 = vld [vmem:[%s3908_s0 + $0xc] sm:$0x3]  ;;  %v90_v29 = vcombine.low %v36_v15, %v37_v16 }
   0x8   :  { %2801 = vmatprep.subr.bf16.mxu0 %v2983_v5  ;;  %v43_v23 = vld [vmem:[%s3908_s0 + $0xe] sm:$0x3]  ;;  %v2992_v28 = vld [vmem:[%s3910_s2 + $0x30] sm:$0xff]   ;;  %v91_v30 = vcombine.low %v38_v17, %v39_v19  ;;  %v92_v31 = vcombine.low %v40_v20, %v41_v21  ;;  %v2994_v35 = vld [vmem:[%s3910_s2 + $0x78] sm:$0xff]  }
   0x9   :  { %v2996_v27 = vld [vmem:[%s3911_s3 + $0x8] sm:$0xff]   ;;  %v93_v32 = vcombine.low %v42_v22, %v43_v23  ;;  %v2997_v34 = vld [vmem:[%s3911_s3 + $0x10] sm:$0xff]   ;;  %v2998_v37 = vld [vmem:[%s3911_s3 + $0x18] sm:$0xff]   ;;  %v100_v40 = vrot.slane %v90_v29, %v3315_v36 }
   0xa   :  { %2867 = vmatpush3.bf16.msra.mxu1 %v2996_v27  ;;  %v357_v38 = vld [vmem:[%s3909_s1] sm:$0x3]  ;;  %v2995_v39 = vld [vmem:[%s3910_s2 + $0x38] sm:$0xff]   ;;  %v107_v41 = vrot.slane %v91_v30, %v3315_v36  ;;  %v114_v42 = vrot.slane %v92_v31, %v3315_v36 }
   0xb   :  { %2802 = vmatpush3.bf16.msra.mxu0 %v2984_v6  ;;  %2868 = vmatprep.subr.bf16.mxu1 %v3167_v2  ;;  %v121_v43 = vrot.slane %v93_v32, %v3315_v36  ;;  %v359_v48 = vpack.c.bf16 %v357_v38, %v357_v38 }
   0xc   :  { %2803 = vmatprep.subr.bf16.mxu0 %v2985_v7  ;;  %v123_v44 = vcombine.high %v100_v40, %v107_v41  ;;  %v122_v46 = vcombine.low %v100_v40, %v107_v41 }
   0xd   :  { %v125_v45 = vcombine.high %v114_v42, %v121_v43  ;;  %v124_v47 = vcombine.low %v114_v42, %v121_v43 }
   0xe   :  { %2869 = vmatpush3.bf16.msra.mxu1 %v2997_v34  ;;  %v139_v49 = vrot.slane %v123_v44, %v3315_v36  ;;  %v132_v51 = vrot.slane %v122_v46, %v3315_v36 }
   0xf   :  { %2804 = vmatpush3.bf16.msra.mxu0 %v2986_v8  ;;  %2870 = vmatprep.subr.bf16.mxu1 %v3167_v2  ;;  %v153_v50 = vrot.slane %v125_v45, %v3315_v36  ;;  %v146_v52 = vrot.slane %v124_v47, %v3315_v36 }
  0x10   :  { %2805 = vmatprep.subr.bf16.mxu0 %v2987_v9 }
  0x11   :  { %v155_v53 = vcombine.low %v139_v49, %v153_v50  ;;  %v154_v54 = vcombine.low %v132_v51, %v146_v52 }
  0x12   :  { %2871 = vmatpush3.bf16.msra.mxu1 %v2998_v37 }
  0x13   :  { %2806 = vmatpush3.bf16.msra.mxu0 %v2988_v11  ;;  %296 = vmatprep.mubr.bf16.mxu0 %v155_v53 }
  0x14   :  { %2807 = vmatprep.subr.bf16.mxu0 %v2989_v12 }
  0x15   :  { %2873 = vmatmul.mubr.msk.bf16.vlgmr.msra.gmra.mrb[0].mxu1 %vm392_vm1, %v359_v48 }
  0x17   :  { %2808 = vmatpush3.bf16.msra.mxu0 %v2990_v14 }
  0x18   :  { %2809 = vmatprep.subr.bf16.mxu0 %v2991_v18 }
  0x1b   :  { %2810 = vmatpush3.bf16.msra.mxu0 %v2992_v28 }
  0x1c   :  { %2811 = vmatprep.subr.bf16.mxu0 %v2994_v35 }
  0x1f   :  { %2812 = vmatpush3.bf16.msra.mxu0 %v2995_v39 }
  0x20   :  { %2876 = vmatprep.subr.bf16.mxu0 %v3167_v2 }
  0x22   :  { %297 = vmatmul.mubr.bf16.vlgmr.msra.gmra.mrb[0].mxu0 %v154_v54 }
  0x23   :  { %2884 = vmatprep.mubr.msk.bf16.mxu0 %vm3168_vm0, %v3167_v2 }
  0x24   :  { %16 = vsyncpa [#allocation5], 0  ;;  %v3342_v55 = vld [vmem:[%s3913_s5 + $0x4] ss:$8 sps:$4 sm:$0xff]   ;;  %v3347_v56 = vld [vmem:[%s3913_s5] ss:$8 sps:$4 sm:$0xff]  }
  0x25   :  { %549 = vmatprep.subr.bf16.mxu1 %v3342_v55  ;;  %v3354_v57 = vld [vmem:[%s3913_s5 + $0x14] ss:$8 sps:$4 sm:$0xff]   ;;  %v3359_v58 = vld [vmem:[%s3913_s5 + $0x10] ss:$8 sps:$4 sm:$0xff]   ;;  %v3366_v59 = vld [vmem:[%s3913_s5 + $0x24] ss:$8 sps:$4 sm:$0xff]  }
  0x26   :  { %550 = vmatpush1.bf16.msra.mxu1 %v3347_v56  ;;  %v3371_v60 = vld [vmem:[%s3913_s5 + $0x20] ss:$8 sps:$4 sm:$0xff]   ;;  %v3378_v61 = vld [vmem:[%s3913_s5 + $0x34] ss:$8 sps:$4 sm:$0xff]   ;;  %v3383_v62 = vld [vmem:[%s3913_s5 + $0x30] ss:$8 sps:$4 sm:$0xff]  }
  0x27   :  { %551 = vmatprep.subr.bf16.mxu1 %v3354_v57  ;;  %v3390_v63 = vld [vmem:[%s3913_s5 + $0x44] ss:$8 sps:$4 sm:$0xff]   ;;  %v3395_v0 = vld [vmem:[%s3913_s5 + $0x40] ss:$8 sps:$4 sm:$0xff]   ;;  %v3402_v1 = vld [vmem:[%s3913_s5 + $0x54] ss:$8 sps:$4 sm:$0xff]  }
  0x28   :  { %v3407_v3 = vld [vmem:[%s3913_s5 + $0x50] ss:$8 sps:$4 sm:$0xff]   ;;  %v3414_v4 = vld [vmem:[%s3913_s5 + $0x64] ss:$8 sps:$4 sm:$0xff]   ;;  %v3419_v5 = vld [vmem:[%s3913_s5 + $0x60] ss:$8 sps:$4 sm:$0xff]  }
  0x29   :  { %v3426_v6 = vld [vmem:[%s3913_s5 + $0x74] ss:$8 sps:$4 sm:$0xff]   ;;  %v3431_v7 = vld [vmem:[%s3913_s5 + $0x70] ss:$8 sps:$4 sm:$0xff]   ;;  %v3170_v8 = vmov 0   ;;  %v3023_v47 = vld [vmem:[%s3911_s3] sm:$0xff]  }
  0x2a   :  { %552 = vmatpush1.bf16.msra.mxu1 %v3359_v58  ;;  %581 = vmatprep.mubr.bf16.mxu1 %v3170_v8  ;;  %v3171_v9 = vmov 1983009808   ;;  %v2586_v12 = vld [vmem:[%s3912_s4] ss:$0 sm:$0xff]  ;;  %v3024_v48 = vld [vmem:[%s3911_s3 + $0x8] sm:$0xff]   ;;  %v3025_v49 = vld [vmem:[%s3911_s3 + $0x10] sm:$0xff]  }
  0x2b   :  { %553 = vmatprep.subr.bf16.mxu1 %v3366_v59  ;;  %v256_v10 = vunpack.c.l.s4 %v3171_v9  ;;  %v254_v13 = vcombine.low %v2586_v12, %v2586_v12  ;;  %2877 = vmatpush3.bf16.msra.mxu0 %v3023_v47  ;;  %v3463_v50 = vsub.s32 0, %v3299_v26  ;;  %v457_v51 = vld [vmem:[%s3914_s6] sm:$0x3]  ;;  %v3469_v52 = vsub.s32 1, %v3299_v26  ;;  %s3172_s27 = smov 64  }
  0x2c   :  { %2878 = vmatprep.subr.bf16.mxu0 %v3167_v2  ;;  %vm605_vm2 = vcmask 517120  }
  0x2d   :  { %v257_v11 = vunpack.c.0.s8 %v256_v10  ;;  %v462_v53 = vrot.slane %v457_v51, %v3463_v50  ;;  %v466_v54 = vrot.slane %v457_v51, %v3469_v52  ;;  %v3030_v51 = vld [vmem:[%s3911_s3 + $0x18] sm:$0xff]  }
  0x2e   :  { %554 = vmatpush1.bf16.msra.mxu1 %v3371_v60 }
  0x2f   :  { %555 = vmatprep.subr.bf16.mxu1 %v3378_v61  ;;  %v3441_v14 = vsub.s32 %v257_v11, %v3299_v26  ;;  %2879 = vmatpush3.bf16.msra.mxu0 %v3024_v48 }
  0x30   :  { %2880 = vmatprep.subr.bf16.mxu0 %v3167_v2 }
  0x31   :  { %v261_v15 = vrot.slane %v254_v13, %v3441_v14 }
  0x32   :  { %556 = vmatpush1.bf16.msra.mxu1 %v3383_v62 }
  0x33   :  { %557 = vmatprep.subr.bf16.mxu1 %v3390_v63  ;;  %v262_v19 = vcombine.low %v261_v15, %v261_v15  ;;  %2881 = vmatpush3.bf16.msra.mxu0 %v3025_v49  ;;  %v3026_v15 = vld [vmem:[%s3911_s3 + $0x18] sm:$0xff]  }
  0x34   :  { %2882 = vmatprep.subr.bf16.mxu0 %v3167_v2 }
  0x36   :  { %558 = vmatpush1.bf16.msra.mxu1 %v3395_v0 }
  0x37   :  { %559 = vmatprep.subr.bf16.mxu1 %v3402_v1  ;;  %2883 = vmatpush3.bf16.msra.mxu0 %v3026_v15 }
  0x38   :  { %798 = vmatprep.subr.bf16.mxu0 %v3342_v55 }
  0x3a   :  { %560 = vmatpush1.bf16.msra.mxu1 %v3407_v3 }
  0x3b   :  { %561 = vmatprep.subr.bf16.mxu1 %v3414_v4 }
  0x3e   :  { %562 = vmatpush1.bf16.msra.mxu1 %v3419_v5 }
  0x3f   :  { %563 = vmatprep.subr.bf16.mxu1 %v3426_v6 }
  0x42   :  { %564 = vmatpush1.bf16.msra.mxu1 %v3431_v7 }
  0x43   :  { %2888 = vmatprep.subr.bf16.mxu1 %v3167_v2 }
  0xe8   :  { %v430_v16 = vpop.f32.mrb[0].mxu1 }
  0xe9   :  { %v2874_v17 = vpop.f32.mrb[1].mxu1 }
  0xea   :  { %v433_v20 = vpop.f32.mrb[2].mxu1 }
  0xeb   :  { %v2875_v22 = vpop.f32.mrb[3].mxu1 }
  0xf5   :  { %v2813_v18 = vpop.f32.mrb[0].mxu0 }
  0xf6   :  { %v2814_v21 = vpop.f32.mrb[1].mxu0 }
  0xf7   :  { %v2815_v23 = vadd.f32 %v2814_v21, %v2813_v18  ;;  %v2816_v24 = vpop.f32.mrb[2].mxu0 }
  0xf8   :  { %v2817_v25 = vpop.f32.mrb[3].mxu0 }
  0xf9   :  { %v299_v27 = vadd.f32 %v2815_v23, %v262_v19  ;;  %v2818_v28 = vadd.f32 %v2817_v25, %v2816_v24 }
  0xfb   :  { %v307_v29 = vcombine.high %v299_v27, %v299_v27  ;;  %v314_v30 = vrot.slane %v299_v27, %v3441_v14  ;;  %2603 = vst.sshfl [vmem:[#allocation2] sm:$0x3 pattern:$0x76325410] %v299_v27  ;;  %v302_v31 = vadd.f32 %v2818_v28, %v262_v19 }
  0xfd   :  { %v321_v32 = vrot.slane %v307_v29, %v3441_v14  ;;  %v322_v33 = vcombine.high %v314_v30, %v314_v30  ;;  %2604 = vst.sshfl [vmem:[#allocation2 + $0x4] sm:$0x3 pattern:$0x76325410] %v307_v29  ;;  %v324_v34 = vcombine.high %v302_v31, %v302_v31  ;;  %v331_v35 = vrot.slane %v302_v31, %v3441_v14 }
  0xfe   :  { %2605 = vst.sshfl [vmem:[#allocation2 + $0x8] sm:$0x3 pattern:$0x76325410] %v302_v31 }
  0xff   :  { %v323_v37 = vcombine.high %v321_v32, %v321_v32  ;;  %350 = vst [vmem:[#allocation2 + $0x2] sm:$0x3] %v322_v33  ;;  %v338_v38 = vrot.slane %v324_v34, %v3441_v14  ;;  %v339_v39 = vcombine.high %v331_v35, %v331_v35  ;;  %2606 = vst.sshfl [vmem:[#allocation2 + $0xc] sm:$0x3 pattern:$0x76325410] %v324_v34 }
 0x101   :  { %352 = vst [vmem:[#allocation2 + $0x6] sm:$0x3] %v323_v37  ;;  %v340_v40 = vcombine.high %v338_v38, %v338_v38  ;;  %354 = vst [vmem:[#allocation2 + $0xa] sm:$0x3] %v339_v39  ;;  %v3027_v39 = vld [vmem:[%s3911_s3] sm:$0xff]  }
 0x102   :  { %v358_v41 = vld [vmem:[#allocation2] sm:$0x3] }
 0x103   :  { %356 = vst [vmem:[#allocation2 + $0xe] sm:$0x3] %v340_v40  ;;  %v436_v42 = vadd.f32 %v430_v16, %v358_v41  ;;  %v3028_v40 = vld [vmem:[%s3911_s3 + $0x8] sm:$0xff]   ;;  %v3029_v41 = vld [vmem:[%s3911_s3 + $0x10] sm:$0xff]  }
 0x105   :  { %v437_v43 = vmul.f32 0.666, %v436_v42  ;;  %v706_v42 = vld [vmem:[%s3914_s6] sm:$0x3] }
 0x106   :  { %v608_v28 = vld [vmem:[#allocation2 + $0x2] sm:$0x3] }
 0x107   :  { %3079 = vtanh.f32 %v437_v43  ;;  %v711_v43 = vrot.slane %v706_v42, %v3463_v50 }
 0x111   :  { %v3080_v44 = vpop.eup %3079 }
 0x112   :  { %v439_v45 = vmul.f32 1.7159, %v3080_v44  ;;  %v715_v44 = vrot.slane %v706_v42, %v3469_v52  ;;  %v3034_v42 = vld [vmem:[%s3911_s3 + $0x18] sm:$0xff]  }
 0x114   :  { %v440_v46 = vpack.c.bf16 %v439_v45, %v439_v45 }
 0x116   :  { %582 = vmatmul.mubr.bf16.vlgmr.msra.gmra.mrb[4].mxu1 %v440_v46 }
 0x117   :  { %2896 = vmatprep.mubr.msk.bf16.mxu1 %vm3168_vm0, %v3167_v2  ;;  %2889 = vmatpush3.bf16.msra.mxu1 %v3027_v39 }
 0x118   :  { %2890 = vmatprep.subr.bf16.mxu1 %v3167_v2 }
 0x11b   :  { %2891 = vmatpush3.bf16.msra.mxu1 %v3028_v40 }
 0x11c   :  { %2892 = vmatprep.subr.bf16.mxu1 %v3167_v2 }
 0x11f   :  { %2893 = vmatpush3.bf16.msra.mxu1 %v3029_v41 }
 0x120   :  { %2894 = vmatprep.subr.bf16.mxu1 %v3167_v2 }
 0x123   :  { %2895 = vmatpush3.bf16.msra.mxu1 %v3030_v51 }
 0x124   :  { %1047 = vmatprep.subr.bf16.mxu1 %v3342_v55 }
 0x1e9   :  { %v583_v9 = vpop.f32.mrb[4].mxu1 }
 0x1ea   :  { %v584_v10 = vadd.f32 %v583_v9, %v462_v53  ;;  %v585_v11 = vpop.f32.mrb[5].mxu1 }
 0x1eb   :  { %v586_v12 = vadd.f32 %v585_v11, %v466_v54  ;;  %v587_v13 = vpop.f32.mrb[6].mxu1 }
 0x1ec   :  { %3081 = vtanh.f32 %v584_v10  ;;  %v588_v16 = vpop.f32.mrb[7].mxu1 }
 0x1ed   :  { %v2628_v17 = vmul.f32 -1.442695, %v586_v12 }
 0x1ef   :  { %3083 = vpow2.f32 %v2628_v17 }
 0x1f6   :  { %v3082_v26 = vpop.eup %3081 }
 0x1f7   :  { %600 = vrot.lane.b32.xlu0 %v3082_v26, %s3172_s27 }
 0x1f9   :  { %v3084_v18 = vpop.eup %3083 }
 0x1fa   :  { %v594_v19 = vadd.f32 1.0, %v3084_v18 }
 0x1fc   :  { %3085 = vrcp.f32 %v594_v19  ;;  %v857_v19 = vld [vmem:[#allocation2 + $0x4] sm:$0x3] }
 0x206   :  { %v3086_v20 = vpop.eup %3085 }
 0x207   :  { %v597_v21 = vsub.f32 1.0, %v3086_v20 }
 0x209   :  { %v598_v22 = vmul.f32 %v3082_v26, %v597_v21 }
 0x269   :  { %v601_v23 = vpop.permute.xlu0 %600 }
 0x26a   :  { %v603_v24 = vmul.f32 %v3086_v20, %v601_v23 }
 0x26c   :  { %v604_v25 = vadd.f32 %v603_v24, %v598_v22 }
 0x26e   :  { %606 = vst.msk [vmem:[#allocation3] sm:$0x3] %vm605_vm2, %v604_v25  ;;  %v609_v27 = vpack.c.bf16 %v604_v25, %v604_v25 }
 0x270   :  { %2885 = vmatmul.mubr.msk.bf16.vlgmr.msra.gmra.mrb[4].mxu0 %vm392_vm1, %v609_v27 }
 0x271   :  { %799 = vmatpush1.bf16.msra.mxu0 %v3347_v56  ;;  %830 = vmatprep.mubr.bf16.mxu0 %v3170_v8 }
 0x272   :  { %800 = vmatprep.subr.bf16.mxu0 %v3354_v57 }
 0x275   :  { %801 = vmatpush1.bf16.msra.mxu0 %v3359_v58 }
 0x276   :  { %802 = vmatprep.subr.bf16.mxu0 %v3366_v59 }
 0x279   :  { %803 = vmatpush1.bf16.msra.mxu0 %v3371_v60 }
 0x27a   :  { %804 = vmatprep.subr.bf16.mxu0 %v3378_v61 }
 0x27d   :  { %805 = vmatpush1.bf16.msra.mxu0 %v3383_v62 }
 0x27e   :  { %806 = vmatprep.subr.bf16.mxu0 %v3390_v63 }
 0x281   :  { %807 = vmatpush1.bf16.msra.mxu0 %v3395_v0 }
 0x282   :  { %808 = vmatprep.subr.bf16.mxu0 %v3402_v1 }
 0x285   :  { %809 = vmatpush1.bf16.msra.mxu0 %v3407_v3 }
 0x286   :  { %810 = vmatprep.subr.bf16.mxu0 %v3414_v4 }
 0x289   :  { %811 = vmatpush1.bf16.msra.mxu0 %v3419_v5 }
 0x28a   :  { %812 = vmatprep.subr.bf16.mxu0 %v3426_v6 }
 0x28d   :  { %813 = vmatpush1.bf16.msra.mxu0 %v3431_v7 }
 0x28e   :  { %2900 = vmatprep.subr.bf16.mxu0 %v3167_v2 }
 0x343   :  { %v679_v29 = vpop.f32.mrb[4].mxu0 }
 0x344   :  { %v685_v30 = vadd.f32 %v679_v29, %v608_v28  ;;  %v2886_v31 = vpop.f32.mrb[5].mxu0 }
 0x345   :  { %v682_v32 = vpop.f32.mrb[6].mxu0  ;;  %v3032_v31 = vld [vmem:[%s3911_s3 + $0x8] sm:$0xff]  }
 0x346   :  { %v686_v33 = vmul.f32 0.666, %v685_v30  ;;  %v2887_v34 = vpop.f32.mrb[7].mxu0  ;;  %v3031_v30 = vld [vmem:[%s3911_s3] sm:$0xff]   ;;  %v3033_v32 = vld [vmem:[%s3911_s3 + $0x10] sm:$0xff]  }
 0x348   :  { %3087 = vtanh.f32 %v686_v33  ;;  %v955_v33 = vld [vmem:[%s3914_s6] sm:$0x3] }
 0x349   :  { %v960_v34 = vrot.slane %v955_v33, %v3463_v50 }
 0x352   :  { %v3088_v35 = vpop.eup %3087 }
 0x353   :  { %v688_v37 = vmul.f32 1.7159, %v3088_v35  ;;  %v964_v35 = vrot.slane %v955_v33, %v3469_v52  ;;  %v3038_v33 = vld [vmem:[%s3911_s3 + $0x18] sm:$0xff]  }
 0x355   :  { %v689_v38 = vpack.c.bf16 %v688_v37, %v688_v37 }
 0x357   :  { %831 = vmatmul.mubr.bf16.vlgmr.msra.gmra.mrb[8].mxu0 %v689_v38 }
 0x358   :  { %2908 = vmatprep.mubr.msk.bf16.mxu0 %vm3168_vm0, %v3167_v2  ;;  %2901 = vmatpush3.bf16.msra.mxu0 %v3031_v30 }
 0x359   :  { %2902 = vmatprep.subr.bf16.mxu0 %v3167_v2 }
 0x35c   :  { %2903 = vmatpush3.bf16.msra.mxu0 %v3032_v31 }
 0x35d   :  { %2904 = vmatprep.subr.bf16.mxu0 %v3167_v2 }
 0x360   :  { %2905 = vmatpush3.bf16.msra.mxu0 %v3033_v32 }
 0x361   :  { %2906 = vmatprep.subr.bf16.mxu0 %v3167_v2 }
 0x364   :  { %2907 = vmatpush3.bf16.msra.mxu0 %v3034_v42 }
 0x365   :  { %1296 = vmatprep.subr.bf16.mxu0 %v3342_v55 }
 0x42a   :  { %v832_v45 = vpop.f32.mrb[8].mxu0 }
 0x42b   :  { %v833_v46 = vadd.f32 %v832_v45, %v711_v43  ;;  %v834_v47 = vpop.f32.mrb[9].mxu0 }
 0x42c   :  { %v835_v48 = vadd.f32 %v834_v47, %v715_v44  ;;  %v836_v49 = vpop.f32.mrb[10].mxu0 }
 0x42d   :  { %3089 = vtanh.f32 %v833_v46  ;;  %v837_v53 = vpop.f32.mrb[11].mxu0 }
 0x42e   :  { %v2650_v54 = vmul.f32 -1.442695, %v835_v48 }
 0x430   :  { %3091 = vpow2.f32 %v2650_v54 }
 0x437   :  { %v3090_v9 = vpop.eup %3089 }
 0x438   :  { %849 = vrot.lane.b32.xlu0 %v3090_v9, %s3172_s27 }
 0x43a   :  { %v3092_v10 = vpop.eup %3091 }
 0x43b   :  { %v843_v11 = vadd.f32 1.0, %v3092_v10 }
 0x43d   :  { %3093 = vrcp.f32 %v843_v11  ;;  %v1106_v11 = vld [vmem:[#allocation2 + $0x6] sm:$0x3] }
 0x447   :  { %v3094_v12 = vpop.eup %3093 }
 0x448   :  { %v846_v13 = vsub.f32 1.0, %v3094_v12 }
 0x44a   :  { %v847_v15 = vmul.f32 %v3090_v9, %v846_v13 }
 0x4aa   :  { %v850_v16 = vpop.permute.xlu0 %849 }
 0x4ab   :  { %v852_v17 = vmul.f32 %v3094_v12, %v850_v16 }
 0x4ad   :  { %v853_v26 = vadd.f32 %v852_v17, %v847_v15 }
 0x4af   :  { %855 = vst.msk [vmem:[#allocation3 + $0x2] sm:$0x3] %vm605_vm2, %v853_v26  ;;  %v858_v18 = vpack.c.bf16 %v853_v26, %v853_v26 }
 0x4b1   :  { %2897 = vmatmul.mubr.msk.bf16.vlgmr.msra.gmra.mrb[8].mxu1 %vm392_vm1, %v858_v18 }
 0x4b2   :  { %1048 = vmatpush1.bf16.msra.mxu1 %v3347_v56  ;;  %1079 = vmatprep.mubr.bf16.mxu1 %v3170_v8 }
 0x4b3   :  { %1049 = vmatprep.subr.bf16.mxu1 %v3354_v57 }
 0x4b6   :  { %1050 = vmatpush1.bf16.msra.mxu1 %v3359_v58 }
 0x4b7   :  { %1051 = vmatprep.subr.bf16.mxu1 %v3366_v59 }
 0x4ba   :  { %1052 = vmatpush1.bf16.msra.mxu1 %v3371_v60 }
 0x4bb   :  { %1053 = vmatprep.subr.bf16.mxu1 %v3378_v61 }
 0x4be   :  { %1054 = vmatpush1.bf16.msra.mxu1 %v3383_v62 }
 0x4bf   :  { %1055 = vmatprep.subr.bf16.mxu1 %v3390_v63 }
 0x4c2   :  { %1056 = vmatpush1.bf16.msra.mxu1 %v3395_v0 }
 0x4c3   :  { %1057 = vmatprep.subr.bf16.mxu1 %v3402_v1 }
 0x4c6   :  { %1058 = vmatpush1.bf16.msra.mxu1 %v3407_v3 }
 0x4c7   :  { %1059 = vmatprep.subr.bf16.mxu1 %v3414_v4 }
 0x4ca   :  { %1060 = vmatpush1.bf16.msra.mxu1 %v3419_v5 }
 0x4cb   :  { %1061 = vmatprep.subr.bf16.mxu1 %v3426_v6 }
 0x4ce   :  { %1062 = vmatpush1.bf16.msra.mxu1 %v3431_v7 }
 0x4cf   :  { %2912 = vmatprep.subr.bf16.mxu1 %v3167_v2 }
 0x584   :  { %v928_v20 = vpop.f32.mrb[8].mxu1 }
 0x585   :  { %v934_v21 = vadd.f32 %v928_v20, %v857_v19  ;;  %v2898_v22 = vpop.f32.mrb[9].mxu1 }
 0x586   :  { %v931_v23 = vpop.f32.mrb[10].mxu1  ;;  %v3036_v22 = vld [vmem:[%s3911_s3 + $0x8] sm:$0xff]  }
 0x587   :  { %v935_v24 = vmul.f32 0.666, %v934_v21  ;;  %v2899_v25 = vpop.f32.mrb[11].mxu1  ;;  %v3035_v21 = vld [vmem:[%s3911_s3] sm:$0xff]   ;;  %v3037_v23 = vld [vmem:[%s3911_s3 + $0x10] sm:$0xff]  }
 0x589   :  { %3095 = vtanh.f32 %v935_v24  ;;  %v1204_v24 = vld [vmem:[%s3914_s6] sm:$0x3] }
 0x58a   :  { %v1209_v25 = vrot.slane %v1204_v24, %v3463_v50 }
 0x593   :  { %v3096_v27 = vpop.eup %3095 }
 0x594   :  { %v937_v28 = vmul.f32 1.7159, %v3096_v27  ;;  %v1213_v27 = vrot.slane %v1204_v24, %v3469_v52  ;;  %v3671_v24 = vld [vmem:[%s3913_s5 + $0x10] ss:$8 sps:$4 sm:$0xff]  }
 0x596   :  { %v938_v29 = vpack.c.bf16 %v937_v28, %v937_v28 }
 0x598   :  { %1080 = vmatmul.mubr.bf16.vlgmr.msra.gmra.mrb[12].mxu1 %v938_v29 }
 0x599   :  { %2920 = vmatprep.mubr.msk.bf16.mxu1 %vm3168_vm0, %v3167_v2  ;;  %2913 = vmatpush3.bf16.msra.mxu1 %v3035_v21  ;;  %v3658_v21 = vld [vmem:[%s3913_s5] ss:$8 sps:$4 sm:$0xff]  }
 0x59a   :  { %2914 = vmatprep.subr.bf16.mxu1 %v3167_v2 }
 0x59d   :  { %2915 = vmatpush3.bf16.msra.mxu1 %v3036_v22 }
 0x59e   :  { %2916 = vmatprep.subr.bf16.mxu1 %v3167_v2 }
 0x5a1   :  { %2917 = vmatpush3.bf16.msra.mxu1 %v3037_v23  ;;  %v3664_v23 = vld [vmem:[%s3913_s5 + $0x14] ss:$8 sps:$4 sm:$0xff]  }
 0x5a2   :  { %2918 = vmatprep.subr.bf16.mxu1 %v3167_v2 }
 0x5a5   :  { %2919 = vmatpush3.bf16.msra.mxu1 %v3038_v33  ;;  %v3720_v33 = vld [vmem:[%s3913_s5 + $0x50] ss:$8 sps:$4 sm:$0xff]  }
 0x5a6   :  { %1545 = vmatprep.subr.bf16.mxu1 %v3342_v55  ;;  %v1355_v55 = vld [vmem:[#allocation2 + $0x8] sm:$0x3] }
 0x66b   :  { %v1081_v37 = vpop.f32.mrb[12].mxu1 }
 0x66c   :  { %v1082_v38 = vadd.f32 %v1081_v37, %v960_v34  ;;  %v1083_v39 = vpop.f32.mrb[13].mxu1 }
 0x66d   :  { %v1084_v40 = vadd.f32 %v1083_v39, %v964_v35  ;;  %v1085_v41 = vpop.f32.mrb[14].mxu1 }
 0x66e   :  { %3097 = vtanh.f32 %v1082_v38  ;;  %v1086_v43 = vpop.f32.mrb[15].mxu1 }
 0x66f   :  { %v2672_v44 = vmul.f32 -1.442695, %v1084_v40 }
 0x671   :  { %3099 = vpow2.f32 %v2672_v44 }
 0x678   :  { %v3098_v45 = vpop.eup %3097 }
 0x679   :  { %1098 = vrot.lane.b32.xlu1 %v3098_v45, %s3172_s27 }
 0x67b   :  { %v3100_v46 = vpop.eup %3099 }
 0x67c   :  { %v1092_v47 = vadd.f32 1.0, %v3100_v46 }
 0x67e   :  { %3101 = vrcp.f32 %v1092_v47 }
 0x688   :  { %v3102_v48 = vpop.eup %3101 }
 0x689   :  { %v1095_v49 = vsub.f32 1.0, %v3102_v48 }
 0x68b   :  { %v1096_v51 = vmul.f32 %v3098_v45, %v1095_v49 }
 0x6eb   :  { %v1099_v53 = vpop.permute.xlu1 %1098 }
 0x6ec   :  { %v1101_v54 = vmul.f32 %v3102_v48, %v1099_v53 }
 0x6ee   :  { %v1102_v9 = vadd.f32 %v1101_v54, %v1096_v51  ;;  %v3042_v54 = vld [vmem:[%s3911_s3 + $0x18] sm:$0xff]  }
 0x6f0   :  { %1104 = vst.msk [vmem:[#allocation3 + $0x4] sm:$0x3] %vm605_vm2, %v1102_v9  ;;  %v1107_v10 = vpack.c.bf16 %v1102_v9, %v1102_v9 }
 0x6f2   :  { %2909 = vmatmul.mubr.msk.bf16.vlgmr.msra.gmra.mrb[12].mxu0 %vm392_vm1, %v1107_v10 }
 0x6f3   :  { %1297 = vmatpush1.bf16.msra.mxu0 %v3347_v56  ;;  %1328 = vmatprep.mubr.bf16.mxu0 %v3170_v8 }
 0x6f4   :  { %1298 = vmatprep.subr.bf16.mxu0 %v3354_v57 }
 0x6f7   :  { %1299 = vmatpush1.bf16.msra.mxu0 %v3359_v58 }
 0x6f8   :  { %1300 = vmatprep.subr.bf16.mxu0 %v3366_v59 }
 0x6fb   :  { %1301 = vmatpush1.bf16.msra.mxu0 %v3371_v60 }
 0x6fc   :  { %1302 = vmatprep.subr.bf16.mxu0 %v3378_v61 }
 0x6ff   :  { %1303 = vmatpush1.bf16.msra.mxu0 %v3383_v62 }
 0x700   :  { %1304 = vmatprep.subr.bf16.mxu0 %v3390_v63 }
 0x703   :  { %1305 = vmatpush1.bf16.msra.mxu0 %v3395_v0 }
 0x704   :  { %1306 = vmatprep.subr.bf16.mxu0 %v3402_v1 }
 0x707   :  { %1307 = vmatpush1.bf16.msra.mxu0 %v3407_v3 }
 0x708   :  { %1308 = vmatprep.subr.bf16.mxu0 %v3414_v4 }
 0x70b   :  { %1309 = vmatpush1.bf16.msra.mxu0 %v3419_v5 }
 0x70c   :  { %1310 = vmatprep.subr.bf16.mxu0 %v3426_v6 }
 0x70f   :  { %1311 = vmatpush1.bf16.msra.mxu0 %v3431_v7 }
 0x710   :  { %2924 = vmatprep.subr.bf16.mxu0 %v3167_v2 }
 0x7c5   :  { %v1177_v12 = vpop.f32.mrb[12].mxu0 }
 0x7c6   :  { %v1183_v13 = vadd.f32 %v1177_v12, %v1106_v11  ;;  %v2910_v15 = vpop.f32.mrb[13].mxu0  ;;  %v3651_v11 = vld [vmem:[%s3913_s5 + $0x4] ss:$8 sps:$4 sm:$0xff]  }
 0x7c7   :  { %v1180_v16 = vpop.f32.mrb[14].mxu0 }
 0x7c8   :  { %v1184_v17 = vmul.f32 0.666, %v1183_v13  ;;  %v2911_v26 = vpop.f32.mrb[15].mxu0 }
 0x7ca   :  { %3103 = vtanh.f32 %v1184_v17 }
 0x7d4   :  { %v3104_v18 = vpop.eup %3103 }
 0x7d5   :  { %v1186_v19 = vmul.f32 1.7159, %v3104_v18 }
 0x7d7   :  { %v1187_v20 = vpack.c.bf16 %v1186_v19, %v1186_v19 }
 0x7d9   :  { %1329 = vmatmul.mubr.bf16.vlgmr.msra.gmra.mrb[16].mxu0 %v1187_v20 }
 0x7da   :  { %2932 = vmatprep.mubr.msk.bf16.mxu0 %vm3168_vm0, %v3167_v2 }
 0x8ac   :  { %v1330_v28 = vpop.f32.mrb[16].mxu0 }
 0x8ad   :  { %v1331_v29 = vadd.f32 %v1330_v28, %v1209_v25  ;;  %v1332_v30 = vpop.f32.mrb[17].mxu0  ;;  %v3678_v25 = vld [vmem:[%s3913_s5 + $0x24] ss:$8 sps:$4 sm:$0xff]   ;;  %v3691_v28 = vld [vmem:[%s3913_s5 + $0x34] ss:$8 sps:$4 sm:$0xff]  }
 0x8ae   :  { %v1333_v31 = vadd.f32 %v1332_v30, %v1213_v27  ;;  %v1334_v32 = vpop.f32.mrb[18].mxu0  ;;  %v3684_v27 = vld [vmem:[%s3913_s5 + $0x20] ss:$8 sps:$4 sm:$0xff]   ;;  %v3703_v30 = vld [vmem:[%s3913_s5 + $0x44] ss:$8 sps:$4 sm:$0xff]  }
 0x8af   :  { %3105 = vtanh.f32 %v1331_v29  ;;  %v1335_v34 = vpop.f32.mrb[19].mxu0  ;;  %v3696_v29 = vld [vmem:[%s3913_s5 + $0x30] ss:$8 sps:$4 sm:$0xff]   ;;  %v3715_v32 = vld [vmem:[%s3913_s5 + $0x54] ss:$8 sps:$4 sm:$0xff]  }
 0x8b0   :  { %v2694_v35 = vmul.f32 -1.442695, %v1333_v31  ;;  %v3708_v31 = vld [vmem:[%s3913_s5 + $0x40] ss:$8 sps:$4 sm:$0xff]   ;;  %v3727_v34 = vld [vmem:[%s3913_s5 + $0x64] ss:$8 sps:$4 sm:$0xff]  }
 0x8b2   :  { %3107 = vpow2.f32 %v2694_v35  ;;  %v3732_v35 = vld [vmem:[%s3913_s5 + $0x60] ss:$8 sps:$4 sm:$0xff]  }
 0x8b9   :  { %v3106_v37 = vpop.eup %3105 }
 0x8ba   :  { %1347 = vrot.lane.b32.xlu1 %v3106_v37, %s3172_s27 }
 0x8bc   :  { %v3108_v38 = vpop.eup %3107 }
 0x8bd   :  { %v1341_v39 = vadd.f32 1.0, %v3108_v38  ;;  %v3744_v38 = vld [vmem:[%s3913_s5 + $0x70] ss:$8 sps:$4 sm:$0xff]  }
 0x8bf   :  { %3109 = vrcp.f32 %v1341_v39  ;;  %v1604_v39 = vld [vmem:[#allocation2 + $0xa] sm:$0x3] }
 0x8c9   :  { %v3110_v40 = vpop.eup %3109 }
 0x8ca   :  { %v1344_v41 = vsub.f32 1.0, %v3110_v40 }
 0x8cc   :  { %v1345_v42 = vmul.f32 %v3106_v37, %v1344_v41  ;;  %v3739_v37 = vld [vmem:[%s3913_s5 + $0x74] ss:$8 sps:$4 sm:$0xff]  }
 0x92c   :  { %v1348_v43 = vpop.permute.xlu1 %1347 }
 0x92d   :  { %v1350_v44 = vmul.f32 %v3110_v40, %v1348_v43 }
 0x92f   :  { %v1351_v45 = vadd.f32 %v1350_v44, %v1345_v42 }
 0x931   :  { %1353 = vst.msk [vmem:[#allocation3 + $0x6] sm:$0x3] %vm605_vm2, %v1351_v45  ;;  %v1356_v46 = vpack.c.bf16 %v1351_v45, %v1351_v45 }
 0x933   :  { %2921 = vmatmul.mubr.msk.bf16.vlgmr.msra.gmra.mrb[16].mxu1 %vm392_vm1, %v1356_v46 }
 0x934   :  { %1546 = vmatpush1.bf16.msra.mxu1 %v3347_v56  ;;  %1577 = vmatprep.mubr.bf16.mxu1 %v3170_v8 }
 0x935   :  { %1547 = vmatprep.subr.bf16.mxu1 %v3354_v57 }
 0x938   :  { %1548 = vmatpush1.bf16.msra.mxu1 %v3359_v58 }
 0x939   :  { %1549 = vmatprep.subr.bf16.mxu1 %v3366_v59 }
 0x93c   :  { %1550 = vmatpush1.bf16.msra.mxu1 %v3371_v60 }
 0x93d   :  { %1551 = vmatprep.subr.bf16.mxu1 %v3378_v61 }
 0x940   :  { %1552 = vmatpush1.bf16.msra.mxu1 %v3383_v62 }
 0x941   :  { %1553 = vmatprep.subr.bf16.mxu1 %v3390_v63 }
 0x944   :  { %1554 = vmatpush1.bf16.msra.mxu1 %v3395_v0 }
 0x945   :  { %1555 = vmatprep.subr.bf16.mxu1 %v3402_v1  ;;  %v3039_v1 = vld [vmem:[%s3911_s3] sm:$0xff]  }
 0x946   :  { %2925 = vmatpush3.bf16.msra.mxu0 %v3039_v1 }
 0x947   :  { %2926 = vmatprep.subr.bf16.mxu0 %v3167_v2 }
 0x948   :  { %1556 = vmatpush1.bf16.msra.mxu1 %v3407_v3  ;;  %v3040_v3 = vld [vmem:[%s3911_s3 + $0x8] sm:$0xff]  }
 0x949   :  { %1557 = vmatprep.subr.bf16.mxu1 %v3414_v4  ;;  %v3041_v4 = vld [vmem:[%s3911_s3 + $0x10] sm:$0xff]  }
 0x94a   :  { %2927 = vmatpush3.bf16.msra.mxu0 %v3040_v3 }
 0x94b   :  { %2928 = vmatprep.subr.bf16.mxu0 %v3167_v2 }
 0x94c   :  { %1558 = vmatpush1.bf16.msra.mxu1 %v3419_v5  ;;  %v1453_v5 = vld [vmem:[%s3914_s6] sm:$0x3] }
 0x94d   :  { %1559 = vmatprep.subr.bf16.mxu1 %v3426_v6  ;;  %v1458_v6 = vrot.slane %v1453_v5, %v3463_v50 }
 0x94e   :  { %2929 = vmatpush3.bf16.msra.mxu0 %v3041_v4 }
 0x94f   :  { %2930 = vmatprep.subr.bf16.mxu0 %v3167_v2 }
 0x950   :  { %1560 = vmatpush1.bf16.msra.mxu1 %v3431_v7  ;;  %v1462_v7 = vrot.slane %v1453_v5, %v3469_v52  ;;  %v3070_v5 = vld [vmem:[%s3911_s3 + $0x18] sm:$0xff]  }
 0x951   :  { %2936 = vmatprep.subr.bf16.mxu1 %v3167_v2 }
 0x952   :  { %2931 = vmatpush3.bf16.msra.mxu0 %v3042_v54 }
 0x953   :  { %1794 = vmatprep.subr.bf16.mxu0 %v3651_v11 }
 0xa06   :  { %v1426_v56 = vpop.f32.mrb[16].mxu1 }
 0xa07   :  { %v1432_v57 = vadd.f32 %v1426_v56, %v1355_v55  ;;  %v2922_v58 = vpop.f32.mrb[17].mxu1 }
 0xa08   :  { %v1429_v59 = vpop.f32.mrb[18].mxu1  ;;  %v3068_v58 = vld [vmem:[%s3911_s3 + $0x8] sm:$0xff]  }
 0xa09   :  { %v1433_v60 = vmul.f32 0.666, %v1432_v57  ;;  %v2923_v61 = vpop.f32.mrb[19].mxu1  ;;  %v3067_v57 = vld [vmem:[%s3911_s3] sm:$0xff]   ;;  %v3069_v59 = vld [vmem:[%s3911_s3 + $0x10] sm:$0xff]  }
 0xa0b   :  { %3111 = vtanh.f32 %v1433_v60  ;;  %v1702_v60 = vld [vmem:[%s3914_s6] sm:$0x3] }
 0xa0c   :  { %v1707_v61 = vrot.slane %v1702_v60, %v3463_v50 }
 0xa15   :  { %v3112_v62 = vpop.eup %3111 }
 0xa16   :  { %v1435_v63 = vmul.f32 1.7159, %v3112_v62  ;;  %v1711_v62 = vrot.slane %v1702_v60, %v3469_v52  ;;  %v3074_v60 = vld [vmem:[%s3911_s3 + $0x18] sm:$0xff]  }
 0xa18   :  { %v1436_v0 = vpack.c.bf16 %v1435_v63, %v1435_v63 }
 0xa1a   :  { %1578 = vmatmul.mubr.bf16.vlgmr.msra.gmra.mrb[20].mxu1 %v1436_v0 }
 0xa1b   :  { %2944 = vmatprep.mubr.msk.bf16.mxu1 %vm3168_vm0, %v3167_v2  ;;  %2937 = vmatpush3.bf16.msra.mxu1 %v3067_v57 }
 0xa1c   :  { %2938 = vmatprep.subr.bf16.mxu1 %v3167_v2 }
 0xa1f   :  { %2939 = vmatpush3.bf16.msra.mxu1 %v3068_v58 }
 0xa20   :  { %2940 = vmatprep.subr.bf16.mxu1 %v3167_v2 }
 0xa23   :  { %2941 = vmatpush3.bf16.msra.mxu1 %v3069_v59 }
 0xa24   :  { %2942 = vmatprep.subr.bf16.mxu1 %v3167_v2 }
 0xa27   :  { %2943 = vmatpush3.bf16.msra.mxu1 %v3070_v5 }
 0xa28   :  { %2043 = vmatprep.subr.bf16.mxu1 %v3651_v11 }
 0xaed   :  { %v1579_v47 = vpop.f32.mrb[20].mxu1 }
 0xaee   :  { %v1580_v48 = vadd.f32 %v1579_v47, %v1458_v6  ;;  %v1581_v49 = vpop.f32.mrb[21].mxu1 }
 0xaef   :  { %v1582_v51 = vadd.f32 %v1581_v49, %v1462_v7  ;;  %v1583_v53 = vpop.f32.mrb[22].mxu1 }
 0xaf0   :  { %3113 = vtanh.f32 %v1580_v48  ;;  %v1584_v9 = vpop.f32.mrb[23].mxu1 }
 0xaf1   :  { %v2716_v10 = vmul.f32 -1.442695, %v1582_v51 }
 0xaf3   :  { %3115 = vpow2.f32 %v2716_v10 }
 0xafa   :  { %v3114_v12 = vpop.eup %3113 }
 0xafb   :  { %1596 = vrot.lane.b32.xlu0 %v3114_v12, %s3172_s27 }
 0xafd   :  { %v3116_v13 = vpop.eup %3115 }
 0xafe   :  { %v1590_v15 = vadd.f32 1.0, %v3116_v13 }
 0xb00   :  { %3117 = vrcp.f32 %v1590_v15  ;;  %v1853_v15 = vld [vmem:[#allocation2 + $0xc] sm:$0x3] }
 0xb0a   :  { %v3118_v16 = vpop.eup %3117 }
 0xb0b   :  { %v1593_v17 = vsub.f32 1.0, %v3118_v16 }
 0xb0d   :  { %v1594_v26 = vmul.f32 %v3114_v12, %v1593_v17 }
 0xb6d   :  { %v1597_v18 = vpop.permute.xlu0 %1596 }
 0xb6e   :  { %v1599_v19 = vmul.f32 %v3118_v16, %v1597_v18 }
 0xb70   :  { %v1600_v20 = vadd.f32 %v1599_v19, %v1594_v26 }
 0xb72   :  { %1602 = vst.msk [vmem:[#allocation3 + $0x8] sm:$0x3] %vm605_vm2, %v1600_v20  ;;  %v1605_v22 = vpack.c.bf16 %v1600_v20, %v1600_v20 }
 0xb74   :  { %2933 = vmatmul.mubr.msk.bf16.vlgmr.msra.gmra.mrb[20].mxu0 %vm392_vm1, %v1605_v22 }
 0xb75   :  { %1795 = vmatpush1.bf16.msra.mxu0 %v3658_v21  ;;  %1826 = vmatprep.mubr.bf16.mxu0 %v3170_v8 }
 0xb76   :  { %1796 = vmatprep.subr.bf16.mxu0 %v3664_v23 }
 0xb79   :  { %1797 = vmatpush1.bf16.msra.mxu0 %v3671_v24 }
 0xb7a   :  { %1798 = vmatprep.subr.bf16.mxu0 %v3678_v25 }
 0xb7d   :  { %1799 = vmatpush1.bf16.msra.mxu0 %v3684_v27 }
 0xb7e   :  { %1800 = vmatprep.subr.bf16.mxu0 %v3691_v28 }
 0xb81   :  { %1801 = vmatpush1.bf16.msra.mxu0 %v3696_v29 }
 0xb82   :  { %1802 = vmatprep.subr.bf16.mxu0 %v3703_v30 }
 0xb85   :  { %1803 = vmatpush1.bf16.msra.mxu0 %v3708_v31 }
 0xb86   :  { %1804 = vmatprep.subr.bf16.mxu0 %v3715_v32 }
 0xb89   :  { %1805 = vmatpush1.bf16.msra.mxu0 %v3720_v33 }
 0xb8a   :  { %1806 = vmatprep.subr.bf16.mxu0 %v3727_v34 }
 0xb8d   :  { %1807 = vmatpush1.bf16.msra.mxu0 %v3732_v35 }
 0xb8e   :  { %1808 = vmatprep.subr.bf16.mxu0 %v3739_v37 }
 0xb91   :  { %1809 = vmatpush1.bf16.msra.mxu0 %v3744_v38 }
 0xb92   :  { %2948 = vmatprep.subr.bf16.mxu0 %v3167_v2 }
 0xc47   :  { %v1675_v40 = vpop.f32.mrb[20].mxu0 }
 0xc48   :  { %v1681_v41 = vadd.f32 %v1675_v40, %v1604_v39  ;;  %v2934_v42 = vpop.f32.mrb[21].mxu0 }
 0xc49   :  { %v1678_v43 = vpop.f32.mrb[22].mxu0  ;;  %v3072_v42 = vld [vmem:[%s3911_s3 + $0x8] sm:$0xff]  }
 0xc4a   :  { %v1682_v44 = vmul.f32 0.666, %v1681_v41  ;;  %v2935_v45 = vpop.f32.mrb[23].mxu0  ;;  %v3071_v41 = vld [vmem:[%s3911_s3] sm:$0xff]   ;;  %v3073_v43 = vld [vmem:[%s3911_s3 + $0x10] sm:$0xff]  }
 0xc4c   :  { %3119 = vtanh.f32 %v1682_v44  ;;  %v1951_v44 = vld [vmem:[%s3914_s6] sm:$0x3] }
 0xc4d   :  { %v1956_v45 = vrot.slane %v1951_v44, %v3463_v50 }
 0xc56   :  { %v3120_v46 = vpop.eup %3119 }
 0xc57   :  { %v1684_v55 = vmul.f32 1.7159, %v3120_v46  ;;  %v1960_v46 = vrot.slane %v1951_v44, %v3469_v52 }
 0xc59   :  { %v1685_v56 = vpack.c.bf16 %v1684_v55, %v1684_v55 }
 0xc5b   :  { %1827 = vmatmul.mubr.bf16.vlgmr.msra.gmra.mrb[24].mxu0 %v1685_v56 }
 0xc5c   :  { %2956 = vmatprep.mubr.msk.bf16.mxu0 %vm3168_vm0, %v3167_v2  ;;  %2949 = vmatpush3.bf16.msra.mxu0 %v3071_v41  ;;  %v2351_v41 = vld [vmem:[#allocation3] sm:$0x3] }
 0xc5d   :  { %2950 = vmatprep.subr.bf16.mxu0 %v3167_v2 }
 0xc60   :  { %2951 = vmatpush3.bf16.msra.mxu0 %v3072_v42 }
 0xc61   :  { %2952 = vmatprep.subr.bf16.mxu0 %v3167_v2 }
 0xc64   :  { %2953 = vmatpush3.bf16.msra.mxu0 %v3073_v43  ;;  %v2355_v43 = vld [vmem:[#allocation3 + $0x8] sm:$0x3] }
 0xc65   :  { %2954 = vmatprep.subr.bf16.mxu0 %v3167_v2 }
 0xc68   :  { %2955 = vmatpush3.bf16.msra.mxu0 %v3074_v60 }
 0xc69   :  { %2292 = vmatprep.subr.bf16.mxu0 %v3651_v11 }
 0xd2e   :  { %v1828_v63 = vpop.f32.mrb[24].mxu0 }
 0xd2f   :  { %v1829_v0 = vadd.f32 %v1828_v63, %v1707_v61  ;;  %v1830_v1 = vpop.f32.mrb[25].mxu0 }
 0xd30   :  { %v1831_v3 = vadd.f32 %v1830_v1, %v1711_v62  ;;  %v1832_v4 = vpop.f32.mrb[26].mxu0 }
 0xd31   :  { %3121 = vtanh.f32 %v1829_v0  ;;  %v1833_v6 = vpop.f32.mrb[27].mxu0 }
 0xd32   :  { %v2738_v7 = vmul.f32 -1.442695, %v1831_v3 }
 0xd34   :  { %3123 = vpow2.f32 %v2738_v7 }
 0xd3b   :  { %v3122_v47 = vpop.eup %3121 }
 0xd3c   :  { %1845 = vrot.lane.b32.xlu1 %v3122_v47, %s3172_s27 }
 0xd3e   :  { %v3124_v48 = vpop.eup %3123 }
 0xd3f   :  { %v1839_v49 = vadd.f32 1.0, %v3124_v48 }
 0xd41   :  { %3125 = vrcp.f32 %v1839_v49 }
 0xd4b   :  { %v3126_v51 = vpop.eup %3125 }
 0xd4c   :  { %v1842_v53 = vsub.f32 1.0, %v3126_v51 }
 0xd4e   :  { %v1843_v54 = vmul.f32 %v3122_v47, %v1842_v53 }
 0xdae   :  { %v1846_v9 = vpop.permute.xlu1 %1845 }
 0xdaf   :  { %v1848_v10 = vmul.f32 %v3126_v51, %v1846_v9 }
 0xdb1   :  { %v1849_v12 = vadd.f32 %v1848_v10, %v1843_v54  ;;  %v3075_v54 = vld [vmem:[%s3915_s7] sm:$0xff]   ;;  %v3078_v10 = vld [vmem:[%s3915_s7 + $0x18] sm:$0xff]  }
 0xdb3   :  { %1851 = vst.msk [vmem:[#allocation3 + $0xa] sm:$0x3] %vm605_vm2, %v1849_v12  ;;  %v1854_v13 = vpack.c.bf16 %v1849_v12, %v1849_v12 }
 0xdb5   :  { %2945 = vmatmul.mubr.msk.bf16.vlgmr.msra.gmra.mrb[24].mxu1 %vm392_vm1, %v1854_v13 }
 0xdb6   :  { %2044 = vmatpush1.bf16.msra.mxu1 %v3658_v21  ;;  %2075 = vmatprep.mubr.bf16.mxu1 %v3170_v8 }
 0xdb7   :  { %2045 = vmatprep.subr.bf16.mxu1 %v3664_v23 }
 0xdba   :  { %2046 = vmatpush1.bf16.msra.mxu1 %v3671_v24  ;;  %v2356_v42 = vld [vmem:[#allocation3 + $0xa] sm:$0x3] }
 0xdbb   :  { %2047 = vmatprep.subr.bf16.mxu1 %v3678_v25  ;;  %v2786_v44 = vpack.c.bf16 %v2356_v42, %v2355_v43 }
 0xdbe   :  { %2048 = vmatpush1.bf16.msra.mxu1 %v3684_v27 }
 0xdbf   :  { %2049 = vmatprep.subr.bf16.mxu1 %v3691_v28 }
 0xdc2   :  { %2050 = vmatpush1.bf16.msra.mxu1 %v3696_v29 }
 0xdc3   :  { %2051 = vmatprep.subr.bf16.mxu1 %v3703_v30 }
 0xdc6   :  { %2052 = vmatpush1.bf16.msra.mxu1 %v3708_v31 }
 0xdc7   :  { %2053 = vmatprep.subr.bf16.mxu1 %v3715_v32 }
 0xdca   :  { %2054 = vmatpush1.bf16.msra.mxu1 %v3720_v33 }
 0xdcb   :  { %2055 = vmatprep.subr.bf16.mxu1 %v3727_v34 }
 0xdce   :  { %2056 = vmatpush1.bf16.msra.mxu1 %v3732_v35 }
 0xdcf   :  { %2057 = vmatprep.subr.bf16.mxu1 %v3739_v37 }
 0xdd2   :  { %2058 = vmatpush1.bf16.msra.mxu1 %v3744_v38 }
 0xdd3   :  { %2960 = vmatprep.subr.bf16.mxu1 %v3167_v2 }
 0xe88   :  { %v1924_v16 = vpop.f32.mrb[24].mxu1 }
 0xe89   :  { %v1930_v17 = vadd.f32 %v1924_v16, %v1853_v15  ;;  %v2946_v26 = vpop.f32.mrb[25].mxu1 }
 0xe8a   :  { %v1927_v18 = vpop.f32.mrb[26].mxu1 }
 0xe8b   :  { %v1931_v19 = vmul.f32 0.666, %v1930_v17  ;;  %v2947_v20 = vpop.f32.mrb[27].mxu1 }
 0xe8c   :  { %v2354_v20 = vld [vmem:[#allocation3 + $0x6] sm:$0x3] }
 0xe8d   :  { %3127 = vtanh.f32 %v1931_v19 }
 0xe97   :  { %v3128_v22 = vpop.eup %3127 }
 0xe98   :  { %v1933_v39 = vmul.f32 1.7159, %v3128_v22  ;;  %v2352_v22 = vld [vmem:[#allocation3 + $0x2] sm:$0x3] }
 0xe9a   :  { %v1934_v40 = vpack.c.bf16 %v1933_v39, %v1933_v39  ;;  %v2353_v39 = vld [vmem:[#allocation3 + $0x4] sm:$0x3] }
 0xe9c   :  { %2076 = vmatmul.mubr.bf16.vlgmr.msra.gmra.mrb[28].mxu1 %v1934_v40  ;;  %v2785_v40 = vpack.c.bf16 %v2354_v20, %v2353_v39 }
 0xe9d   :  { %2968 = vmatprep.mubr.msk.bf16.mxu1 %vm3168_vm0, %v3167_v2  ;;  %2961 = vmatpush3.bf16.msra.mxu1 %v3075_v54 }
 0xe9e   :  { %2962 = vmatprep.subr.bf16.mxu1 %v3167_v2 }
 0xf6f   :  { %v2077_v55 = vpop.f32.mrb[28].mxu1 }
 0xf70   :  { %v2078_v56 = vadd.f32 %v2077_v55, %v1956_v45  ;;  %v2079_v57 = vpop.f32.mrb[29].mxu1  ;;  %v2406_v45 = vrot.slane %v2785_v40, %v3315_v36 }
 0xf71   :  { %v2080_v58 = vadd.f32 %v2079_v57, %v1960_v46  ;;  %v2081_v59 = vpop.f32.mrb[30].mxu1 }
 0xf72   :  { %3129 = vtanh.f32 %v2078_v56  ;;  %v2082_v61 = vpop.f32.mrb[31].mxu1 }
 0xf73   :  { %v2760_v62 = vmul.f32 -1.442695, %v2080_v58  ;;  %v2413_v58 = vrot.slane %v2786_v44, %v3315_v36 }
 0xf75   :  { %3131 = vpow2.f32 %v2760_v62 }
 0xf7c   :  { %v3130_v63 = vpop.eup %3129 }
 0xf7d   :  { %2094 = vrot.lane.b32.xlu0 %v3130_v63, %s3172_s27 }
 0xf7f   :  { %v3132_v0 = vpop.eup %3131 }
 0xf80   :  { %v2088_v1 = vadd.f32 1.0, %v3132_v0 }
 0xf82   :  { %3133 = vrcp.f32 %v2088_v1 }
 0xf8c   :  { %v3134_v3 = vpop.eup %3133 }
 0xf8d   :  { %v2091_v4 = vsub.f32 1.0, %v3134_v3 }
 0xf8f   :  { %v2092_v5 = vmul.f32 %v3130_v63, %v2091_v4 }
 0xfef   :  { %v2095_v6 = vpop.permute.xlu0 %2094 }
 0xff0   :  { %v2097_v7 = vmul.f32 %v3134_v3, %v2095_v6 }
 0xff2   :  { %v2098_v47 = vadd.f32 %v2097_v7, %v2092_v5 }
 0xff4   :  { %2100 = vst.msk [vmem:[#allocation3 + $0xc] sm:$0x3] %vm605_vm2, %v2098_v47  ;;  %v2103_v48 = vpack.c.bf16 %v2098_v47, %v2098_v47 }
 0xff6   :  { %2957 = vmatmul.mubr.msk.bf16.vlgmr.msra.gmra.mrb[28].mxu0 %vm392_vm1, %v2103_v48 }
 0xff7   :  { %2293 = vmatpush1.bf16.msra.mxu0 %v3658_v21  ;;  %2324 = vmatprep.mubr.bf16.mxu0 %v3170_v8  ;;  %v2102_v8 = vld [vmem:[#allocation2 + $0xe] sm:$0x3] }
 0xff8   :  { %2294 = vmatprep.subr.bf16.mxu0 %v3664_v23 }
 0xffb   :  { %2295 = vmatpush1.bf16.msra.mxu0 %v3671_v24  ;;  %v2357_v46 = vld [vmem:[#allocation3 + $0xc] sm:$0x3] }
 0xffc   :  { %2296 = vmatprep.subr.bf16.mxu0 %v3678_v25 }
 0xfff   :  { %2297 = vmatpush1.bf16.msra.mxu0 %v3684_v27 }
0x1000   :  { %2298 = vmatprep.subr.bf16.mxu0 %v3691_v28 }
0x1003   :  { %2299 = vmatpush1.bf16.msra.mxu0 %v3696_v29 }
0x1004   :  { %2300 = vmatprep.subr.bf16.mxu0 %v3703_v30 }
0x1007   :  { %2301 = vmatpush1.bf16.msra.mxu0 %v3708_v31  ;;  %v2200_v31 = vld [vmem:[%s3914_s6] sm:$0x3] }
0x1008   :  { %2302 = vmatprep.subr.bf16.mxu0 %v3715_v32  ;;  %v2205_v32 = vrot.slane %v2200_v31, %v3463_v50  ;;  %v3076_v50 = vld [vmem:[%s3915_s7 + $0x8] sm:$0xff]  }
0x1009   :  { %2963 = vmatpush3.bf16.msra.mxu1 %v3076_v50 }
0x100a   :  { %2964 = vmatprep.subr.bf16.mxu1 %v3167_v2 }
0x100b   :  { %2303 = vmatpush1.bf16.msra.mxu0 %v3720_v33  ;;  %v2209_v33 = vrot.slane %v2200_v31, %v3469_v52  ;;  %v3077_v52 = vld [vmem:[%s3915_s7 + $0x10] sm:$0xff]   ;;  %s3173_s7 = smov [#allocation4]  }
0x100c   :  { %2304 = vmatprep.subr.bf16.mxu0 %v3727_v34 }
0x100d   :  { %2965 = vmatpush3.bf16.msra.mxu1 %v3077_v52 }
0x100e   :  { %2966 = vmatprep.subr.bf16.mxu1 %v3167_v2  ;;  %v2784_v2 = vpack.c.bf16 %v2352_v22, %v2351_v41 }
0x100f   :  { %2305 = vmatpush1.bf16.msra.mxu0 %v3732_v35 }
0x1010   :  { %2306 = vmatprep.subr.bf16.mxu0 %v3739_v37  ;;  %v2399_v57 = vrot.slane %v2784_v2, %v3315_v36 }
0x1011   :  { %2967 = vmatpush3.bf16.msra.mxu1 %v3078_v10 }
0x1012   :  { %v2421_v60 = vcombine.low %v2399_v57, %v2406_v45 }
0x1013   :  { %2307 = vmatpush1.bf16.msra.mxu0 %v3744_v38 }
0x1014   :  { %v2429_v62 = vrot.slane %v2421_v60, %v3315_v36 }
0x10c9   :  { %v2173_v11 = vpop.f32.mrb[28].mxu0 }
0x10ca   :  { %v2179_v21 = vadd.f32 %v2173_v11, %v2102_v8  ;;  %v2958_v23 = vpop.f32.mrb[29].mxu0 }
0x10cb   :  { %v2176_v24 = vpop.f32.mrb[30].mxu0 }
0x10cc   :  { %v2180_v25 = vmul.f32 0.666, %v2179_v21  ;;  %v2959_v27 = vpop.f32.mrb[31].mxu0 }
0x10ce   :  { %3135 = vtanh.f32 %v2180_v25 }
0x10d8   :  { %v3136_v28 = vpop.eup %3135 }
0x10d9   :  { %v2182_v29 = vmul.f32 1.7159, %v3136_v28 }
0x10db   :  { %v2183_v30 = vpack.c.bf16 %v2182_v29, %v2182_v29 }
0x10dd   :  { %2325 = vmatmul.mubr.bf16.vlgmr.msra.gmra.mrb[32].mxu0 %v2183_v30 }
0x11b0   :  { %v2326_v34 = vpop.f32.mrb[32].mxu0 }
0x11b1   :  { %v2327_v35 = vadd.f32 %v2326_v34, %v2205_v32  ;;  %v2328_v37 = vpop.f32.mrb[33].mxu0 }
0x11b2   :  { %v2329_v38 = vadd.f32 %v2328_v37, %v2209_v33  ;;  %v2330_v49 = vpop.f32.mrb[34].mxu0 }
0x11b3   :  { %3137 = vtanh.f32 %v2327_v35  ;;  %v2331_v51 = vpop.f32.mrb[35].mxu0 }
0x11b4   :  { %v2782_v53 = vmul.f32 -1.442695, %v2329_v38 }
0x11b6   :  { %3139 = vpow2.f32 %v2782_v53 }
0x11bd   :  { %v3138_v9 = vpop.eup %3137 }
0x11be   :  { %2343 = vrot.lane.b32.xlu1 %v3138_v9, %s3172_s27  ;;  %s2576_s27 = sshll.u32 %s3173_s7, 4  ;;  %s2577_s27 = int_to_ptr.vmem [resolvable:$true] %s2576_s27 }
0x11bf   :  { %s3143_s12 = scalar_lea.vmem %s2577_s27, 32  ;;  %p3148_p1 = scmp.lt.s32.totalorder %s2577_s27, %s2577_s27 }
0x11c0   :  { %v3140_v12 = vpop.eup %3139  ;;  %p3144_p0 = scmp.ne.s32.totalorder %s2577_s27, %s3143_s12  ;;  %p3149_p2 = scmp.lt.s32.totalorder %s3143_s12, %s3143_s12 }
0x11c1   :  { %v2337_v13 = vadd.f32 1.0, %v3140_v12 }
0x11c2   :  { %p3150_p3 = por %p3149_p2, %p3148_p1 }
0x11c3   :  { %3141 = vrcp.f32 %v2337_v13 }
0x11c4   :  { %p3151_p4 = pnand %p3150_p3, %p3144_p0 }
0x11cd   :  { %v3142_v15 = vpop.eup %3141 }
0x11ce   :  { %v2340_v16 = vsub.f32 1.0, %v3142_v15 }
0x11d0   :  { %v2341_v17 = vmul.f32 %v3138_v9, %v2340_v16 }
0x1230   :  { %v2344_v26 = vpop.permute.xlu1 %2343 }
0x1231   :  { %v2346_v18 = vmul.f32 %v3142_v15, %v2344_v26 }
0x1233   :  { %v2347_v19 = vadd.f32 %v2346_v18, %v2341_v17 }
0x1235   :  { %2349 = vst.msk [vmem:[#allocation3 + $0xe] sm:$0x3] %vm605_vm2, %v2347_v19  ;;  %2350 = vst.msk [vmem:[#allocation4] sm:$0x3] %vm605_vm2, %v2347_v19 }
0x123c   :  { %v2358_v55 = vld [vmem:[#allocation3 + $0xe] sm:$0x3] }
0x123d   :  { %v2787_v56 = vpack.c.bf16 %v2358_v55, %v2357_v46 }
0x123f   :  { %v2420_v59 = vrot.slane %v2787_v56, %v3315_v36 }
0x1241   :  { %v2422_v61 = vcombine.low %v2413_v58, %v2420_v59 }
0x1243   :  { %v2436_v63 = vrot.slane %v2422_v61, %v3315_v36 }
0x1245   :  { %v2437_v0 = vcombine.low %v2429_v62, %v2436_v63 }
0x1247   :  { %2969 = vmatmul.mubr.msk.bf16.vlgmr.msra.gmra.mrb[32].mxu1 %vm392_vm1, %v2437_v0 }
0x1248   :  { %3154 = shalt.err (!%p3151_p4)
}
0x1249   :  { %s3155_s15 = scalar_lea.hbm %s3918_s10, 32 }
0x124a   :  { %p3156_p5 = scmp.ne.s32.totalorder %s3918_s10, %s3155_s15  ;;  %p3159_p6 = scmp.lt.u32.totalorder %s3155_s15, %s3918_s10 }
0x124c   :  { %p3161_p7 = pnand %p3159_p6, %p3156_p5 }
0x124e   :  { %3164 = shalt.err (!%p3161_p7)
}
0x124f   :  { %2579 = dma.vmem_to_hbm [thread:$0]  %s2577_s27, 32, %s3918_s10, [#allocation5]   ;;  %v2783_v36 = vld [vmem:[%s3916_s8] ss:$0 sm:$0xff] }
0x1250   :  { %v2462_v1 = vcombine.low %v2783_v36, %v2783_v36 }
0x1252   :  { %v2469_v3 = vrot.slane %v2462_v1, %v3441_v14 }
0x1254   :  { %v2470_v4 = vcombine.low %v2469_v3, %v2469_v3 }
0x131a   :  { %v2509_v5 = vpop.f32.mrb[32].mxu1 }
0x131b   :  { %v2510_v6 = vadd.f32 %v2509_v5, %v2470_v4  ;;  %v2970_v7 = vpop.f32.mrb[33].mxu1 }
0x131c   :  { %v2512_v47 = vpop.f32.mrb[34].mxu1 }
0x131d   :  { %v2518_v48 = vcombine.high %v2510_v6, %v2510_v6  ;;  %v2525_v8 = vrot.slane %v2510_v6, %v3441_v14  ;;  %2793 = vst.sshfl [vmem:[%s3917_s9] sm:$0x3 pattern:$0x76325410] %v2510_v6  ;;  %v2513_v11 = vadd.f32 %v2512_v47, %v2470_v4  ;;  %v2971_v21 = vpop.f32.mrb[35].mxu1 }
0x131f   :  { %v2532_v23 = vrot.slane %v2518_v48, %v3441_v14  ;;  %v2533_v24 = vcombine.high %v2525_v8, %v2525_v8  ;;  %2794 = vst.sshfl [vmem:[%s3917_s9 + $0x4] sm:$0x3 pattern:$0x76325410] %v2518_v48  ;;  %v2535_v25 = vcombine.high %v2513_v11, %v2513_v11  ;;  %v2542_v27 = vrot.slane %v2513_v11, %v3441_v14 }
0x1320   :  { %2795 = vst.sshfl [vmem:[%s3917_s9 + $0x8] sm:$0x3 pattern:$0x76325410] %v2513_v11 }
0x1321   :  { %v2534_v28 = vcombine.high %v2532_v23, %v2532_v23  ;;  %2561 = vst [vmem:[%s3917_s9 + $0x2] sm:$0x3] %v2533_v24  ;;  %v2549_v29 = vrot.slane %v2535_v25, %v3441_v14  ;;  %v2550_v30 = vcombine.high %v2542_v27, %v2542_v27  ;;  %2796 = vst.sshfl [vmem:[%s3917_s9 + $0xc] sm:$0x3 pattern:$0x76325410] %v2535_v25 }
0x1323   :  { %2563 = vst [vmem:[%s3917_s9 + $0x6] sm:$0x3] %v2534_v28  ;;  %v2551_v31 = vcombine.high %v2549_v29, %v2549_v29  ;;  %2565 = vst [vmem:[%s3917_s9 + $0xa] sm:$0x3] %v2550_v30 }
0x1325   :  { %2567 = vst [vmem:[%s3917_s9 + $0xe] sm:$0x3] %v2551_v31 }
0x1326   :  { %3165 = dma.done.wait [#allocation5], 32  }
0x1327   :  { %3166 = vsyncadd [#allocation5], 4294967264 }
0x1328   :  { %2585 = vsyncpa [#allocation5], 1 }

</bundles_post_ra>
